<compile_context>
chip_gen: v7x
topology: tpu7x:2x2x1
jax: 0.10.0
libtpu: 0.0.40
codegen_flags: <defaults>
</compile_context>

<pallas_src>
import jax
import jax.numpy as jnp
from jax.experimental import pallas as pl
from jax.experimental.pallas import tpu as pltpu

ORIGIN_DIM = 1024      # hard-coded in STEmbedder (ScalingLayer origin_dim)
SCALING_DIM = 1792     # hard-coded in STEmbedder (ScalingLayer scaling_dim)
PAD_TOKEN_ID = 0
BATCH_TILE = 8                       # fills all 8 vreg sublanes per grid step
_SEQ_TILE_BYTES = 4 * 1024 * 1024    # per-buffer budget for the hidden tile
_VMEM_LIMIT = 32 * 1024 * 1024       # safe on v5e/v6e (128 MiB) and v7x (64 MiB)


def _round_up(x, m):
    return (x + m - 1) // m * m


def _pick_seq_tile(seq_len, batch_tile, hidden, bytes_per_elem=2,
                   budget=_SEQ_TILE_BYTES):
    """Largest S tile (multiple of 8, divisor of S) whose block fits the budget."""
    max_ts = max(8, budget // (batch_tile * hidden * bytes_per_elem))
    if seq_len <= max_ts:
        return seq_len
    for ts in range(min(max_ts, seq_len), 7, -1):
        if seq_len % ts == 0 and ts % 8 == 0:
            return ts
    # TODO(synk): S with no multiple-of-8 divisor falls back to one big S tile.
    return seq_len


# ----------------------------------------------------------------------------
# Kernel 1 (fused): masked mean pool -> bf16 -> ScalingLayer matmul (+bias)
# ----------------------------------------------------------------------------
def fused_pool_scale_kernel(h_ref, invn_ref, w_ref, b_ref, o_ref, acc_ref):
    st = pl.program_id(1)

    @pl.when(st == 0)
    def _():
        acc_ref[...] = jnp.zeros_like(acc_ref)

    # Pad-token rows of the hidden states are zero (masked upstream), so a
    # plain sum over this S tile IS the masked sum.  Accumulate in f32.
    acc_ref[...] += jnp.sum(h_ref[...], axis=1, dtype=jnp.float32)   # (TB, H)

    @pl.when(st == pl.num_programs(1) - 1)
    def _():
        pooled = acc_ref[...] * invn_ref[...]            # (TB,H) * (TB,1) mean
        # TODO(synk): torch uses .half() (fp16); TPU MXU path uses bf16 + f32 acc.
        x = pooled.astype(jnp.bfloat16)
        o_ref[...] = (
            jnp.dot(x, w_ref[...], preferred_element_type=jnp.float32)
            + b_ref[...]
        )


def fused_mean_pool_scale(hidden_bf16, inv_counts, w_bf16, b_f32,
                          *, batch_tile=BATCH_TILE):
    """hidden_bf16: (Bp, S, 1024) bf16, pad rows already zero.
    inv_counts:   (Bp, 1) f32 (1 / valid-token count per row).
    w_bf16:       (1024, 1792) bf16 (pre-transposed).
    b_f32:        (1, 1792) f32.
    Returns (Bp, 1792) f32."""
    Bp, S, H = hidden_bf16.shape
    d_in, d_out = w_bf16.shape
    assert H == d_in and Bp % batch_tile == 0

    seq_tile = _pick_seq_tile(S, batch_tile, H)
    n_bt = Bp // batch_tile
    n_st = S // seq_tile

    return pl.pallas_call(
        fused_pool_scale_kernel,
        out_shape=jax.ShapeDtypeStruct((Bp, d_out), jnp.float32),
        grid_spec=pltpu.PrefetchScalarGridSpec(
            num_scalar_prefetch=0,
            grid=(n_bt, n_st),
            in_specs=[
                pl.BlockSpec((batch_tile, seq_tile, H),
                             lambda bt, st: (bt, st, 0)),
                pl.BlockSpec((batch_tile, 1), lambda bt, st: (bt, 0)),
                pl.BlockSpec((d_in, d_out), lambda bt, st: (0, 0)),   # resident
                pl.BlockSpec((1, d_out), lambda bt, st: (0, 0)),      # resident
            ],
            out_specs=pl.BlockSpec((batch_tile, d_out), lambda bt, st: (bt, 0)),
            scratch_shapes=[pltpu.VMEM((batch_tile, H), jnp.float32)],
        ),
        compiler_params=pltpu.CompilerParams(
            dimension_semantics=("parallel", "arbitrary"),
            vmem_limit_bytes=_VMEM_LIMIT,
        ),
    )(hidden_bf16, inv_counts, w_bf16, b_f32)


# ----------------------------------------------------------------------------
# Kernel 2: masked mean pool only (add_scaling_layer=False path)
# ----------------------------------------------------------------------------
def mean_pool_kernel(h_ref, invn_ref, o_ref, acc_ref):
    st = pl.program_id(1)

    @pl.when(st == 0)
    def _():
        acc_ref[...] = jnp.zeros_like(acc_ref)

    acc_ref[...] += jnp.sum(h_ref[...], axis=1, dtype=jnp.float32)

    @pl.when(st == pl.num_programs(1) - 1)
    def _():
        o_ref[...] = acc_ref[...] * invn_ref[...]


def mean_pool(hidden_bf16, inv_counts, *, batch_tile=BATCH_TILE):
    Bp, S, H = hidden_bf16.shape
    assert Bp % batch_tile == 0
    seq_tile = _pick_seq_tile(S, batch_tile, H)
    n_bt = Bp // batch_tile
    n_st = S // seq_tile
    return pl.pallas_call(
        mean_pool_kernel,
        out_shape=jax.ShapeDtypeStruct((Bp, H), jnp.float32),
        grid_spec=pltpu.PrefetchScalarGridSpec(
            num_scalar_prefetch=0,
            grid=(n_bt, n_st),
            in_specs=[
                pl.BlockSpec((batch_tile, seq_tile, H),
                             lambda bt, st: (bt, st, 0)),
                pl.BlockSpec((batch_tile, 1), lambda bt, st: (bt, 0)),
            ],
            out_specs=pl.BlockSpec((batch_tile, H), lambda bt, st: (bt, 0)),
            scratch_shapes=[pltpu.VMEM((batch_tile, H), jnp.float32)],
        ),
        compiler_params=pltpu.CompilerParams(
            dimension_semantics=("parallel", "arbitrary"),
            vmem_limit_bytes=_VMEM_LIMIT,
        ),
    )(hidden_bf16, inv_counts)


# ----------------------------------------------------------------------------
# Kernel 3: cosine similarity along last dim (torch.cosine_similarity, eps=1e-8)
#   torch clamps EACH norm separately: dot / (max(||a||,eps) * max(||b||,eps))
# ----------------------------------------------------------------------------
def cosine_kernel(a_ref, b_ref, o_ref):
    a = a_ref[...]                                       # (B, D) f32
    b = b_ref[...]
    dot = jnp.sum(a * b, axis=-1, keepdims=True)         # (B, 1)
    na = jnp.maximum(jnp.sqrt(jnp.sum(a * a, axis=-1, keepdims=True)), 1e-8)
    nb = jnp.maximum(jnp.sqrt(jnp.sum(b * b, axis=-1, keepdims=True)), 1e-8)
    o_ref[...] = dot * pl.reciprocal(na * nb)


def cosine_similarity(a, b):
    B, D = a.shape
    out = pl.pallas_call(
        cosine_kernel,
        out_shape=jax.ShapeDtypeStruct((B, 1), jnp.float32),
        grid_spec=pltpu.PrefetchScalarGridSpec(
            num_scalar_prefetch=0,
            grid=(1,),
            in_specs=[
                pl.BlockSpec((B, D), lambda i: (0, 0)),
                pl.BlockSpec((B, D), lambda i: (0, 0)),
            ],
            out_specs=pl.BlockSpec((B, 1), lambda i: (0, 0)),
        ),
    )(a, b)
    return out[:, 0]


# ----------------------------------------------------------------------------
# STEmbedder-style wrapper (glue in plain JAX)
# ----------------------------------------------------------------------------
class STEmbedderPallas:
    def __init__(self, key, vocab_size=64, hidden=ORIGIN_DIM,
                 add_scaling_layer=True, pad_token_id=PAD_TOKEN_ID):
        k1, k2, k3 = jax.random.split(key, 3)
        # TODO(synk): deterministic token-embedding table stands in for the
        # full pretrained HF transformer encoder (not implementable here).
        tok = jax.random.normal(k1, (vocab_size, hidden), dtype=jnp.float32) * 0.02
        # Zero the pad-token row so pad positions contribute nothing to the
        # masked sum (the kernel then needs no (B,S) mask input, only counts).
        tok = tok.at[pad_token_id].set(0.0)
        self.token_emb = tok
        self.add_scaling_layer = add_scaling_layer
        self.pad_token_id = pad_token_id
        # ScalingLayer (torch.nn.Linear(1024, 1792)) params, pre-laid-out once:
        #   W stored as [in=1024, out=1792] bf16, b as [1, 1792] f32.
        self.scale_w = (
            jax.random.normal(k2, (ORIGIN_DIM, SCALING_DIM), dtype=jnp.float32)
            * (1.0 / jnp.sqrt(ORIGIN_DIM))
        ).astype(jnp.bfloat16)
        self.scale_b = (
            jax.random.normal(k3, (SCALING_DIM,), dtype=jnp.float32) * 0.01
        ).reshape(1, SCALING_DIM)

    # -- plain-JAX glue -------------------------------------------------------
    def _pad_batch(self, ids):
        """Pad the (cheap) token-id tensor so the batch is a BATCH_TILE multiple."""
        B = ids.shape[0]
        Bp = _round_up(B, BATCH_TILE)
        if Bp != B:
            ids = jnp.pad(ids, ((0, Bp - B), (0, 0)),
                          constant_values=self.pad_token_id)
        return ids, B

    def _encode_and_counts(self, ids):
        # stand-in encoder: embedding lookup -> "last hidden states" [Bp,S,H]
        # streamed as bf16 (pad rows are zero because the pad embedding is zero).
        hidden = self.token_emb[ids].astype(jnp.bfloat16)
        mask = (ids != self.pad_token_id)
        counts = jnp.sum(mask, axis=-1, keepdims=True).astype(jnp.float32)
        inv_counts = 1.0 / jnp.maximum(counts, 1.0)
        return hidden, inv_counts

    def _run_embed_ids(self, ids_padded):
        hidden, inv = self._encode_and_counts(ids_padded)
        if self.add_scaling_layer:
            return fused_mean_pool_scale(hidden, inv, self.scale_w, self.scale_b)
        return mean_pool(hidden, inv)

    # -- public API mirroring STEmbedder -------------------------------------
    def get_embedding(self, text_ids):
        if text_ids is None:
            return None
        ids, B = self._pad_batch(text_ids)
        return self._run_embed_ids(ids)[:B]

    def compute_cosent_predict_labels(self, text_ids, text_pair_ids):
        if text_ids.shape[1] == text_pair_ids.shape[1]:
            # Batch both texts through ONE fused call: weight streamed once,
            # MXU row occupancy doubled.  Concatenate IDS (cheap), not hidden.
            B = text_ids.shape[0]
            ids, _ = self._pad_batch(
                jnp.concatenate([text_ids, text_pair_ids], axis=0))
            both = self._run_embed_ids(ids)
            emb, emb_pair = both[:B], both[B:2 * B]
        else:
            emb = self.get_embedding(text_ids)
            emb_pair = self.get_embedding(text_pair_ids)
        predict_labels = cosine_similarity(emb, emb_pair)
        # TODO(synk): CoSentLoss definition is not provided in the module source.
        return predict_labels, emb, emb_pair


if __name__ == "__main__":
    key = jax.random.PRNGKey(0)
    kmodel, kids1, kids2 = jax.random.split(key, 3)

    B, S = 2, 8
    model = STEmbedderPallas(kmodel)

    text_ids = jax.random.randint(kids1, (B, S), 1, 64, dtype=jnp.int32)
    text_pair_ids = jax.random.randint(kids2, (B, S), 1, 64, dtype=jnp.int32)
    # introduce some padding tokens to exercise the masked mean
    text_ids = text_ids.at[:, -2:].set(PAD_TOKEN_ID)
    text_pair_ids = text_pair_ids.at[:, -3:].set(PAD_TOKEN_ID)

    predict_labels, emb, emb_pair = model.compute_cosent_predict_labels(
        text_ids, text_pair_ids)
    jax.block_until_ready((predict_labels, emb, emb_pair))

    # --- pure-JAX reference (mirrors the kernel's bf16 streaming / f32 accum) ---
    def ref_embed(ids):
        hidden = model.token_emb[ids].astype(jnp.bfloat16).astype(jnp.float32)
        mask = (ids != PAD_TOKEN_ID).astype(jnp.float32)
        pooled = (hidden * mask[..., None]).sum(1) / jnp.maximum(
            mask.sum(1, keepdims=True), 1.0)
        x = pooled.astype(jnp.bfloat16).astype(jnp.float32)
        return x @ model.scale_w.astype(jnp.float32) + model.scale_b

    def ref_cos(a, b):
        dot = (a * b).sum(-1)
        na = jnp.maximum(jnp.sqrt((a * a).sum(-1)), 1e-8)
        nb = jnp.maximum(jnp.sqrt((b * b).sum(-1)), 1e-8)
        return dot / (na * nb)

    ref_e = ref_embed(text_ids)
    ref_p = ref_embed(text_pair_ids)

    assert emb.shape == (B, SCALING_DIM) and emb.dtype == jnp.float32
    assert emb_pair.shape == (B, SCALING_DIM)
    assert predict_labels.shape == (B,)
    assert jnp.allclose(emb, ref_e, rtol=5e-2, atol=5e-2)
    assert jnp.allclose(emb_pair, ref_p, rtol=5e-2, atol=5e-2)
    assert jnp.allclose(predict_labels, ref_cos(ref_e, ref_p),
                        rtol=5e-2, atol=5e-2)
    print("KERNEL_OK")
</pallas_src>

<mosaic_0001>
module attributes {stable_mosaic.version = 11 : i64} {
  func.func @fused_pool_scale_kernel(%arg0: i32, %arg1: i32, %arg2: memref<8x8x1024xbf16, #tpu.memory_space<vmem>>, %arg3: memref<8x1xf32, #tpu.memory_space<vmem>>, %arg4: memref<1024x1792xbf16, #tpu.memory_space<vmem>>, %arg5: memref<1x1792xf32, #tpu.memory_space<vmem>>, %arg6: memref<8x1792xf32, #tpu.memory_space<vmem>>, %arg7: memref<8x1024xf32, #tpu.memory_space<vmem>>) attributes {dimension_semantics = [#tpu.dimension_semantics<parallel>, #tpu.dimension_semantics<arbitrary>], iteration_bounds = array<i64: 1, 1>, scalar_prefetch = 0 : i64, scratch_operands = 1 : i64, tpu.core_type = #tpu.core_type<tc>, window_params = [{transform_indices = @transform_0, window_bounds = array<i64: 8, 8, 1024>}, {transform_indices = @transform_1, window_bounds = array<i64: 8, 1>}, {pipeline_mode = #tpu.pipeline_mode<synchronous>, transform_indices = @transform_2, window_bounds = array<i64: 1024, 1792>}, {pipeline_mode = #tpu.pipeline_mode<synchronous>, transform_indices = @transform_3, window_bounds = array<i64: 1, 1792>}, {transform_indices = @transform_4, window_bounds = array<i64: 8, 1792>}]} {
    %c0_i32 = arith.constant 0 : i32
    %0 = arith.cmpi eq, %arg1, %c0_i32 : i32
    %1 = arith.extui %0 : i1 to i32
    %c0_i32_0 = arith.constant 0 : i32
    %2 = arith.cmpi ne, %1, %c0_i32_0 : i32
    scf.if %2 {
      %cst_9 = arith.constant 0.000000e+00 : f32
      %12 = vector.broadcast %cst_9 : f32 to vector<8x1024xf32>
      %c0_10 = arith.constant 0 : index
      %c0_11 = arith.constant 0 : index
      %13 = vector.load %arg7[%c0_10, %c0_11] : memref<8x1024xf32, #tpu.memory_space<vmem>>, vector<8x1024xf32>
      tpu.vector_store %arg7[%c0_10, %c0_11], %12 {strides = array<i32>} : memref<8x1024xf32, #tpu.memory_space<vmem>>, vector<8x1024xf32>,
    } else {
    }
    %c0 = arith.constant 0 : index
    %c0_1 = arith.constant 0 : index
    %3 = vector.load %arg7[%c0, %c0_1] : memref<8x1024xf32, #tpu.memory_space<vmem>>, vector<8x1024xf32>
    %c0_2 = arith.constant 0 : index
    %c0_3 = arith.constant 0 : index
    %c0_4 = arith.constant 0 : index
    %4 = vector.load %arg2[%c0_2, %c0_3, %c0_4] : memref<8x8x1024xbf16, #tpu.memory_space<vmem>>, vector<8x8x1024xbf16>
    %5 = arith.extf %4 : vector<8x8x1024xbf16> to vector<8x8x1024xf32>
    %cst = arith.constant dense<0.000000e+00> : vector<8x1024xf32>
    %6 = vector.multi_reduction <add>, %5, %cst [1] : vector<8x8x1024xf32> to vector<8x1024xf32>
    %7 = arith.addf %3, %6 : vector<8x1024xf32>
    %c0_5 = arith.constant 0 : index
    %c0_6 = arith.constant 0 : index
    %8 = vector.load %arg7[%c0_5, %c0_6] : memref<8x1024xf32, #tpu.memory_space<vmem>>, vector<8x1024xf32>
    tpu.vector_store %arg7[%c0_5, %c0_6], %7 {strides = array<i32>} : memref<8x1024xf32, #tpu.memory_space<vmem>>, vector<8x1024xf32>,
    %c0_i32_7 = arith.constant 0 : i32
    %9 = arith.cmpi eq, %arg1, %c0_i32_7 : i32
    %10 = arith.extui %9 : i1 to i32
    %c0_i32_8 = arith.constant 0 : i32
    %11 = arith.cmpi ne, %10, %c0_i32_8 : i32
    scf.if %11 {
      %c0_9 = arith.constant 0 : index
      %c0_10 = arith.constant 0 : index
      %12 = vector.load %arg7[%c0_9, %c0_10] : memref<8x1024xf32, #tpu.memory_space<vmem>>, vector<8x1024xf32>
      %c0_11 = arith.constant 0 : index
      %c0_12 = arith.constant 0 : index
      %13 = vector.load %arg3[%c0_11, %c0_12] : memref<8x1xf32, #tpu.memory_space<vmem>>, vector<8x1xf32>
      %14 = vector.broadcast %13 : vector<8x1xf32> to vector<8x1024xf32>
      %15 = arith.mulf %12, %14 : vector<8x1024xf32>
      %16 = arith.truncf %15 : vector<8x1024xf32> to vector<8x1024xbf16>
      %c0_13 = arith.constant 0 : index
      %c0_14 = arith.constant 0 : index
      %17 = vector.load %arg4[%c0_13, %c0_14] : memref<1024x1792xbf16, #tpu.memory_space<vmem>>, vector<1024x1792xbf16>
      %cst_15 = arith.constant dense<0.000000e+00> : vector<8x1792xf32>
      %18 = tpu.matmul %16, %17, %cst_15 {dimension_numbers = #tpu.dot_dimension_numbers<[1], [0], [0], [1], [0, 0, 1, 1], [], []>} : vector<8x1024xbf16>, vector<1024x1792xbf16>, vector<8x1792xf32> -> vector<8x1792xf32>
      %c0_16 = arith.constant 0 : index
      %c0_17 = arith.constant 0 : index
      %19 = vector.load %arg5[%c0_16, %c0_17] : memref<1x1792xf32, #tpu.memory_space<vmem>>, vector<1x1792xf32>
      %20 = vector.broadcast %19 : vector<1x1792xf32> to vector<8x1792xf32>
      %21 = arith.addf %18, %20 : vector<8x1792xf32>
      %c0_18 = arith.constant 0 : index
      %c0_19 = arith.constant 0 : index
      %22 = vector.load %arg6[%c0_18, %c0_19] : memref<8x1792xf32, #tpu.memory_space<vmem>>, vector<8x1792xf32>
      tpu.vector_store %arg6[%c0_18, %c0_19], %21 {strides = array<i32>} : memref<8x1792xf32, #tpu.memory_space<vmem>>, vector<8x1792xf32>,
    } else {
    }
    return
  }
  func.func @transform_0(%arg0: i32, %arg1: i32) -> (i32, i32, i32) {
    %c0_i32 = arith.constant 0 : i32
    %c0_i32_0 = arith.constant 0 : i32
    return %arg0, %arg1, %c0_i32 : i32, i32, i32
  }
  func.func @transform_1(%arg0: i32, %arg1: i32) -> (i32, i32) {
    %c0_i32 = arith.constant 0 : i32
    %c0_i32_0 = arith.constant 0 : i32
    return %arg0, %c0_i32 : i32, i32
  }
  func.func @transform_2(%arg0: i32, %arg1: i32) -> (i32, i32) {
    %c0_i32 = arith.constant 0 : i32
    %c0_i32_0 = arith.constant 0 : i32
    %c0_i32_1 = arith.constant 0 : i32
    return %c0_i32, %c0_i32_0 : i32, i32
  }
  func.func @transform_3(%arg0: i32, %arg1: i32) -> (i32, i32) {
    %c0_i32 = arith.constant 0 : i32
    %c0_i32_0 = arith.constant 0 : i32
    %c0_i32_1 = arith.constant 0 : i32
    return %c0_i32, %c0_i32_0 : i32, i32
  }
  func.func @transform_4(%arg0: i32, %arg1: i32) -> (i32, i32) {
    %c0_i32 = arith.constant 0 : i32
    %c0_i32_0 = arith.constant 0 : i32
    return %arg0, %c0_i32 : i32, i32
  }
}

</mosaic_0001>

<bundles_post_ra>
// kernel: tpu_custom_call.1
= control target key start
LH: loop header
LB: loop body
LE: loop exit
PB: predicated region body
PF: predicated region fallthrough
CT: control target
= control target key end

     0   :  { %9 = vsyncpa [#allocation4], 0  ;;  %s10626_s0 = inlined_call_operand.hbm [shape: bf16[8,8,1024], index: 0, kind: input, shape index: {}]   ;;  %s10627_s1 = inlined_call_operand.vmem [shape: f32[8,1], index: 1, kind: input, shape index: {}]   ;;  %s10628_s2 = inlined_call_operand.hbm [shape: bf16[1024,1792], index: 2, kind: input, shape index: {}]   ;;  %s10629_s3 = inlined_call_operand.hbm [shape: f32[1,1792], index: 3, kind: input, shape index: {}]   ;;  %s10630_s4 = inlined_call_operand.hbm [shape: f32[8,1792], index: 4, kind: output, shape index: {}]  }
   0x1   :  { %10 = vsyncpa [#allocation7], 0 }
   0x2   :  { %11 = vsyncpa [#allocation5], 0  ;;  %s9811_s15 = smov [#allocation6]   ;;  %s9717_s19 = scalar_lea.hbm %s10628_s2, 114688 }
   0x3   :  { %s31_s16 = sshll.u32 %s9811_s15, 4  ;;  %p9718_p0 = scmp.ne.s32.totalorder %s10628_s2, %s9717_s19  ;;  %s32_s16 = int_to_ptr.vmem [resolvable:$true] %s31_s16 }
   0x4   :  { %p9721_p1 = scmp.lt.u32.totalorder %s9717_s19, %s10628_s2 }
   0x6   :  { %p9723_p2 = pnand %p9721_p1, %p9718_p0 }
   0x8   :  { %9726 = shalt.err (!%p9723_p2)
}
   0x9   :  { %s9727_s24 = scalar_lea.vmem %s32_s16, 114688  ;;  %p9732_p4 = scmp.lt.s32.totalorder %s32_s16, %s32_s16 }
   0xa   :  { %p9728_p3 = scmp.ne.s32.totalorder %s32_s16, %s9727_s24  ;;  %p9733_p5 = scmp.lt.s32.totalorder %s9727_s24, %s9727_s24 }
   0xc   :  { %p9734_p6 = por %p9733_p5, %p9732_p4 }
   0xe   :  { %p9735_p7 = pnand %p9734_p6, %p9728_p3 }
  0x10   :  { %9738 = shalt.err (!%p9735_p7)
}
  0x11   :  { %s9812_s25 = smov 896   ;;  %s9813_s26 = smov 56  }
  0x12   :  { %37 = dma.hbm_to_vmem [thread:$0]  %s10628_s2, 114688, %s32_s16, [#allocation7], %s9812_s25, %s9812_s25, %s9813_s26  }
  0x13   :  { %s9814_s29 = smov [#allocation3]   ;;  %s9739_s7 = scalar_lea.hbm %s10626_s0, 4096 }
  0x14   :  { %s17_s30 = sshll.u32 %s9814_s29, 4  ;;  %p9740_p8 = scmp.ne.s32.totalorder %s10626_s0, %s9739_s7  ;;  %s18_s30 = int_to_ptr.vmem [resolvable:$true] %s17_s30 }
  0x15   :  { %p9743_p9 = scmp.lt.u32.totalorder %s9739_s7, %s10626_s0 }
  0x17   :  { %p9745_p10 = pnand %p9743_p9, %p9740_p8 }
  0x19   :  { %9748 = shalt.err (!%p9745_p10)
}
  0x1a   :  { %s9749_s12 = scalar_lea.vmem %s18_s30, 4096  ;;  %p9754_p12 = scmp.lt.s32.totalorder %s18_s30, %s18_s30 }
  0x1b   :  { %p9750_p11 = scmp.ne.s32.totalorder %s18_s30, %s9749_s12  ;;  %p9755_p13 = scmp.lt.s32.totalorder %s9749_s12, %s9749_s12 }
  0x1d   :  { %p9756_p0 = por %p9755_p13, %p9754_p12 }
  0x1f   :  { %p9757_p1 = pnand %p9756_p0, %p9750_p11 }
  0x21   :  { %9760 = shalt.err (!%p9757_p1)
}
  0x22   :  { %s9815_s2 = smov 512   ;;  %s9816_s13 = smov 32  }
  0x23   :  { %23 = dma.hbm_to_vmem [thread:$0]  %s10626_s0, 4096, %s18_s30, [#allocation4], %s9815_s2, %s9815_s2, %s9816_s13  }
  0x24   :  { %s9817_s16 = smov [#allocation8]   ;;  %s9761_s20 = scalar_lea.hbm %s10629_s3, 224 }
  0x25   :  { %s44_s17 = sshll.u32 %s9817_s16, 4  ;;  %p9762_p2 = scmp.ne.s32.totalorder %s10629_s3, %s9761_s20  ;;  %s45_s17 = int_to_ptr.vmem [resolvable:$true] %s44_s17 }
  0x26   :  { %p9765_p3 = scmp.lt.u32.totalorder %s9761_s20, %s10629_s3 }
  0x28   :  { %p9767_p4 = pnand %p9765_p3, %p9762_p2 }
  0x2a   :  { %9770 = shalt.err (!%p9767_p4)
}
  0x2b   :  { %s9771_s25 = scalar_lea.vmem %s45_s17, 224  ;;  %p9776_p6 = scmp.lt.s32.totalorder %s45_s17, %s45_s17 }
  0x2c   :  { %p9772_p5 = scmp.ne.s32.totalorder %s45_s17, %s9771_s25  ;;  %p9777_p7 = scmp.lt.s32.totalorder %s9771_s25, %s9771_s25 }
  0x2e   :  { %p9778_p8 = por %p9777_p7, %p9776_p6 }
  0x30   :  { %p9779_p9 = pnand %p9778_p8, %p9772_p5 }
  0x32   :  { %9782 = shalt.err (!%p9779_p9)
}
  0x33   :  { %47 = dma.hbm_to_vmem [thread:$0]  %s10629_s3, 224, %s45_s17, [#allocation7]  }
  0x34   :  { %9805 = dma.done.wait [#allocation4], 4096  }
  0x35   :  { %9806 = vsyncadd [#allocation4], 4294963200 }
  0x36   :  { %9807 = dma.done.wait [#allocation7], 114912  }
  0x37   :  { %9808 = vsyncadd [#allocation7], 4294852384  ;;  %v9818_v0 = vmov 0   ;;  %v719_v1 = vld [vmem:[%s10627_s1] sm:$0xff]  ;;  %v8377_v6 = vld [vmem:[#allocation6 + $0x74] ss:$56 sps:$4 sm:$0xff]  }
  0x38   :  { %8370 = vset.pattern.permute.xlu0 %v9818_v0  ;;  %v8371_v2 = vld [vmem:[#allocation6 + $0x4] ss:$56 sps:$4 sm:$0xff]   ;;  %v8375_v4 = vld [vmem:[#allocation6] ss:$56 sps:$4 sm:$0xff]   ;;  %v8379_v7 = vld [vmem:[#allocation6 + $0xe74] ss:$56 sps:$4 sm:$0xff]  }
  0x39   :  { %722 = vperm.xlu0 %8370, %v719_v1   ;;  %v8373_v3 = vld [vmem:[#allocation6 + $0xe04] ss:$56 sps:$4 sm:$0xff]   ;;  %v8376_v5 = vld [vmem:[#allocation6 + $0xe00] ss:$56 sps:$4 sm:$0xff]   ;;  %6191 = vmatprep.subr.bf16.mxu1 %v8371_v2  ;;  %v8381_v8 = vld [vmem:[#allocation6 + $0x70] ss:$56 sps:$4 sm:$0xff]  }
  0x3a   :  { %6273 = vmatprep.subr.bf16.mxu0 %v8373_v3  ;;  %6192 = vmatpush1.bf16.msra.mxu1 %v8375_v4  ;;  %v8382_v9 = vld [vmem:[#allocation6 + $0xe70] ss:$56 sps:$4 sm:$0xff]   ;;  %v8383_v10 = vld [vmem:[#allocation6 + $0xe4] ss:$56 sps:$4 sm:$0xff]   ;;  %v8387_v12 = vld [vmem:[#allocation6 + $0xe0] ss:$56 sps:$4 sm:$0xff]  }
  0x3b   :  { %6274 = vmatpush1.bf16.msra.mxu0 %v8376_v5  ;;  %6193 = vmatprep.subr.bf16.mxu1 %v8377_v6  ;;  %v8385_v11 = vld [vmem:[#allocation6 + $0xee4] ss:$56 sps:$4 sm:$0xff]   ;;  %v8388_v13 = vld [vmem:[#allocation6 + $0xee0] ss:$56 sps:$4 sm:$0xff]   ;;  %v8389_v14 = vld [vmem:[#allocation6 + $0x154] ss:$56 sps:$4 sm:$0xff]  }
  0x3c   :  { %6275 = vmatprep.subr.bf16.mxu0 %v8379_v7  ;;  %v8391_v15 = vld [vmem:[#allocation6 + $0xf54] ss:$56 sps:$4 sm:$0xff]   ;;  %v8393_v16 = vld [vmem:[#allocation6 + $0x150] ss:$56 sps:$4 sm:$0xff]   ;;  %v8395_v18 = vld [vmem:[#allocation6 + $0x1c4] ss:$56 sps:$4 sm:$0xff]  }
  0x3d   :  { %v8394_v17 = vld [vmem:[#allocation6 + $0xf50] ss:$56 sps:$4 sm:$0xff]   ;;  %v8397_v19 = vld [vmem:[#allocation6 + $0xfc4] ss:$56 sps:$4 sm:$0xff]   ;;  %v8399_v20 = vld [vmem:[#allocation6 + $0x1c0] ss:$56 sps:$4 sm:$0xff]  }
  0x3e   :  { %6194 = vmatpush1.bf16.msra.mxu1 %v8381_v8  ;;  %v8400_v21 = vld [vmem:[#allocation6 + $0xfc0] ss:$56 sps:$4 sm:$0xff]   ;;  %v8401_v22 = vld [vmem:[#allocation6 + $0x234] ss:$56 sps:$4 sm:$0xff]   ;;  %v8405_v24 = vld [vmem:[#allocation6 + $0x230] ss:$56 sps:$4 sm:$0xff]  }
  0x3f   :  { %6276 = vmatpush1.bf16.msra.mxu0 %v8382_v9  ;;  %6195 = vmatprep.subr.bf16.mxu1 %v8383_v10  ;;  %v8403_v23 = vld [vmem:[#allocation6 + $0x1034] ss:$56 sps:$4 sm:$0xff]   ;;  %v8406_v25 = vld [vmem:[#allocation6 + $0x1030] ss:$56 sps:$4 sm:$0xff]   ;;  %v8407_v26 = vld [vmem:[#allocation6 + $0x2a4] ss:$56 sps:$4 sm:$0xff]  }
  0x40   :  { %6277 = vmatprep.subr.bf16.mxu0 %v8385_v11  ;;  %v8409_v27 = vld [vmem:[#allocation6 + $0x10a4] ss:$56 sps:$4 sm:$0xff]   ;;  %v8411_v28 = vld [vmem:[#allocation6 + $0x2a0] ss:$56 sps:$4 sm:$0xff]   ;;  %v8413_v30 = vld [vmem:[#allocation6 + $0x314] ss:$56 sps:$4 sm:$0xff]  }
  0x41   :  { %v8412_v29 = vld [vmem:[#allocation6 + $0x10a0] ss:$56 sps:$4 sm:$0xff]   ;;  %v8415_v31 = vld [vmem:[#allocation6 + $0x1114] ss:$56 sps:$4 sm:$0xff]   ;;  %v8417_v32 = vld [vmem:[#allocation6 + $0x310] ss:$56 sps:$4 sm:$0xff]  }
  0x42   :  { %6196 = vmatpush1.bf16.msra.mxu1 %v8387_v12  ;;  %v8418_v33 = vld [vmem:[#allocation6 + $0x1110] ss:$56 sps:$4 sm:$0xff]   ;;  %v8419_v34 = vld [vmem:[#allocation6 + $0x384] ss:$56 sps:$4 sm:$0xff]   ;;  %v8423_v36 = vld [vmem:[#allocation6 + $0x380] ss:$56 sps:$4 sm:$0xff]  }
  0x43   :  { %6278 = vmatpush1.bf16.msra.mxu0 %v8388_v13  ;;  %6197 = vmatprep.subr.bf16.mxu1 %v8389_v14  ;;  %v8421_v35 = vld [vmem:[#allocation6 + $0x1184] ss:$56 sps:$4 sm:$0xff]   ;;  %v8424_v37 = vld [vmem:[#allocation6 + $0x1180] ss:$56 sps:$4 sm:$0xff]   ;;  %v8425_v38 = vld [vmem:[#allocation6 + $0x3f4] ss:$56 sps:$4 sm:$0xff]  }
  0x44   :  { %6279 = vmatprep.subr.bf16.mxu0 %v8391_v15  ;;  %v8427_v39 = vld [vmem:[#allocation6 + $0x11f4] ss:$56 sps:$4 sm:$0xff]   ;;  %v8429_v40 = vld [vmem:[#allocation6 + $0x3f0] ss:$56 sps:$4 sm:$0xff]   ;;  %v8431_v42 = vld [vmem:[#allocation6 + $0x464] ss:$56 sps:$4 sm:$0xff]  }
  0x45   :  { %v8430_v41 = vld [vmem:[#allocation6 + $0x11f0] ss:$56 sps:$4 sm:$0xff]   ;;  %v8433_v43 = vld [vmem:[#allocation6 + $0x1264] ss:$56 sps:$4 sm:$0xff]   ;;  %v8435_v44 = vld [vmem:[#allocation6 + $0x460] ss:$56 sps:$4 sm:$0xff]  }
  0x46   :  { %6198 = vmatpush1.bf16.msra.mxu1 %v8393_v16  ;;  %v8436_v45 = vld [vmem:[#allocation6 + $0x1260] ss:$56 sps:$4 sm:$0xff]   ;;  %v8437_v46 = vld [vmem:[#allocation6 + $0x4d4] ss:$56 sps:$4 sm:$0xff]   ;;  %v8441_v57 = vld [vmem:[#allocation6 + $0x4d0] ss:$56 sps:$4 sm:$0xff]  }
  0x47   :  { %6280 = vmatpush1.bf16.msra.mxu0 %v8394_v17  ;;  %6199 = vmatprep.subr.bf16.mxu1 %v8395_v18  ;;  %v8439_v47 = vld [vmem:[#allocation6 + $0x12d4] ss:$56 sps:$4 sm:$0xff]   ;;  %v9884_v48 = vld [vmem:[#allocation3] sm:$0xff]  ;;  %v9890_v51 = vld [vmem:[#allocation3 + $0x18] sm:$0xff]  ;;  %vm621_vm0 = vcmask 1041409   ;;  %vm623_vm1 = vcmask 1042434  }
  0x48   :  { %6281 = vmatprep.subr.bf16.mxu0 %v8397_v19  ;;  %v9886_v49 = vld [vmem:[#allocation3 + $0x8] sm:$0xff]  ;;  %v9888_v50 = vld [vmem:[#allocation3 + $0x10] sm:$0xff]  ;;  %v9892_v52 = vld [vmem:[#allocation3 + $0x20] sm:$0xff]  ;;  %v109_v53 = vunpack.c.l.bf16 %v9884_v48  ;;  %v110_v54 = vunpack.c.h.bf16 %v9884_v48  ;;  %v115_v63 = vunpack.c.l.bf16 %v9890_v51  ;;  %v116_v0 = vunpack.c.h.bf16 %v9890_v51  ;;  %s9819_s1 = smov [#allocation9]  }
  0x49   :  { %v111_v55 = vunpack.c.l.bf16 %v9886_v49  ;;  %v112_v56 = vunpack.c.h.bf16 %v9886_v49  ;;  %v9898_v58 = vld [vmem:[#allocation3 + $0x28] sm:$0xff]  ;;  %v9900_v59 = vld [vmem:[#allocation3 + $0x30] sm:$0xff]  ;;  %v9902_v60 = vld [vmem:[#allocation3 + $0x38] sm:$0xff]  ;;  %v113_v61 = vunpack.c.l.bf16 %v9888_v50  ;;  %v114_v62 = vunpack.c.h.bf16 %v9888_v50  ;;  %s7359_s3 = sshll.u32 %s9819_s1, 4  ;;  %s7360_s3 = int_to_ptr.vmem [resolvable:$true] %s7359_s3 }
  0x4a   :  { %6200 = vmatpush1.bf16.msra.mxu1 %v8399_v20  ;;  %v8442_v1 = vld [vmem:[#allocation6 + $0x12d0] ss:$56 sps:$4 sm:$0xff]   ;;  %v8443_v2 = vld [vmem:[#allocation6 + $0x544] ss:$56 sps:$4 sm:$0xff]   ;;  %vm625_vm2 = vcmask 1043459   ;;  %vm627_vm3 = vcmask 1044484   ;;  %p9788_p11 = scmp.lt.s32.totalorder %s7360_s3, %s7360_s3 }
  0x4b   :  { %6282 = vmatpush1.bf16.msra.mxu0 %v8400_v21  ;;  %6201 = vmatprep.subr.bf16.mxu1 %v8401_v22  ;;  %v9908_v3 = vld [vmem:[#allocation3 + $0x40] sm:$0xff]  ;;  %v9910_v4 = vld [vmem:[#allocation3 + $0x48] sm:$0xff]  ;;  %v9912_v5 = vld [vmem:[#allocation3 + $0x50] sm:$0xff]  ;;  %v173_v21 = vrot.slane %v109_v53, 4  ;;  %vm629_vm4 = vcmask 1045509   ;;  %vm631_vm5 = vcmask 1046534  }
  0x4c   :  { %6283 = vmatprep.subr.bf16.mxu0 %v8403_v23  ;;  %v9918_v10 = vld [vmem:[#allocation3 + $0x58] sm:$0xff]  ;;  %v9920_v11 = vld [vmem:[#allocation3 + $0x60] sm:$0xff]  ;;  %v9922_v12 = vld [vmem:[#allocation3 + $0x68] sm:$0xff]  ;;  %v197_v23 = vrot.slane %v113_v61, 4  ;;  %vm633_vm6 = vcmask 1047559   ;;  %s9783_s29 = scalar_lea.vmem %s7360_s3, 1792 }
  0x4d   :  { %v8445_v17 = vld [vmem:[#allocation6 + $0x1344] ss:$56 sps:$4 sm:$0xff]   ;;  %v9928_v18 = vld [vmem:[#allocation3 + $0x70] sm:$0xff]  ;;  %v8459_v22 = vld [vmem:[#allocation6 + $0x620] ss:$56 sps:$4 sm:$0xff]   ;;  %p9784_p10 = scmp.ne.s32.totalorder %s7360_s3, %s9783_s29  ;;  %p9789_p12 = scmp.lt.s32.totalorder %s9783_s29, %s9783_s29 }
  0x4e   :  { %6202 = vmatpush1.bf16.msra.mxu1 %v8405_v24  ;;  %v9930_v19 = vld [vmem:[#allocation3 + $0x78] sm:$0xff]  ;;  %v8465_v16 = vld [vmem:[#allocation6 + $0x690] ss:$56 sps:$4 sm:$0xff]   ;;  %v198_v15 = vadd.f32 %v197_v23, %v113_v61 }
  0x4f   :  { %6284 = vmatpush1.bf16.msra.mxu0 %v8406_v25  ;;  %6203 = vmatprep.subr.bf16.mxu1 %v8407_v26  ;;  %v8447_v24 = vld [vmem:[#allocation6 + $0x540] ss:$56 sps:$4 sm:$0xff]   ;;  %v9938_v26 = vld [vmem:[#allocation3 + $0x88] sm:$0xff]  ;;  %v8472_v50 = vld [vmem:[#allocation6 + $0x1504] ss:$56 sps:$4 sm:$0xff]   ;;  %p9790_p13 = por %p9789_p12, %p9788_p11 }
  0x50   :  { %6285 = vmatprep.subr.bf16.mxu0 %v8409_v27  ;;  %v9936_v25 = vld [vmem:[#allocation3 + $0x80] sm:$0xff]  ;;  %v8461_v27 = vld [vmem:[#allocation6 + $0x694] ss:$56 sps:$4 sm:$0xff]  }
  0x51   :  { %p9791_p0 = pnand %p9790_p13, %p9784_p10 }
  0x52   :  { %6204 = vmatpush1.bf16.msra.mxu1 %v8411_v28  ;;  %v174_v28 = vadd.f32 %v173_v21, %v109_v53 }
  0x53   :  { %6286 = vmatpush1.bf16.msra.mxu0 %v8412_v29  ;;  %6205 = vmatprep.subr.bf16.mxu1 %v8413_v30  ;;  %v8454_v30 = vld [vmem:[#allocation6 + $0x13b0] ss:$56 sps:$4 sm:$0xff]   ;;  %v9980_v29 = vld [vmem:[#allocation3 + $0xe0] sm:$0xff] }
  0x54   :  { %6287 = vmatprep.subr.bf16.mxu0 %v8415_v31  ;;  %v8448_v31 = vld [vmem:[#allocation6 + $0x1340] ss:$56 sps:$4 sm:$0xff]  }
  0x56   :  { %6206 = vmatpush1.bf16.msra.mxu1 %v8417_v32  ;;  %v8449_v32 = vld [vmem:[#allocation6 + $0x5b4] ss:$56 sps:$4 sm:$0xff]  }
  0x57   :  { %6288 = vmatpush1.bf16.msra.mxu0 %v8418_v33  ;;  %6207 = vmatprep.subr.bf16.mxu1 %v8419_v34  ;;  %v9944_v33 = vld [vmem:[#allocation3 + $0x90] sm:$0xff]  ;;  %v9946_v34 = vld [vmem:[#allocation3 + $0x98] sm:$0xff] }
  0x58   :  { %6289 = vmatprep.subr.bf16.mxu0 %v8421_v35  ;;  %v191_v35 = vrot.slane %v112_v56, 4 }
  0x5a   :  { %6208 = vmatpush1.bf16.msra.mxu1 %v8423_v36  ;;  %v9970_v36 = vld [vmem:[#allocation3 + $0xc8] sm:$0xff]  ;;  %v192_v20 = vadd.f32 %v191_v35, %v112_v56  ;;  %v199_v35 = vrot.slane %v198_v15, 2 }
  0x5b   :  { %6290 = vmatpush1.bf16.msra.mxu0 %v8424_v37  ;;  %6209 = vmatprep.subr.bf16.mxu1 %v8425_v38  ;;  %v8457_v38 = vld [vmem:[#allocation6 + $0x1424] ss:$56 sps:$4 sm:$0xff]   ;;  %v8463_v37 = vld [vmem:[#allocation6 + $0x1494] ss:$56 sps:$4 sm:$0xff]  }
  0x5c   :  { %6291 = vmatprep.subr.bf16.mxu0 %v8427_v39  ;;  %v8451_v39 = vld [vmem:[#allocation6 + $0x13b4] ss:$56 sps:$4 sm:$0xff]   ;;  %v193_v56 = vrot.slane %v192_v20, 2  ;;  %v200_v51 = vadd.f32 %v199_v35, %v198_v15  ;;  %v10640_v35 = vunpack.c.l.bf16 %v9902_v60 }
  0x5e   :  { %6210 = vmatpush1.bf16.msra.mxu1 %v8429_v40  ;;  %v9952_v40 = vld [vmem:[#allocation3 + $0xa0] sm:$0xff]  ;;  %v201_v8 = vrot.slane %v200_v51, 1 }
  0x5f   :  { %6292 = vmatpush1.bf16.msra.mxu0 %v8430_v41  ;;  %6211 = vmatprep.subr.bf16.mxu1 %v8431_v42  ;;  %v9954_v41 = vld [vmem:[#allocation3 + $0xa8] sm:$0xff]  ;;  %v8455_v42 = vld [vmem:[#allocation6 + $0x624] ss:$56 sps:$4 sm:$0xff]  }
  0x60   :  { %6293 = vmatprep.subr.bf16.mxu0 %v8433_v43  ;;  %v9994_v43 = vld [vmem:[#allocation3 + $0xf8] sm:$0xff] }
  0x62   :  { %6212 = vmatpush1.bf16.msra.mxu1 %v8435_v44  ;;  %v8453_v44 = vld [vmem:[#allocation6 + $0x5b0] ss:$56 sps:$4 sm:$0xff]  }
  0x63   :  { %6294 = vmatpush1.bf16.msra.mxu0 %v8436_v45  ;;  %6213 = vmatprep.subr.bf16.mxu1 %v8437_v46  ;;  %v9960_v46 = vld [vmem:[#allocation3 + $0xb0] sm:$0xff]  ;;  %v9986_v45 = vld [vmem:[#allocation3 + $0xe8] sm:$0xff] }
  0x64   :  { %6295 = vmatprep.subr.bf16.mxu0 %v8439_v47  ;;  %v9962_v47 = vld [vmem:[#allocation3 + $0xb8] sm:$0xff] }
  0x66   :  { %6214 = vmatpush1.bf16.msra.mxu1 %v8441_v57  ;;  %v9964_v57 = vld [vmem:[#allocation3 + $0xc0] sm:$0xff] }
  0x67   :  { %6296 = vmatpush1.bf16.msra.mxu0 %v8442_v1  ;;  %6215 = vmatprep.subr.bf16.mxu1 %v8443_v2  ;;  %v9972_v1 = vld [vmem:[#allocation3 + $0xd0] sm:$0xff]  ;;  %v9974_v2 = vld [vmem:[#allocation3 + $0xd8] sm:$0xff] }
  0x68   :  { %6297 = vmatprep.subr.bf16.mxu0 %v8445_v17  ;;  %v9992_v17 = vld [vmem:[#allocation3 + $0xf0] sm:$0xff] }
  0x6a   :  { %6216 = vmatpush1.bf16.msra.mxu1 %v8447_v24  ;;  %v179_v24 = vrot.slane %v110_v54, 4 }
  0x6b   :  { %6298 = vmatpush1.bf16.msra.mxu0 %v8448_v31  ;;  %6217 = vmatprep.subr.bf16.mxu1 %v8449_v32  ;;  %v215_v31 = vrot.slane %v116_v0, 4 }
  0x6c   :  { %6299 = vmatprep.subr.bf16.mxu0 %v8451_v39  ;;  %v8460_v39 = vld [vmem:[#allocation6 + $0x1420] ss:$56 sps:$4 sm:$0xff]   ;;  %v180_v32 = vadd.f32 %v179_v24, %v110_v54  ;;  %v8466_v54 = vld [vmem:[#allocation6 + $0x1490] ss:$56 sps:$4 sm:$0xff]  }
  0x6d   :  { %v216_v48 = vadd.f32 %v215_v31, %v116_v0 }
  0x6e   :  { %6218 = vmatpush1.bf16.msra.mxu1 %v8453_v44  ;;  %v185_v44 = vrot.slane %v111_v55, 4  ;;  %v181_v21 = vrot.slane %v180_v32, 2 }
  0x6f   :  { %6300 = vmatpush1.bf16.msra.mxu0 %v8454_v30  ;;  %6219 = vmatprep.subr.bf16.mxu1 %v8455_v42  ;;  %v203_v30 = vrot.slane %v114_v62, 4  ;;  %v209_v42 = vrot.slane %v115_v63, 4  ;;  %v217_v23 = vrot.slane %v216_v48, 2 }
  0x70   :  { %6301 = vmatprep.subr.bf16.mxu0 %v8457_v38  ;;  %v186_v38 = vadd.f32 %v185_v44, %v111_v55  ;;  %v175_v55 = vrot.slane %v174_v28, 2  ;;  %v182_v44 = vadd.f32 %v181_v21, %v180_v32 }
  0x71   :  { %v204_v14 = vadd.f32 %v203_v30, %v114_v62  ;;  %v210_v53 = vadd.f32 %v209_v42, %v115_v63  ;;  %v194_v30 = vadd.f32 %v193_v56, %v192_v20 }
  0x72   :  { %6220 = vmatpush1.bf16.msra.mxu1 %v8459_v22  ;;  %v187_v49 = vrot.slane %v186_v38, 2  ;;  %v8469_v22 = vld [vmem:[#allocation6 + $0x704] ss:$56 sps:$4 sm:$0xff]   ;;  %v176_v62 = vadd.f32 %v175_v55, %v174_v28  ;;  %v183_v13 = vrot.slane %v182_v44, 1  ;;  %v10635_v55 = vunpack.c.h.bf16 %v9892_v52 }
  0x73   :  { %6302 = vmatpush1.bf16.msra.mxu0 %v8460_v39  ;;  %6221 = vmatprep.subr.bf16.mxu1 %v8461_v27  ;;  %v205_v24 = vrot.slane %v204_v14, 2  ;;  %v211_v61 = vrot.slane %v210_v53, 2  ;;  %v218_v39 = vadd.f32 %v217_v23, %v216_v48  ;;  %v195_v27 = vrot.slane %v194_v30, 1 }
  0x74   :  { %6303 = vmatprep.subr.bf16.mxu0 %v8463_v37  ;;  %v188_v63 = vadd.f32 %v187_v49, %v186_v38  ;;  %v177_v42 = vrot.slane %v176_v62, 1  ;;  %v10046_v32 = vadd.f32 %v183_v13, %v182_v44  ;;  %v10634_v48 = vunpack.c.l.bf16 %v9892_v52 }
  0x75   :  { %v206_v0 = vadd.f32 %v205_v24, %v204_v14  ;;  %v212_v31 = vadd.f32 %v211_v61, %v210_v53  ;;  %v219_v37 = vrot.slane %v218_v39, 1  ;;  %v10050_v14 = vadd.f32 %v195_v27, %v194_v30 }
  0x76   :  { %6222 = vmatpush1.bf16.msra.mxu1 %v8465_v16  ;;  %v189_v9 = vrot.slane %v188_v63, 1  ;;  %v10044_v28 = vadd.f32 %v177_v42, %v176_v62  ;;  %v10052_v16 = vadd.f32 %v201_v8, %v200_v51  ;;  %v227_v21 = vrot.slane %v10635_v55, 4 }
  0x77   :  { %6304 = vmatpush1.bf16.msra.mxu0 %v8466_v54  ;;  %6232 = vmatprep.subr.bf16.mxu1 %v8469_v22  ;;  %v207_v7 = vrot.slane %v206_v0, 1  ;;  %v213_v6 = vrot.slane %v212_v31, 1  ;;  %v10058_v53 = vadd.f32 %v219_v37, %v218_v39  ;;  %v221_v54 = vrot.slane %v10634_v48, 4 }
  0x78   :  { %6314 = vmatprep.subr.bf16.mxu0 %v8472_v50  ;;  %v10048_v15 = vadd.f32 %v189_v9, %v188_v63  ;;  %v10636_v13 = vunpack.c.l.bf16 %v9898_v58  ;;  %v10637_v49 = vunpack.c.h.bf16 %v9898_v58  ;;  %v10638_v8 = vunpack.c.l.bf16 %v9900_v59 }
  0x79   :  { %v10054_v20 = vadd.f32 %v207_v7, %v206_v0  ;;  %v10056_v38 = vadd.f32 %v213_v6, %v212_v31  ;;  %10633 = vst [vmem:[#allocation15_spill] sm:$0xff] %v10058_v53  ;;  %v10639_v6 = vunpack.c.h.bf16 %v9900_v59  ;;  %v257_v24 = vrot.slane %v10640_v35, 4 }
  0x7a   :  { %v233_v9 = vrot.slane %v10636_v13, 4  ;;  %v239_v56 = vrot.slane %v10637_v49, 4  ;;  %v245_v7 = vrot.slane %v10638_v8, 4  ;;  %v10641_v61 = vunpack.c.h.bf16 %v9902_v60 }
  0x7b   :  { %10631 = vst [vmem:[#allocation13_spill] sm:$0xff] %v10054_v20  ;;  %10632 = vst [vmem:[#allocation14_spill] sm:$0xff] %v10056_v38  ;;  %v251_v22 = vrot.slane %v10639_v6, 4  ;;  %v10642_v50 = vmov %v10634_v48  ;;  %v10643_v44 = vmov %v10635_v55  ;;  %v10644_v30 = vmov %v10636_v13 }
  0x7c   :  { %v263_v23 = vrot.slane %v10641_v61, 4  ;;  %v222_v62 = vadd.f32 %v221_v54, %v10642_v50  ;;  %v228_v63 = vadd.f32 %v227_v21, %v10643_v44  ;;  %v234_v51 = vadd.f32 %v233_v9, %v10644_v30 }
  0x7d   :  { %v10645_v0 = vmov %v10637_v49  ;;  %v10646_v39 = vmov %v10638_v8  ;;  %v10647_v27 = vmov %v10639_v6  ;;  %v10648_v48 = vmov %v10640_v35 }
  0x7e   :  { %v240_v31 = vadd.f32 %v239_v56, %v10645_v0  ;;  %v246_v42 = vadd.f32 %v245_v7, %v10646_v39  ;;  %v252_v37 = vadd.f32 %v251_v22, %v10647_v27  ;;  %v258_v55 = vadd.f32 %v257_v24, %v10648_v48 }
  0x7f   :  { %v10649_v54 = vmov %v10641_v61  ;;  %v223_v52 = vrot.slane %v222_v62, 2  ;;  %v229_v21 = vrot.slane %v228_v63, 2  ;;  %v235_v49 = vrot.slane %v234_v51, 2 }
  0x80   :  { %v264_v13 = vadd.f32 %v263_v23, %v10649_v54  ;;  %v241_v8 = vrot.slane %v240_v31, 2  ;;  %v247_v9 = vrot.slane %v246_v42, 2  ;;  %v253_v6 = vrot.slane %v252_v37, 2 }
  0x81   :  { %v259_v58 = vrot.slane %v258_v55, 2  ;;  %v224_v35 = vadd.f32 %v223_v52, %v222_v62  ;;  %v230_v61 = vadd.f32 %v229_v21, %v228_v63  ;;  %v236_v7 = vadd.f32 %v235_v49, %v234_v51 }
  0x82   :  { %v265_v56 = vrot.slane %v264_v13, 2  ;;  %v242_v50 = vadd.f32 %v241_v8, %v240_v31  ;;  %v248_v59 = vadd.f32 %v247_v9, %v246_v42  ;;  %v254_v22 = vadd.f32 %v253_v6, %v252_v37 }
  0x83   :  { %v260_v44 = vadd.f32 %v259_v58, %v258_v55  ;;  %v225_v24 = vrot.slane %v224_v35, 1  ;;  %v231_v0 = vrot.slane %v230_v61, 1  ;;  %v237_v60 = vrot.slane %v236_v7, 1 }
  0x84   :  { %v266_v30 = vadd.f32 %v265_v56, %v264_v13  ;;  %v243_v23 = vrot.slane %v242_v50, 1  ;;  %v249_v39 = vrot.slane %v248_v59, 1  ;;  %v255_v27 = vrot.slane %v254_v22, 1 }
  0x85   :  { %v261_v48 = vrot.slane %v260_v44, 1  ;;  %v10092_v53 = vadd.f32 %v225_v24, %v224_v35  ;;  %v10094_v38 = vadd.f32 %v231_v0, %v230_v61  ;;  %v10096_v62 = vadd.f32 %v237_v60, %v236_v7 }
  0x86   :  { %v267_v54 = vrot.slane %v266_v30, 1  ;;  %v10098_v63 = vadd.f32 %v243_v23, %v242_v50  ;;  %v10100_v51 = vadd.f32 %v249_v39, %v248_v59  ;;  %v10102_v31 = vadd.f32 %v255_v27, %v254_v22 }
  0x87   :  { %v10104_v42 = vadd.f32 %v261_v48, %v260_v44  ;;  %v10654_v55 = vunpack.c.l.bf16 %v9908_v3  ;;  %v10655_v52 = vunpack.c.h.bf16 %v9908_v3  ;;  %v10656_v49 = vunpack.c.l.bf16 %v9910_v4 }
  0x88   :  { %10650 = vst [vmem:[#allocation16_spill] sm:$0xff] %v10100_v51  ;;  %10651 = vst [vmem:[#allocation17_spill] sm:$0xff] %v10102_v31  ;;  %v10106_v37 = vadd.f32 %v267_v54, %v266_v30  ;;  %v10657_v9 = vunpack.c.h.bf16 %v9910_v4  ;;  %v10658_v58 = vunpack.c.l.bf16 %v9912_v5  ;;  %v10659_v35 = vunpack.c.h.bf16 %v9912_v5 }
  0x89   :  { %10652 = vst [vmem:[#allocation18_spill] sm:$0xff] %v10104_v42  ;;  %v269_v13 = vrot.slane %v10654_v55, 4  ;;  %v275_v21 = vrot.slane %v10655_v52, 4  ;;  %v281_v8 = vrot.slane %v10656_v49, 4  ;;  %v10660_v7 = vunpack.c.l.bf16 %v9918_v10 }
  0x8a   :  { %10653 = vst [vmem:[#allocation19_spill] sm:$0xff] %v10106_v37  ;;  %v287_v6 = vrot.slane %v10657_v9, 4  ;;  %v293_v56 = vrot.slane %v10658_v58, 4  ;;  %v299_v61 = vrot.slane %v10659_v35, 4  ;;  %v10661_v59 = vunpack.c.h.bf16 %v9918_v10 }
  0x8b   :  { %v305_v50 = vrot.slane %v10660_v7, 4  ;;  %v10662_v44 = vmov %v10654_v55  ;;  %v10663_v24 = vmov %v10655_v52  ;;  %v10664_v60 = vmov %v10656_v49 }
  0x8c   :  { %v311_v22 = vrot.slane %v10661_v59, 4  ;;  %v270_v30 = vadd.f32 %v269_v13, %v10662_v44  ;;  %v276_v0 = vadd.f32 %v275_v21, %v10663_v24  ;;  %v282_v23 = vadd.f32 %v281_v8, %v10664_v60 }
  0x8d   :  { %v10665_v39 = vmov %v10657_v9  ;;  %v10666_v48 = vmov %v10658_v58  ;;  %v10667_v55 = vmov %v10659_v35  ;;  %v10668_v49 = vmov %v10660_v7 }
  0x8e   :  { %v288_v27 = vadd.f32 %v287_v6, %v10665_v39  ;;  %v294_v54 = vadd.f32 %v293_v56, %v10666_v48  ;;  %v300_v52 = vadd.f32 %v299_v61, %v10667_v55  ;;  %v306_v9 = vadd.f32 %v305_v50, %v10668_v49 }
  0x8f   :  { %v10669_v13 = vmov %v10661_v59  ;;  %v271_v3 = vrot.slane %v270_v30, 2  ;;  %v277_v21 = vrot.slane %v276_v0, 2  ;;  %v283_v35 = vrot.slane %v282_v23, 2 }
  0x90   :  { %v312_v58 = vadd.f32 %v311_v22, %v10669_v13  ;;  %v289_v7 = vrot.slane %v288_v27, 2  ;;  %v295_v8 = vrot.slane %v294_v54, 2  ;;  %v301_v59 = vrot.slane %v300_v52, 2 }
  0x91   :  { %v307_v4 = vrot.slane %v306_v9, 2  ;;  %v272_v44 = vadd.f32 %v271_v3, %v270_v30  ;;  %v278_v24 = vadd.f32 %v277_v21, %v276_v0  ;;  %v284_v56 = vadd.f32 %v283_v35, %v282_v23 }
  0x92   :  { %v313_v6 = vrot.slane %v312_v58, 2  ;;  %v290_v60 = vadd.f32 %v289_v7, %v288_v27  ;;  %v296_v5 = vadd.f32 %v295_v8, %v294_v54  ;;  %v302_v61 = vadd.f32 %v301_v59, %v300_v52 }
  0x93   :  { %v308_v39 = vadd.f32 %v307_v4, %v306_v9  ;;  %v273_v50 = vrot.slane %v272_v44, 1  ;;  %v279_v55 = vrot.slane %v278_v24, 1  ;;  %v285_v10 = vrot.slane %v284_v56, 1 }
  0x94   :  { %v314_v48 = vadd.f32 %v313_v6, %v312_v58  ;;  %v291_v22 = vrot.slane %v290_v60, 1  ;;  %v297_v49 = vrot.slane %v296_v5, 1  ;;  %v303_v13 = vrot.slane %v302_v61, 1 }
  0x95   :  { %v309_v37 = vrot.slane %v308_v39, 1  ;;  %v10140_v31 = vadd.f32 %v273_v50, %v272_v44  ;;  %v10142_v20 = vadd.f32 %v279_v55, %v278_v24  ;;  %v10144_v30 = vadd.f32 %v285_v10, %v284_v56 }
  0x96   :  { %v315_v42 = vrot.slane %v314_v48, 1  ;;  %v10146_v0 = vadd.f32 %v291_v22, %v290_v60  ;;  %v10148_v23 = vadd.f32 %v297_v49, %v296_v5  ;;  %v10150_v27 = vadd.f32 %v303_v13, %v302_v61 }
  0x97   :  { %v10152_v54 = vadd.f32 %v309_v37, %v308_v39  ;;  %v10674_v9 = vunpack.c.l.bf16 %v9920_v11  ;;  %v10675_v3 = vunpack.c.h.bf16 %v9920_v11  ;;  %v10676_v35 = vunpack.c.l.bf16 %v9922_v12 }
  0x98   :  { %10670 = vst [vmem:[#allocation20_spill] sm:$0xff] %v10148_v23  ;;  %10671 = vst [vmem:[#allocation21_spill] sm:$0xff] %v10150_v27  ;;  %v10154_v52 = vadd.f32 %v315_v42, %v314_v48  ;;  %v10677_v8 = vunpack.c.h.bf16 %v9922_v12  ;;  %v10678_v4 = vunpack.c.l.bf16 %v9928_v18  ;;  %v10679_v37 = vunpack.c.h.bf16 %v9928_v18 }
  0x99   :  { %10672 = vst [vmem:[#allocation22_spill] sm:$0xff] %v10152_v54  ;;  %v317_v58 = vrot.slane %v10674_v9, 4  ;;  %v323_v21 = vrot.slane %v10675_v3, 4  ;;  %v329_v7 = vrot.slane %v10676_v35, 4  ;;  %v10680_v42 = vunpack.c.l.bf16 %v9930_v19 }
  0x9a   :  { %10673 = vst [vmem:[#allocation23_spill] sm:$0xff] %v10154_v52  ;;  %v335_v59 = vrot.slane %v10677_v8, 4  ;;  %v341_v6 = vrot.slane %v10678_v4, 4  ;;  %v347_v44 = vrot.slane %v10679_v37, 4  ;;  %v10681_v56 = vunpack.c.h.bf16 %v9930_v19 }
  0x9b   :  { %v353_v24 = vrot.slane %v10680_v42, 4  ;;  %v10682_v5 = vmov %v10674_v9  ;;  %v10683_v39 = vmov %v10675_v3  ;;  %v10684_v50 = vmov %v10676_v35 }
  0x9c   :  { %v359_v60 = vrot.slane %v10681_v56, 4  ;;  %v318_v61 = vadd.f32 %v317_v58, %v10682_v5  ;;  %v324_v48 = vadd.f32 %v323_v21, %v10683_v39  ;;  %v330_v55 = vadd.f32 %v329_v7, %v10684_v50 }
  0x9d   :  { %v10685_v10 = vmov %v10677_v8  ;;  %v10686_v49 = vmov %v10678_v4  ;;  %v10687_v9 = vmov %v10679_v37  ;;  %v10688_v35 = vmov %v10680_v42 }
  0x9e   :  { %v336_v22 = vadd.f32 %v335_v59, %v10685_v10  ;;  %v342_v13 = vadd.f32 %v341_v6, %v10686_v49  ;;  %v348_v3 = vadd.f32 %v347_v44, %v10687_v9  ;;  %v354_v8 = vadd.f32 %v353_v24, %v10688_v35 }
  0x9f   :  { %v10689_v58 = vmov %v10681_v56  ;;  %v319_v11 = vrot.slane %v318_v61, 2  ;;  %v325_v21 = vrot.slane %v324_v48, 2  ;;  %v331_v37 = vrot.slane %v330_v55, 2 }
  0xa0   :  { %v360_v4 = vadd.f32 %v359_v60, %v10689_v58  ;;  %v337_v42 = vrot.slane %v336_v22, 2  ;;  %v343_v7 = vrot.slane %v342_v13, 2  ;;  %v349_v56 = vrot.slane %v348_v3, 2 }
  0xa1   :  { %v355_v12 = vrot.slane %v354_v8, 2  ;;  %v320_v5 = vadd.f32 %v319_v11, %v318_v61  ;;  %v326_v39 = vadd.f32 %v325_v21, %v324_v48  ;;  %v332_v6 = vadd.f32 %v331_v37, %v330_v55 }
  0xa2   :  { %v361_v59 = vrot.slane %v360_v4, 2  ;;  %v338_v50 = vadd.f32 %v337_v42, %v336_v22  ;;  %v344_v18 = vadd.f32 %v343_v7, %v342_v13  ;;  %v350_v44 = vadd.f32 %v349_v56, %v348_v3 }
  0xa3   :  { %v356_v10 = vadd.f32 %v355_v12, %v354_v8  ;;  %v321_v24 = vrot.slane %v320_v5, 1  ;;  %v327_v9 = vrot.slane %v326_v39, 1  ;;  %v333_v19 = vrot.slane %v332_v6, 1 }
  0xa4   :  { %v362_v49 = vadd.f32 %v361_v59, %v360_v4  ;;  %v339_v60 = vrot.slane %v338_v50, 1  ;;  %v345_v35 = vrot.slane %v344_v18, 1  ;;  %v351_v58 = vrot.slane %v350_v44, 1 }
  0xa5   :  { %v357_v52 = vrot.slane %v356_v10, 1  ;;  %v10188_v27 = vadd.f32 %v321_v24, %v320_v5  ;;  %v10190_v23 = vadd.f32 %v327_v9, %v326_v39  ;;  %v10192_v61 = vadd.f32 %v333_v19, %v332_v6 }
  0xa6   :  { %v363_v54 = vrot.slane %v362_v49, 1  ;;  %v10194_v48 = vadd.f32 %v339_v60, %v338_v50  ;;  %v10196_v55 = vadd.f32 %v345_v35, %v344_v18  ;;  %v10198_v22 = vadd.f32 %v351_v58, %v350_v44 }
  0xa7   :  { %v10200_v13 = vadd.f32 %v357_v52, %v356_v10  ;;  %v10694_v8 = vunpack.c.l.bf16 %v9936_v25  ;;  %v10695_v11 = vunpack.c.h.bf16 %v9936_v25  ;;  %v10696_v37 = vunpack.c.l.bf16 %v9938_v26 }
  0xa8   :  { %10690 = vst [vmem:[#allocation24_spill] sm:$0xff] %v10196_v55  ;;  %10691 = vst [vmem:[#allocation25_spill] sm:$0xff] %v10198_v22  ;;  %v10202_v3 = vadd.f32 %v363_v54, %v362_v49  ;;  %v10697_v7 = vunpack.c.h.bf16 %v9938_v26  ;;  %v10698_v12 = vunpack.c.l.bf16 %v9944_v33  ;;  %v10699_v52 = vunpack.c.h.bf16 %v9944_v33 }
  0xa9   :  { %10692 = vst [vmem:[#allocation26_spill] sm:$0xff] %v10200_v13  ;;  %v365_v4 = vrot.slane %v10694_v8, 4  ;;  %v371_v21 = vrot.slane %v10695_v11, 4  ;;  %v377_v42 = vrot.slane %v10696_v37, 4  ;;  %v10700_v54 = vunpack.c.l.bf16 %v9946_v34 }
  0xaa   :  { %10693 = vst [vmem:[#allocation27_spill] sm:$0xff] %v10202_v3  ;;  %v383_v56 = vrot.slane %v10697_v7, 4  ;;  %v389_v59 = vrot.slane %v10698_v12, 4  ;;  %v395_v5 = vrot.slane %v10699_v52, 4  ;;  %v10701_v6 = vunpack.c.h.bf16 %v9946_v34 }
  0xab   :  { %v401_v39 = vrot.slane %v10700_v54, 4  ;;  %v10702_v18 = vmov %v10694_v8  ;;  %v10703_v10 = vmov %v10695_v11  ;;  %v10704_v24 = vmov %v10696_v37 }
  0xac   :  { %v407_v50 = vrot.slane %v10701_v6, 4  ;;  %v366_v44 = vadd.f32 %v365_v4, %v10702_v18  ;;  %v372_v49 = vadd.f32 %v371_v21, %v10703_v10  ;;  %v378_v9 = vadd.f32 %v377_v42, %v10704_v24 }
  0xad   :  { %v10705_v19 = vmov %v10697_v7  ;;  %v10706_v35 = vmov %v10698_v12  ;;  %v10707_v8 = vmov %v10699_v52  ;;  %v10708_v37 = vmov %v10700_v54 }
  0xae   :  { %v384_v60 = vadd.f32 %v383_v56, %v10705_v19  ;;  %v390_v58 = vadd.f32 %v389_v59, %v10706_v35  ;;  %v396_v11 = vadd.f32 %v395_v5, %v10707_v8  ;;  %v402_v7 = vadd.f32 %v401_v39, %v10708_v37 }
  0xaf   :  { %v10709_v4 = vmov %v10701_v6  ;;  %v367_v25 = vrot.slane %v366_v44, 2  ;;  %v373_v21 = vrot.slane %v372_v49, 2  ;;  %v379_v52 = vrot.slane %v378_v9, 2 }
  0xb0   :  { %v408_v12 = vadd.f32 %v407_v50, %v10709_v4  ;;  %v385_v54 = vrot.slane %v384_v60, 2  ;;  %v391_v42 = vrot.slane %v390_v58, 2  ;;  %v397_v6 = vrot.slane %v396_v11, 2 }
  0xb1   :  { %v403_v26 = vrot.slane %v402_v7, 2  ;;  %v368_v18 = vadd.f32 %v367_v25, %v366_v44  ;;  %v374_v10 = vadd.f32 %v373_v21, %v372_v49  ;;  %v380_v59 = vadd.f32 %v379_v52, %v378_v9 }
  0xb2   :  { %v409_v56 = vrot.slane %v408_v12, 2  ;;  %v386_v24 = vadd.f32 %v385_v54, %v384_v60  ;;  %v392_v33 = vadd.f32 %v391_v42, %v390_v58  ;;  %v398_v5 = vadd.f32 %v397_v6, %v396_v11 }
  0xb3   :  { %v404_v19 = vadd.f32 %v403_v26, %v402_v7  ;;  %v369_v39 = vrot.slane %v368_v18, 1  ;;  %v375_v8 = vrot.slane %v374_v10, 1  ;;  %v381_v34 = vrot.slane %v380_v59, 1 }
  0xb4   :  { %v410_v35 = vadd.f32 %v409_v56, %v408_v12  ;;  %v387_v50 = vrot.slane %v386_v24, 1  ;;  %v393_v37 = vrot.slane %v392_v33, 1  ;;  %v399_v4 = vrot.slane %v398_v5, 1 }
  0xb5   :  { %v405_v3 = vrot.slane %v404_v19, 1  ;;  %v10236_v22 = vadd.f32 %v369_v39, %v368_v18  ;;  %v10238_v55 = vadd.f32 %v375_v8, %v374_v10  ;;  %v10240_v44 = vadd.f32 %v381_v34, %v380_v59 }
  0xb6   :  { %v411_v13 = vrot.slane %v410_v35, 1  ;;  %v10242_v49 = vadd.f32 %v387_v50, %v386_v24  ;;  %v10244_v9 = vadd.f32 %v393_v37, %v392_v33  ;;  %v10246_v60 = vadd.f32 %v399_v4, %v398_v5 }
  0xb7   :  { %v10248_v58 = vadd.f32 %v405_v3, %v404_v19  ;;  %v10714_v7 = vunpack.c.l.bf16 %v9952_v40  ;;  %v10715_v25 = vunpack.c.h.bf16 %v9952_v40  ;;  %v10716_v52 = vunpack.c.l.bf16 %v9954_v41 }
  0xb8   :  { %10710 = vst [vmem:[#allocation28_spill] sm:$0xff] %v10244_v9  ;;  %10711 = vst [vmem:[#allocation29_spill] sm:$0xff] %v10246_v60  ;;  %v10250_v11 = vadd.f32 %v411_v13, %v410_v35  ;;  %v10717_v42 = vunpack.c.h.bf16 %v9954_v41  ;;  %v10718_v26 = vunpack.c.l.bf16 %v9960_v46  ;;  %v10719_v3 = vunpack.c.h.bf16 %v9960_v46 }
  0xb9   :  { %10712 = vst [vmem:[#allocation30_spill] sm:$0xff] %v10248_v58  ;;  %v413_v12 = vrot.slane %v10714_v7, 4  ;;  %v419_v21 = vrot.slane %v10715_v25, 4  ;;  %v425_v54 = vrot.slane %v10716_v52, 4  ;;  %v10720_v13 = vunpack.c.l.bf16 %v9962_v47 }
  0xba   :  { %10713 = vst [vmem:[#allocation31_spill] sm:$0xff] %v10250_v11  ;;  %v431_v6 = vrot.slane %v10717_v42, 4  ;;  %v437_v56 = vrot.slane %v10718_v26, 4  ;;  %v443_v18 = vrot.slane %v10719_v3, 4  ;;  %v10721_v59 = vunpack.c.h.bf16 %v9962_v47 }
  0xbb   :  { %v449_v10 = vrot.slane %v10720_v13, 4  ;;  %v10722_v33 = vmov %v10714_v7  ;;  %v10723_v19 = vmov %v10715_v25  ;;  %v10724_v39 = vmov %v10716_v52 }
  0xbc   :  { %v455_v24 = vrot.slane %v10721_v59, 4  ;;  %v414_v5 = vadd.f32 %v413_v12, %v10722_v33  ;;  %v420_v35 = vadd.f32 %v419_v21, %v10723_v19  ;;  %v426_v8 = vadd.f32 %v425_v54, %v10724_v39 }
  0xbd   :  { %v10725_v34 = vmov %v10717_v42  ;;  %v10726_v37 = vmov %v10718_v26  ;;  %v10727_v7 = vmov %v10719_v3  ;;  %v10728_v52 = vmov %v10720_v13 }
  0xbe   :  { %v432_v50 = vadd.f32 %v431_v6, %v10725_v34  ;;  %v438_v4 = vadd.f32 %v437_v56, %v10726_v37  ;;  %v444_v25 = vadd.f32 %v443_v18, %v10727_v7  ;;  %v450_v42 = vadd.f32 %v449_v10, %v10728_v52 }
  0xbf   :  { %v10729_v12 = vmov %v10721_v59  ;;  %v415_v40 = vrot.slane %v414_v5, 2  ;;  %v421_v21 = vrot.slane %v420_v35, 2  ;;  %v427_v3 = vrot.slane %v426_v8, 2 }
  0xc0   :  { %v456_v26 = vadd.f32 %v455_v24, %v10729_v12  ;;  %v433_v13 = vrot.slane %v432_v50, 2  ;;  %v439_v54 = vrot.slane %v438_v4, 2  ;;  %v445_v59 = vrot.slane %v444_v25, 2 }
  0xc1   :  { %v451_v41 = vrot.slane %v450_v42, 2  ;;  %v416_v33 = vadd.f32 %v415_v40, %v414_v5  ;;  %v422_v19 = vadd.f32 %v421_v21, %v420_v35  ;;  %v428_v56 = vadd.f32 %v427_v3, %v426_v8 }
  0xc2   :  { %v457_v6 = vrot.slane %v456_v26, 2  ;;  %v434_v39 = vadd.f32 %v433_v13, %v432_v50  ;;  %v440_v46 = vadd.f32 %v439_v54, %v438_v4  ;;  %v446_v18 = vadd.f32 %v445_v59, %v444_v25 }
  0xc3   :  { %v452_v34 = vadd.f32 %v451_v41, %v450_v42  ;;  %v417_v10 = vrot.slane %v416_v33, 1  ;;  %v423_v7 = vrot.slane %v422_v19, 1  ;;  %v429_v47 = vrot.slane %v428_v56, 1 }
  0xc4   :  { %v458_v37 = vadd.f32 %v457_v6, %v456_v26  ;;  %v435_v24 = vrot.slane %v434_v39, 1  ;;  %v441_v52 = vrot.slane %v440_v46, 1  ;;  %v447_v12 = vrot.slane %v446_v18, 1 }
  0xc5   :  { %v453_v11 = vrot.slane %v452_v34, 1  ;;  %v10284_v60 = vadd.f32 %v417_v10, %v416_v33  ;;  %v10286_v9 = vadd.f32 %v423_v7, %v422_v19  ;;  %v10288_v5 = vadd.f32 %v429_v47, %v428_v56 }
  0xc6   :  { %v459_v58 = vrot.slane %v458_v37, 1  ;;  %v10290_v35 = vadd.f32 %v435_v24, %v434_v39  ;;  %v10292_v8 = vadd.f32 %v441_v52, %v440_v46  ;;  %v10294_v50 = vadd.f32 %v447_v12, %v446_v18 }
  0xc7   :  { %v10296_v4 = vadd.f32 %v453_v11, %v452_v34  ;;  %v10734_v42 = vunpack.c.l.bf16 %v9964_v57  ;;  %v10735_v40 = vunpack.c.h.bf16 %v9964_v57  ;;  %v10736_v3 = vunpack.c.l.bf16 %v9970_v36 }
  0xc8   :  { %10730 = vst [vmem:[#allocation32_spill] sm:$0xff] %v10292_v8  ;;  %10731 = vst [vmem:[#allocation33_spill] sm:$0xff] %v10294_v50  ;;  %v10298_v25 = vadd.f32 %v459_v58, %v458_v37  ;;  %v10737_v54 = vunpack.c.h.bf16 %v9970_v36  ;;  %v10738_v41 = vunpack.c.l.bf16 %v9972_v1  ;;  %v10739_v11 = vunpack.c.h.bf16 %v9972_v1 }
  0xc9   :  { %10732 = vst [vmem:[#allocation34_spill] sm:$0xff] %v10296_v4  ;;  %v461_v26 = vrot.slane %v10734_v42, 4  ;;  %v467_v21 = vrot.slane %v10735_v40, 4  ;;  %v473_v13 = vrot.slane %v10736_v3, 4  ;;  %v10740_v58 = vunpack.c.l.bf16 %v9974_v2 }
  0xca   :  { %10733 = vst [vmem:[#allocation35_spill] sm:$0xff] %v10298_v25  ;;  %v479_v59 = vrot.slane %v10737_v54, 4  ;;  %v485_v6 = vrot.slane %v10738_v41, 4  ;;  %v491_v33 = vrot.slane %v10739_v11, 4  ;;  %v10741_v56 = vunpack.c.h.bf16 %v9974_v2 }
  0xcb   :  { %v497_v19 = vrot.slane %v10740_v58, 4  ;;  %v10742_v46 = vmov %v10734_v42  ;;  %v10743_v34 = vmov %v10735_v40  ;;  %v10744_v10 = vmov %v10736_v3 }
  0xcc   :  { %v503_v39 = vrot.slane %v10741_v56, 4  ;;  %v462_v18 = vadd.f32 %v461_v26, %v10742_v46  ;;  %v468_v37 = vadd.f32 %v467_v21, %v10743_v34  ;;  %v474_v7 = vadd.f32 %v473_v13, %v10744_v10 }
  0xcd   :  { %v10745_v47 = vmov %v10737_v54  ;;  %v10746_v52 = vmov %v10738_v41  ;;  %v10747_v42 = vmov %v10739_v11  ;;  %v10748_v3 = vmov %v10740_v58 }
  0xce   :  { %v480_v24 = vadd.f32 %v479_v59, %v10745_v47  ;;  %v486_v12 = vadd.f32 %v485_v6, %v10746_v52  ;;  %v492_v40 = vadd.f32 %v491_v33, %v10747_v42  ;;  %v498_v54 = vadd.f32 %v497_v19, %v10748_v3 }
  0xcf   :  { %v10749_v26 = vmov %v10741_v56  ;;  %v463_v57 = vrot.slane %v462_v18, 2  ;;  %v469_v21 = vrot.slane %v468_v37, 2  ;;  %v475_v11 = vrot.slane %v474_v7, 2 }
  0xd0   :  { %v504_v41 = vadd.f32 %v503_v39, %v10749_v26  ;;  %v481_v58 = vrot.slane %v480_v24, 2  ;;  %v487_v13 = vrot.slane %v486_v12, 2  ;;  %v493_v56 = vrot.slane %v492_v40, 2 }
  0xd1   :  { %v499_v36 = vrot.slane %v498_v54, 2  ;;  %v464_v46 = vadd.f32 %v463_v57, %v462_v18  ;;  %v470_v34 = vadd.f32 %v469_v21, %v468_v37  ;;  %v476_v6 = vadd.f32 %v475_v11, %v474_v7 }
  0xd2   :  { %v505_v59 = vrot.slane %v504_v41, 2  ;;  %v482_v10 = vadd.f32 %v481_v58, %v480_v24  ;;  %v488_v1 = vadd.f32 %v487_v13, %v486_v12  ;;  %v494_v33 = vadd.f32 %v493_v56, %v492_v40 }
  0xd3   :  { %v500_v47 = vadd.f32 %v499_v36, %v498_v54  ;;  %v465_v19 = vrot.slane %v464_v46, 1  ;;  %v471_v42 = vrot.slane %v470_v34, 1  ;;  %v477_v2 = vrot.slane %v476_v6, 1 }
  0xd4   :  { %v506_v52 = vadd.f32 %v505_v59, %v504_v41  ;;  %v483_v39 = vrot.slane %v482_v10, 1  ;;  %v489_v3 = vrot.slane %v488_v1, 1  ;;  %v495_v26 = vrot.slane %v494_v33, 1 }
  0xd5   :  { %v501_v25 = vrot.slane %v500_v47, 1  ;;  %v10332_v50 = vadd.f32 %v465_v19, %v464_v46  ;;  %v10334_v8 = vadd.f32 %v471_v42, %v470_v34  ;;  %v10336_v18 = vadd.f32 %v477_v2, %v476_v6 }
  0xd6   :  { %v507_v4 = vrot.slane %v506_v52, 1  ;;  %v10338_v37 = vadd.f32 %v483_v39, %v482_v10  ;;  %v10340_v7 = vadd.f32 %v489_v3, %v488_v1  ;;  %v10342_v24 = vadd.f32 %v495_v26, %v494_v33 }
  0xd7   :  { %v10344_v12 = vadd.f32 %v501_v25, %v500_v47  ;;  %v10754_v54 = vunpack.c.l.bf16 %v9980_v29  ;;  %v10755_v57 = vunpack.c.h.bf16 %v9980_v29  ;;  %v10756_v11 = vunpack.c.l.bf16 %v9986_v45 }
  0xd8   :  { %10750 = vst [vmem:[#allocation36_spill] sm:$0xff] %v10340_v7  ;;  %10751 = vst [vmem:[#allocation37_spill] sm:$0xff] %v10342_v24  ;;  %v10346_v40 = vadd.f32 %v507_v4, %v506_v52  ;;  %v10757_v13 = vunpack.c.h.bf16 %v9986_v45  ;;  %v10758_v36 = vunpack.c.l.bf16 %v9992_v17  ;;  %v10759_v25 = vunpack.c.h.bf16 %v9992_v17 }
  0xd9   :  { %10752 = vst [vmem:[#allocation38_spill] sm:$0xff] %v10344_v12  ;;  %v509_v41 = vrot.slane %v10754_v54, 4  ;;  %v515_v21 = vrot.slane %v10755_v57, 4  ;;  %v521_v58 = vrot.slane %v10756_v11, 4  ;;  %v10760_v46 = vunpack.c.l.bf16 %v9994_v43 }
  0xda   :  { %10753 = vst [vmem:[#allocation39_spill] sm:$0xff] %v10346_v40  ;;  %v527_v56 = vrot.slane %v10757_v13, 4  ;;  %v533_v59 = vrot.slane %v10758_v36, 4  ;;  %v539_v4 = vrot.slane %v10759_v25, 4  ;;  %v10761_v6 = vunpack.c.h.bf16 %v9994_v43 }
  0xdb   :  { %v545_v34 = vrot.slane %v10760_v46, 4  ;;  %v10762_v1 = vmov %v10754_v54  ;;  %v10763_v47 = vmov %v10755_v57  ;;  %v10764_v19 = vmov %v10756_v11 }
  0xdc   :  { %v551_v10 = vrot.slane %v10761_v6, 4  ;;  %v510_v33 = vadd.f32 %v509_v41, %v10762_v1  ;;  %v516_v52 = vadd.f32 %v515_v21, %v10763_v47  ;;  %v522_v42 = vadd.f32 %v521_v58, %v10764_v19 }
  0xdd   :  { %v10765_v2 = vmov %v10757_v13  ;;  %v10766_v3 = vmov %v10758_v36  ;;  %v10767_v54 = vmov %v10759_v25  ;;  %v10768_v11 = vmov %v10760_v46 }
  0xde   :  { %v528_v39 = vadd.f32 %v527_v56, %v10765_v2  ;;  %v534_v26 = vadd.f32 %v533_v59, %v10766_v3  ;;  %v540_v57 = vadd.f32 %v539_v4, %v10767_v54  ;;  %v546_v13 = vadd.f32 %v545_v34, %v10768_v11 }
  0xdf   :  { %v10769_v41 = vmov %v10761_v6  ;;  %v511_v21 = vrot.slane %v510_v33, 2  ;;  %v517_v36 = vrot.slane %v516_v52, 2  ;;  %v523_v58 = vrot.slane %v522_v42, 2 }
  0xe0   :  { %v552_v29 = vadd.f32 %v551_v10, %v10769_v41  ;;  %v529_v25 = vrot.slane %v528_v39, 2  ;;  %v535_v45 = vrot.slane %v534_v26, 2  ;;  %v541_v56 = vrot.slane %v540_v57, 2 }
  0xe1   :  { %v547_v46 = vrot.slane %v546_v13, 2  ;;  %v512_v59 = vadd.f32 %v511_v21, %v510_v33  ;;  %v518_v17 = vadd.f32 %v517_v36, %v516_v52  ;;  %v524_v4 = vadd.f32 %v523_v58, %v522_v42  ;;  %v10774_v58 = vld [vmem:[#allocation18_spill] sm:$0xff] }
  0xe2   :  { %v553_v6 = vrot.slane %v552_v29, 2  ;;  %v530_v1 = vadd.f32 %v529_v25, %v528_v39  ;;  %v536_v34 = vadd.f32 %v535_v45, %v534_v26  ;;  %v542_v47 = vadd.f32 %v541_v56, %v540_v57  ;;  %v10775_v25 = vld [vmem:[#allocation15_spill] sm:$0xff]  ;;  %v10777_v45 = vld [vmem:[#allocation20_spill] sm:$0xff]  ;;  %v10778_v56 = vld [vmem:[#allocation21_spill] sm:$0xff] }
  0xe3   :  { %v548_v43 = vadd.f32 %v547_v46, %v546_v13  ;;  %v513_v19 = vrot.slane %v512_v59, 1  ;;  %v519_v2 = vrot.slane %v518_v17, 1  ;;  %v525_v3 = vrot.slane %v524_v4, 1 }
  0xe4   :  { %v554_v10 = vadd.f32 %v553_v6, %v552_v29  ;;  %v531_v54 = vrot.slane %v530_v1, 1  ;;  %v537_v11 = vrot.slane %v536_v34, 1  ;;  %v543_v41 = vrot.slane %v542_v47, 1  ;;  %v10779_v6 = vld [vmem:[#allocation22_spill] sm:$0xff] }
  0xe5   :  { %v549_v40 = vrot.slane %v548_v43, 1  ;;  %v514_v24 = vadd.f32 %v513_v19, %v512_v59  ;;  %v520_v7 = vadd.f32 %v519_v2, %v518_v17  ;;  %v526_v51 = vadd.f32 %v525_v3, %v524_v4  ;;  %v10780_v59 = vld [vmem:[#allocation23_spill] sm:$0xff]  ;;  %v10781_v4 = vld [vmem:[#allocation24_spill] sm:$0xff] }
  0xe6   :  { %v555_v12 = vrot.slane %v554_v10, 1  ;;  %v532_v33 = vadd.f32 %v531_v54, %v530_v1  ;;  %v538_v52 = vadd.f32 %v537_v11, %v536_v34  ;;  %v544_v42 = vadd.f32 %v543_v41, %v542_v47  ;;  %v10782_v34 = vld [vmem:[#allocation25_spill] sm:$0xff]  ;;  %v10784_v19 = vld [vmem:[#allocation27_spill] sm:$0xff]  ;;  %v10785_v3 = vld [vmem:[#allocation28_spill] sm:$0xff] }
  0xe7   :  { %v550_v39 = vadd.f32 %v549_v40, %v548_v43  ;;  %v622_v26 = vsel %vm621_vm0, %v10092_v53, %v10044_v28  ;;  %v635_v57 = vsel %vm621_vm0, %v10094_v38, %v10046_v32  ;;  %v642_v13 = vsel %vm621_vm0, %v10096_v62, %v10048_v15  ;;  %v10783_v43 = vld [vmem:[#allocation26_spill] sm:$0xff]  ;;  %v10786_v11 = vld [vmem:[#allocation29_spill] sm:$0xff] }
  0xe8   :  { %v556_v21 = vadd.f32 %v555_v12, %v554_v10  ;;  %v649_v29 = vsel %vm621_vm0, %v10098_v63, %v10050_v14  ;;  %v624_v40 = vsel %vm623_vm1, %v10140_v31, %v622_v26  ;;  %v636_v12 = vsel %vm623_vm1, %v10142_v20, %v635_v57  ;;  %v10788_v57 = vld [vmem:[#allocation31_spill] sm:$0xff] }
  0xe9   :  { %v643_v28 = vsel %vm623_vm1, %v10144_v30, %v642_v13  ;;  %v650_v32 = vsel %vm623_vm1, %v10146_v0, %v649_v29  ;;  %v626_v38 = vsel %vm625_vm2, %v10188_v27, %v624_v40  ;;  %v637_v15 = vsel %vm625_vm2, %v10190_v23, %v636_v12  ;;  %v723_v29 = vpop.permute.xlu0 %722  ;;  %v10789_v40 = vld [vmem:[#allocation32_spill] sm:$0xff] }
  0xea   :  { %v644_v14 = vsel %vm625_vm2, %v10192_v61, %v643_v28  ;;  %v651_v53 = vsel %vm625_vm2, %v10194_v48, %v650_v32  ;;  %v628_v20 = vsel %vm627_vm3, %v10236_v22, %v626_v38  ;;  %v638_v62 = vsel %vm627_vm3, %v10238_v55, %v637_v15  ;;  %v10790_v28 = vld [vmem:[#allocation33_spill] sm:$0xff]  ;;  %v10791_v38 = vld [vmem:[#allocation34_spill] sm:$0xff] }
  0xeb   :  { %v645_v63 = vsel %vm627_vm3, %v10240_v44, %v644_v14  ;;  %v652_v31 = vsel %vm627_vm3, %v10242_v49, %v651_v53  ;;  %v630_v30 = vsel %vm629_vm4, %v10284_v60, %v628_v20  ;;  %v639_v0 = vsel %vm629_vm4, %v10286_v9, %v638_v62  ;;  %v10792_v14 = vld [vmem:[#allocation35_spill] sm:$0xff]  ;;  %v10793_v20 = vld [vmem:[#allocation36_spill] sm:$0xff] }
  0xec   :  { %v646_v23 = vsel %vm629_vm4, %v10288_v5, %v645_v63  ;;  %v653_v27 = vsel %vm629_vm4, %v10290_v35, %v652_v31  ;;  %v632_v61 = vsel %vm631_vm5, %v10332_v50, %v630_v30  ;;  %v640_v48 = vsel %vm631_vm5, %v10334_v8, %v639_v0  ;;  %v10770_v5 = vld [vmem:[#allocation16_spill] sm:$0xff]  ;;  %v10771_v50 = vld [vmem:[#allocation13_spill] sm:$0xff]  ;;  %v10795_v30 = vld [vmem:[#allocation38_spill] sm:$0xff] }
  0xed   :  { %v647_v55 = vsel %vm631_vm5, %v10336_v18, %v646_v23  ;;  %v654_v22 = vsel %vm631_vm5, %v10338_v37, %v653_v27  ;;  %v634_v44 = vsel %vm633_vm6, %v514_v24, %v632_v61  ;;  %v641_v49 = vsel %vm633_vm6, %v520_v7, %v640_v48  ;;  %v10772_v8 = vld [vmem:[#allocation17_spill] sm:$0xff]  ;;  %v10773_v18 = vld [vmem:[#allocation14_spill] sm:$0xff]  ;;  %v10776_v24 = vld [vmem:[#allocation19_spill] sm:$0xff] }
  0xee   :  { %v648_v9 = vsel %vm633_vm6, %v526_v51, %v647_v55  ;;  %v655_v60 = vsel %vm633_vm6, %v532_v33, %v654_v22  ;;  %v656_v35 = vsel %vm621_vm0, %v10770_v5, %v10052_v16  ;;  %v663_v36 = vsel %vm621_vm0, %v10772_v8, %v10771_v50  ;;  %v10787_v33 = vld [vmem:[#allocation30_spill] sm:$0xff]  ;;  %v10794_v63 = vld [vmem:[#allocation37_spill] sm:$0xff]  ;;  %v10796_v23 = vld [vmem:[#allocation39_spill] sm:$0xff] }
  0xef   :  { %v670_v37 = vsel %vm621_vm0, %v10774_v58, %v10773_v18  ;;  %v677_v7 = vsel %vm621_vm0, %v10776_v24, %v10775_v25  ;;  %v657_v51 = vsel %vm623_vm1, %v10777_v45, %v656_v35  ;;  %v664_v46 = vsel %vm623_vm1, %v10778_v56, %v663_v36  ;;  %v8476_v45 = vld [vmem:[#allocation6 + $0x1570] ss:$56 sps:$4 sm:$0xff]   ;;  %v8484_v56 = vld [vmem:[#allocation6 + $0x15e4] ss:$56 sps:$4 sm:$0xff]  }
  0xf0   :  { %v671_v16 = vsel %vm623_vm1, %v10779_v6, %v670_v37  ;;  %v678_v17 = vsel %vm623_vm1, %v10780_v59, %v677_v7  ;;  %v658_v1 = vsel %vm625_vm2, %v10781_v4, %v657_v51  ;;  %v665_v47 = vsel %vm625_vm2, %v10782_v34, %v664_v46  ;;  %v8481_v51 = vld [vmem:[#allocation6 + $0x7e4] ss:$56 sps:$4 sm:$0xff]   ;;  %v8479_v46 = vld [vmem:[#allocation6 + $0x7e0] ss:$56 sps:$4 sm:$0xff]   ;;  %v8485_v59 = vld [vmem:[#allocation6 + $0x850] ss:$56 sps:$4 sm:$0xff]  }
  0xf1   :  { %v672_v10 = vsel %vm625_vm2, %v10783_v43, %v671_v16  ;;  %v679_v2 = vsel %vm625_vm2, %v10784_v19, %v678_v17  ;;  %v659_v54 = vsel %vm627_vm3, %v10785_v3, %v658_v1  ;;  %v666_v41 = vsel %vm627_vm3, %v10786_v11, %v665_v47  ;;  %v8482_v6 = vld [vmem:[#allocation6 + $0x15e0] ss:$56 sps:$4 sm:$0xff]   ;;  %v8487_v16 = vld [vmem:[#allocation6 + $0x854] ss:$56 sps:$4 sm:$0xff]   ;;  %v8488_v4 = vld [vmem:[#allocation6 + $0x1650] ss:$56 sps:$4 sm:$0xff]  }
  0xf2   :  { %v673_v26 = vsel %vm627_vm3, %v10787_v33, %v672_v10  ;;  %v680_v13 = vsel %vm627_vm3, %v10788_v57, %v679_v2  ;;  %v660_v12 = vsel %vm629_vm4, %v10789_v40, %v659_v54  ;;  %v667_v32 = vsel %vm629_vm4, %v10790_v28, %v666_v41  ;;  %v8490_v17 = vld [vmem:[#allocation6 + $0x1654] ss:$56 sps:$4 sm:$0xff]   ;;  %v8493_v1 = vld [vmem:[#allocation6 + $0x8c4] ss:$56 sps:$4 sm:$0xff]   ;;  %v8491_v34 = vld [vmem:[#allocation6 + $0x8c0] ss:$56 sps:$4 sm:$0xff]  }
  0xf3   :  { %v674_v15 = vsel %vm629_vm4, %v10791_v38, %v673_v26  ;;  %v681_v53 = vsel %vm629_vm4, %v10792_v14, %v680_v13  ;;  %v661_v62 = vsel %vm631_vm5, %v10793_v20, %v660_v12  ;;  %v668_v31 = vsel %vm631_vm5, %v10794_v63, %v667_v32  ;;  %v8496_v47 = vld [vmem:[#allocation6 + $0x16c4] ss:$56 sps:$4 sm:$0xff]   ;;  %v8494_v43 = vld [vmem:[#allocation6 + $0x16c0] ss:$56 sps:$4 sm:$0xff]   ;;  %v8499_v10 = vld [vmem:[#allocation6 + $0x934] ss:$56 sps:$4 sm:$0xff]  }
  0xf4   :  { %v675_v0 = vsel %vm631_vm5, %v10795_v30, %v674_v15  ;;  %v682_v27 = vsel %vm631_vm5, %v10796_v23, %v681_v53  ;;  %v662_v61 = vsel %vm633_vm6, %v538_v52, %v661_v62  ;;  %v669_v48 = vsel %vm633_vm6, %v544_v42, %v668_v31  ;;  %v8467_v52 = vld [vmem:[#allocation6 + $0x700] ss:$56 sps:$4 sm:$0xff]   ;;  %v8497_v19 = vld [vmem:[#allocation6 + $0x930] ss:$56 sps:$4 sm:$0xff]   ;;  %v8502_v2 = vld [vmem:[#allocation6 + $0x1734] ss:$56 sps:$4 sm:$0xff]  }
  0xf5   :  { %v676_v55 = vsel %vm633_vm6, %v550_v39, %v675_v0  ;;  %v683_v22 = vsel %vm633_vm6, %v556_v21, %v682_v27  ;;  %v725_v5 = vmul.f32 %v723_v29, %v634_v44  ;;  %v726_v35 = vmul.f32 %v723_v29, %v641_v49  ;;  %v8470_v21 = vld [vmem:[#allocation6 + $0x1500] ss:$56 sps:$4 sm:$0xff]   ;;  %v8475_v44 = vld [vmem:[#allocation6 + $0x774] ss:$56 sps:$4 sm:$0xff]   ;;  %v8500_v3 = vld [vmem:[#allocation6 + $0x1730] ss:$56 sps:$4 sm:$0xff]  }
  0xf6   :  { %v10492_v50 = vmul.f32 %v723_v29, %v648_v9  ;;  %v728_v8 = vmul.f32 %v723_v29, %v655_v60  ;;  %v729_v36 = vmul.f32 %v723_v29, %v662_v61  ;;  %v730_v18 = vmul.f32 %v723_v29, %v669_v48  ;;  %v8473_v9 = vld [vmem:[#allocation6 + $0x770] ss:$56 sps:$4 sm:$0xff]   ;;  %v8478_v60 = vld [vmem:[#allocation6 + $0x1574] ss:$56 sps:$4 sm:$0xff]   ;;  %v8505_v54 = vld [vmem:[#allocation6 + $0x9a4] ss:$56 sps:$4 sm:$0xff]  }
  0xf7   :  { %v10494_v58 = vmul.f32 %v723_v29, %v676_v55  ;;  %v732_v37 = vmul.f32 %v723_v29, %v683_v22  ;;  %v10496_v25 = vpack.c.bf16 %v725_v5, %v725_v5  ;;  %v10498_v24 = vpack.c.bf16 %v726_v35, %v726_v35  ;;  %v8503_v11 = vld [vmem:[#allocation6 + $0x9a0] ss:$56 sps:$4 sm:$0xff]   ;;  %v8508_v41 = vld [vmem:[#allocation6 + $0x17a4] ss:$56 sps:$4 sm:$0xff]   ;;  %v8511_v26 = vld [vmem:[#allocation6 + $0xa14] ss:$56 sps:$4 sm:$0xff]  }
  0xf8   :  { %v10500_v42 = vpack.c.bf16 %v729_v36, %v729_v36  ;;  %v10502_v39 = vpack.c.bf16 %v730_v18, %v730_v18  ;;  %v10505_v49 = vpack.c.bf16 %v728_v8, %v728_v8  ;;  %v8506_v33 = vld [vmem:[#allocation6 + $0x17a0] ss:$56 sps:$4 sm:$0xff]   ;;  %v8509_v57 = vld [vmem:[#allocation6 + $0xa10] ss:$56 sps:$4 sm:$0xff]   ;;  %v8514_v13 = vld [vmem:[#allocation6 + $0x1814] ss:$56 sps:$4 sm:$0xff]  }
  0xf9   :  { %6223 = vmatprep.mubr.bf16.mxu1 %v10498_v24  ;;  %v10509_v7 = vpack.c.bf16 %v732_v37, %v732_v37  ;;  %v8512_v29 = vld [vmem:[#allocation6 + $0x1810] ss:$56 sps:$4 sm:$0xff]   ;;  %v8517_v40 = vld [vmem:[#allocation6 + $0xa84] ss:$56 sps:$4 sm:$0xff]   ;;  %v8515_v12 = vld [vmem:[#allocation6 + $0xa80] ss:$56 sps:$4 sm:$0xff]  }
  0xfa   :  { %6305 = vmatprep.mubr.bf16.mxu0 %v10502_v39  ;;  %6224 = vmatmul.mubr.bf16.vlgmr.msra.gmra.mrb[0].mxu1 %v10496_v25  ;;  %v8520_v28 = vld [vmem:[#allocation6 + $0x1884] ss:$56 sps:$4 sm:$0xff]   ;;  %v8518_v32 = vld [vmem:[#allocation6 + $0x1880] ss:$56 sps:$4 sm:$0xff]   ;;  %v8523_v38 = vld [vmem:[#allocation6 + $0xaf4] ss:$56 sps:$4 sm:$0xff]  }
  0xfb   :  { %6233 = vmatpush1.bf16.msra.mxu1 %v8467_v52  ;;  %6306 = vmatmul.mubr.bf16.vlgmr.msra.gmra.mrb[0].mxu0 %v10500_v42  ;;  %v8521_v15 = vld [vmem:[#allocation6 + $0xaf0] ss:$56 sps:$4 sm:$0xff]   ;;  %v8526_v14 = vld [vmem:[#allocation6 + $0x18f4] ss:$56 sps:$4 sm:$0xff]   ;;  %v8529_v20 = vld [vmem:[#allocation6 + $0xb64] ss:$56 sps:$4 sm:$0xff]  }
  0xfc   :  { %6315 = vmatpush1.bf16.msra.mxu0 %v8470_v21  ;;  %6264 = vmatprep.mubr.bf16.mxu1 %v10505_v49  ;;  %v8524_v53 = vld [vmem:[#allocation6 + $0x18f0] ss:$56 sps:$4 sm:$0xff]   ;;  %v8527_v62 = vld [vmem:[#allocation6 + $0xb60] ss:$56 sps:$4 sm:$0xff]   ;;  %v8532_v63 = vld [vmem:[#allocation6 + $0x1964] ss:$56 sps:$4 sm:$0xff]  }
  0xfd   :  { %6346 = vmatprep.mubr.bf16.mxu0 %v10509_v7  ;;  %6234 = vmatprep.subr.bf16.mxu1 %v8475_v44  ;;  %v8530_v31 = vld [vmem:[#allocation6 + $0x1960] ss:$56 sps:$4 sm:$0xff]   ;;  %v8535_v30 = vld [vmem:[#allocation6 + $0xbd4] ss:$56 sps:$4 sm:$0xff]   ;;  %v8533_v0 = vld [vmem:[#allocation6 + $0xbd0] ss:$56 sps:$4 sm:$0xff]  }
  0xfe   :  { %6316 = vmatprep.subr.bf16.mxu0 %v8478_v60  ;;  %v8538_v23 = vld [vmem:[#allocation6 + $0x19d4] ss:$56 sps:$4 sm:$0xff]   ;;  %v8536_v27 = vld [vmem:[#allocation6 + $0x19d0] ss:$56 sps:$4 sm:$0xff]   ;;  %v8541_v61 = vld [vmem:[#allocation6 + $0xc44] ss:$56 sps:$4 sm:$0xff]  }
  0xff   :  { %6235 = vmatpush1.bf16.msra.mxu1 %v8473_v9  ;;  %v8539_v48 = vld [vmem:[#allocation6 + $0xc40] ss:$56 sps:$4 sm:$0xff]   ;;  %v8544_v55 = vld [vmem:[#allocation6 + $0x1a44] ss:$56 sps:$4 sm:$0xff]   ;;  %v8547_v5 = vld [vmem:[#allocation6 + $0xcb4] ss:$56 sps:$4 sm:$0xff]  }
 0x100   :  { %6317 = vmatpush1.bf16.msra.mxu0 %v8476_v45  ;;  %6236 = vmatprep.subr.bf16.mxu1 %v8481_v51  ;;  %v8542_v22 = vld [vmem:[#allocation6 + $0x1a40] ss:$56 sps:$4 sm:$0xff]   ;;  %v8545_v35 = vld [vmem:[#allocation6 + $0xcb0] ss:$56 sps:$4 sm:$0xff]   ;;  %v8550_v8 = vld [vmem:[#allocation6 + $0x1ab4] ss:$56 sps:$4 sm:$0xff]  }
 0x101   :  { %6318 = vmatprep.subr.bf16.mxu0 %v8484_v56  ;;  %v8548_v36 = vld [vmem:[#allocation6 + $0x1ab0] ss:$56 sps:$4 sm:$0xff]   ;;  %v8553_v18 = vld [vmem:[#allocation6 + $0xd24] ss:$56 sps:$4 sm:$0xff]   ;;  %v8551_v37 = vld [vmem:[#allocation6 + $0xd20] ss:$56 sps:$4 sm:$0xff]  }
 0x102   :  { %v8556_v52 = vld [vmem:[#allocation6 + $0x1b24] ss:$56 sps:$4 sm:$0xff]   ;;  %v8554_v21 = vld [vmem:[#allocation6 + $0x1b20] ss:$56 sps:$4 sm:$0xff]   ;;  %v8559_v44 = vld [vmem:[#allocation6 + $0xd94] ss:$56 sps:$4 sm:$0xff]  }
 0x103   :  { %6237 = vmatpush1.bf16.msra.mxu1 %v8479_v46  ;;  %v8557_v9 = vld [vmem:[#allocation6 + $0xd90] ss:$56 sps:$4 sm:$0xff]   ;;  %v8562_v60 = vld [vmem:[#allocation6 + $0x1b94] ss:$56 sps:$4 sm:$0xff]  }
 0x104   :  { %6319 = vmatpush1.bf16.msra.mxu0 %v8482_v6  ;;  %6238 = vmatprep.subr.bf16.mxu1 %v8487_v16  ;;  %v8560_v45 = vld [vmem:[#allocation6 + $0x1b90] ss:$56 sps:$4 sm:$0xff]   ;;  %v8565_v51 = vld [vmem:[#allocation6 + $0xc] ss:$56 sps:$4 sm:$0xff]   ;;  %v8571_v16 = vld [vmem:[#allocation6 + $0x7c] ss:$56 sps:$4 sm:$0xff]  }
 0x105   :  { %6320 = vmatprep.subr.bf16.mxu0 %v8490_v17  ;;  %v8563_v56 = vld [vmem:[#allocation6 + $0x8] ss:$56 sps:$4 sm:$0xff]   ;;  %v8568_v46 = vld [vmem:[#allocation6 + $0x14] ss:$56 sps:$4 sm:$0xff]   ;;  %v10520_v17 = vpack.c.bf16 %v10494_v58, %v10494_v58 }
 0x106   :  { %v8566_v6 = vld [vmem:[#allocation6 + $0x10] ss:$56 sps:$4 sm:$0xff]  }
 0x107   :  { %6239 = vmatpush1.bf16.msra.mxu1 %v8485_v59  ;;  %v10516_v59 = vpack.c.bf16 %v10492_v50, %v10492_v50  ;;  %v8580_v50 = vld [vmem:[#allocation6 + $0xf4] ss:$56 sps:$4 sm:$0xff]   ;;  %v8575_v58 = vld [vmem:[#allocation6 + $0xe8] ss:$56 sps:$4 sm:$0xff]  }
 0x108   :  { %6321 = vmatpush1.bf16.msra.mxu0 %v8488_v4  ;;  %6240 = vmatprep.subr.bf16.mxu1 %v8493_v1  ;;  %v8569_v4 = vld [vmem:[#allocation6 + $0x78] ss:$56 sps:$4 sm:$0xff]  }
 0x109   :  { %6322 = vmatprep.subr.bf16.mxu0 %v8496_v47  ;;  %v8572_v1 = vld [vmem:[#allocation6 + $0x80] ss:$56 sps:$4 sm:$0xff]   ;;  %v8577_v47 = vld [vmem:[#allocation6 + $0xec] ss:$56 sps:$4 sm:$0xff]  }
 0x10b   :  { %6241 = vmatpush1.bf16.msra.mxu1 %v8491_v34  ;;  %v8574_v34 = vld [vmem:[#allocation6 + $0x84] ss:$56 sps:$4 sm:$0xff]  }
 0x10c   :  { %6323 = vmatpush1.bf16.msra.mxu0 %v8494_v43  ;;  %6242 = vmatprep.subr.bf16.mxu1 %v8499_v10  ;;  %v8578_v43 = vld [vmem:[#allocation6 + $0xf0] ss:$56 sps:$4 sm:$0xff]   ;;  %v8583_v10 = vld [vmem:[#allocation6 + $0x15c] ss:$56 sps:$4 sm:$0xff]  }
 0x10d   :  { %6324 = vmatprep.subr.bf16.mxu0 %v8502_v2  ;;  %v8586_v2 = vld [vmem:[#allocation6 + $0x164] ss:$56 sps:$4 sm:$0xff]  }
 0x10f   :  { %6243 = vmatpush1.bf16.msra.mxu1 %v8497_v19  ;;  %v8581_v19 = vld [vmem:[#allocation6 + $0x158] ss:$56 sps:$4 sm:$0xff]  }
 0x110   :  { %6325 = vmatpush1.bf16.msra.mxu0 %v8500_v3  ;;  %6244 = vmatprep.subr.bf16.mxu1 %v8505_v54  ;;  %v8584_v3 = vld [vmem:[#allocation6 + $0x160] ss:$56 sps:$4 sm:$0xff]   ;;  %v8589_v54 = vld [vmem:[#allocation6 + $0x1cc] ss:$56 sps:$4 sm:$0xff]  }
 0x111   :  { %6326 = vmatprep.subr.bf16.mxu0 %v8508_v41  ;;  %v8592_v41 = vld [vmem:[#allocation6 + $0x1d4] ss:$56 sps:$4 sm:$0xff]  }
 0x113   :  { %6245 = vmatpush1.bf16.msra.mxu1 %v8503_v11  ;;  %v8587_v11 = vld [vmem:[#allocation6 + $0x1c8] ss:$56 sps:$4 sm:$0xff]  }
 0x114   :  { %6327 = vmatpush1.bf16.msra.mxu0 %v8506_v33  ;;  %6246 = vmatprep.subr.bf16.mxu1 %v8511_v26  ;;  %v8590_v33 = vld [vmem:[#allocation6 + $0x1d0] ss:$56 sps:$4 sm:$0xff]   ;;  %v8595_v26 = vld [vmem:[#allocation6 + $0x23c] ss:$56 sps:$4 sm:$0xff]  }
 0x115   :  { %6328 = vmatprep.subr.bf16.mxu0 %v8514_v13  ;;  %v8598_v13 = vld [vmem:[#allocation6 + $0x244] ss:$56 sps:$4 sm:$0xff]  }
 0x117   :  { %6247 = vmatpush1.bf16.msra.mxu1 %v8509_v57  ;;  %v8593_v57 = vld [vmem:[#allocation6 + $0x238] ss:$56 sps:$4 sm:$0xff]  }
 0x118   :  { %6329 = vmatpush1.bf16.msra.mxu0 %v8512_v29  ;;  %6248 = vmatprep.subr.bf16.mxu1 %v8517_v40  ;;  %v8596_v29 = vld [vmem:[#allocation6 + $0x240] ss:$56 sps:$4 sm:$0xff]   ;;  %v8601_v40 = vld [vmem:[#allocation6 + $0x2ac] ss:$56 sps:$4 sm:$0xff]  }
 0x119   :  { %6330 = vmatprep.subr.bf16.mxu0 %v8520_v28  ;;  %v8604_v28 = vld [vmem:[#allocation6 + $0x2b4] ss:$56 sps:$4 sm:$0xff]  }
 0x11b   :  { %6249 = vmatpush1.bf16.msra.mxu1 %v8515_v12  ;;  %v8599_v12 = vld [vmem:[#allocation6 + $0x2a8] ss:$56 sps:$4 sm:$0xff]  }
 0x11c   :  { %6331 = vmatpush1.bf16.msra.mxu0 %v8518_v32  ;;  %6250 = vmatprep.subr.bf16.mxu1 %v8523_v38  ;;  %v8602_v32 = vld [vmem:[#allocation6 + $0x2b0] ss:$56 sps:$4 sm:$0xff]   ;;  %v8607_v38 = vld [vmem:[#allocation6 + $0x31c] ss:$56 sps:$4 sm:$0xff]  }
 0x11d   :  { %6332 = vmatprep.subr.bf16.mxu0 %v8526_v14  ;;  %v8610_v14 = vld [vmem:[#allocation6 + $0x324] ss:$56 sps:$4 sm:$0xff]  }
 0x11f   :  { %6251 = vmatpush1.bf16.msra.mxu1 %v8521_v15  ;;  %v8605_v15 = vld [vmem:[#allocation6 + $0x318] ss:$56 sps:$4 sm:$0xff]  }
 0x120   :  { %6333 = vmatpush1.bf16.msra.mxu0 %v8524_v53  ;;  %6252 = vmatprep.subr.bf16.mxu1 %v8529_v20  ;;  %v8608_v53 = vld [vmem:[#allocation6 + $0x320] ss:$56 sps:$4 sm:$0xff]   ;;  %v8613_v20 = vld [vmem:[#allocation6 + $0x38c] ss:$56 sps:$4 sm:$0xff]  }
 0x121   :  { %6334 = vmatprep.subr.bf16.mxu0 %v8532_v63  ;;  %v8616_v63 = vld [vmem:[#allocation6 + $0x394] ss:$56 sps:$4 sm:$0xff]  }
 0x123   :  { %6253 = vmatpush1.bf16.msra.mxu1 %v8527_v62  ;;  %v8611_v62 = vld [vmem:[#allocation6 + $0x388] ss:$56 sps:$4 sm:$0xff]  }
 0x124   :  { %6335 = vmatpush1.bf16.msra.mxu0 %v8530_v31  ;;  %6254 = vmatprep.subr.bf16.mxu1 %v8535_v30  ;;  %v8614_v31 = vld [vmem:[#allocation6 + $0x390] ss:$56 sps:$4 sm:$0xff]   ;;  %v8619_v30 = vld [vmem:[#allocation6 + $0x3fc] ss:$56 sps:$4 sm:$0xff]  }
 0x125   :  { %6336 = vmatprep.subr.bf16.mxu0 %v8538_v23  ;;  %v8622_v23 = vld [vmem:[#allocation6 + $0x404] ss:$56 sps:$4 sm:$0xff]  }
 0x127   :  { %6255 = vmatpush1.bf16.msra.mxu1 %v8533_v0  ;;  %v8617_v0 = vld [vmem:[#allocation6 + $0x3f8] ss:$56 sps:$4 sm:$0xff]  }
 0x128   :  { %6337 = vmatpush1.bf16.msra.mxu0 %v8536_v27  ;;  %6256 = vmatprep.subr.bf16.mxu1 %v8541_v61  ;;  %v8620_v27 = vld [vmem:[#allocation6 + $0x400] ss:$56 sps:$4 sm:$0xff]   ;;  %v8625_v61 = vld [vmem:[#allocation6 + $0x46c] ss:$56 sps:$4 sm:$0xff]  }
 0x129   :  { %6338 = vmatprep.subr.bf16.mxu0 %v8544_v55  ;;  %v8628_v55 = vld [vmem:[#allocation6 + $0x474] ss:$56 sps:$4 sm:$0xff]  }
 0x12b   :  { %6257 = vmatpush1.bf16.msra.mxu1 %v8539_v48  ;;  %v8623_v48 = vld [vmem:[#allocation6 + $0x468] ss:$56 sps:$4 sm:$0xff]  }
 0x12c   :  { %6339 = vmatpush1.bf16.msra.mxu0 %v8542_v22  ;;  %6258 = vmatprep.subr.bf16.mxu1 %v8547_v5  ;;  %v8626_v22 = vld [vmem:[#allocation6 + $0x470] ss:$56 sps:$4 sm:$0xff]   ;;  %v8631_v5 = vld [vmem:[#allocation6 + $0x4dc] ss:$56 sps:$4 sm:$0xff]  }
 0x12d   :  { %6340 = vmatprep.subr.bf16.mxu0 %v8550_v8  ;;  %v8634_v8 = vld [vmem:[#allocation6 + $0x4e4] ss:$56 sps:$4 sm:$0xff]  }
 0x12f   :  { %6259 = vmatpush1.bf16.msra.mxu1 %v8545_v35  ;;  %v8629_v35 = vld [vmem:[#allocation6 + $0x4d8] ss:$56 sps:$4 sm:$0xff]  }
 0x130   :  { %6341 = vmatpush1.bf16.msra.mxu0 %v8548_v36  ;;  %6260 = vmatprep.subr.bf16.mxu1 %v8553_v18  ;;  %v8632_v36 = vld [vmem:[#allocation6 + $0x4e0] ss:$56 sps:$4 sm:$0xff]   ;;  %v8637_v18 = vld [vmem:[#allocation6 + $0x54c] ss:$56 sps:$4 sm:$0xff]  }
 0x131   :  { %6342 = vmatprep.subr.bf16.mxu0 %v8556_v52  ;;  %v8640_v52 = vld [vmem:[#allocation6 + $0x554] ss:$56 sps:$4 sm:$0xff]  }
 0x133   :  { %6261 = vmatpush1.bf16.msra.mxu1 %v8551_v37  ;;  %v8635_v37 = vld [vmem:[#allocation6 + $0x548] ss:$56 sps:$4 sm:$0xff]  }
 0x134   :  { %6343 = vmatpush1.bf16.msra.mxu0 %v8554_v21  ;;  %6262 = vmatprep.subr.bf16.mxu1 %v8559_v44  ;;  %v8638_v21 = vld [vmem:[#allocation6 + $0x550] ss:$56 sps:$4 sm:$0xff]   ;;  %v8643_v44 = vld [vmem:[#allocation6 + $0x5bc] ss:$56 sps:$4 sm:$0xff]  }
 0x135   :  { %6344 = vmatprep.subr.bf16.mxu0 %v8562_v60  ;;  %v8646_v60 = vld [vmem:[#allocation6 + $0x5c4] ss:$56 sps:$4 sm:$0xff]  }
 0x137   :  { %6263 = vmatpush1.bf16.msra.mxu1 %v8557_v9  ;;  %v8641_v9 = vld [vmem:[#allocation6 + $0x5b8] ss:$56 sps:$4 sm:$0xff]  }
 0x138   :  { %6345 = vmatpush1.bf16.msra.mxu0 %v8560_v45  ;;  %6355 = vmatprep.subr.bf16.mxu1 %v8565_v51  ;;  %v8644_v45 = vld [vmem:[#allocation6 + $0x5c0] ss:$56 sps:$4 sm:$0xff]   ;;  %v8649_v51 = vld [vmem:[#allocation6 + $0x62c] ss:$56 sps:$4 sm:$0xff]  }
 0x139   :  { %6519 = vmatprep.subr.bf16.mxu0 %v8568_v46  ;;  %v8652_v46 = vld [vmem:[#allocation6 + $0x634] ss:$56 sps:$4 sm:$0xff]  }
 0x13a   :  { %6265 = vmatmul.mubr.bf16.vlgmr.msra.gmra.mrb[0].mxu1 %v10516_v59 }
 0x13b   :  { %6347 = vmatmul.mubr.bf16.vlgmr.msra.gmra.mrb[0].mxu0 %v10520_v17  ;;  %6356 = vmatpush1.bf16.msra.mxu1 %v8563_v56  ;;  %v8647_v56 = vld [vmem:[#allocation6 + $0x628] ss:$56 sps:$4 sm:$0xff]  }
 0x13c   :  { %6387 = vmatprep.mubr.bf16.mxu1 %v10498_v24  ;;  %6520 = vmatpush1.bf16.msra.mxu0 %v8566_v6  ;;  %v8650_v6 = vld [vmem:[#allocation6 + $0x630] ss:$56 sps:$4 sm:$0xff]  }
 0x13d   :  { %6551 = vmatprep.mubr.bf16.mxu0 %v10498_v24  ;;  %6357 = vmatprep.subr.bf16.mxu1 %v8571_v16  ;;  %v8655_v16 = vld [vmem:[#allocation6 + $0x69c] ss:$56 sps:$4 sm:$0xff]  }
 0x13e   :  { %6521 = vmatprep.subr.bf16.mxu0 %v8574_v34  ;;  %v8656_v34 = vld [vmem:[#allocation6 + $0x6a0] ss:$56 sps:$4 sm:$0xff]  }
 0x13f   :  { %6358 = vmatpush1.bf16.msra.mxu1 %v8569_v4  ;;  %v8653_v4 = vld [vmem:[#allocation6 + $0x698] ss:$56 sps:$4 sm:$0xff]  }
 0x140   :  { %6522 = vmatpush1.bf16.msra.mxu0 %v8572_v1  ;;  %6359 = vmatprep.subr.bf16.mxu1 %v8577_v47  ;;  %v8658_v1 = vld [vmem:[#allocation6 + $0x6a4] ss:$56 sps:$4 sm:$0xff]  }
 0x141   :  { %6523 = vmatprep.subr.bf16.mxu0 %v8580_v50  ;;  %v8661_v47 = vld [vmem:[#allocation6 + $0x70c] ss:$56 sps:$4 sm:$0xff]   ;;  %v8659_v50 = vld [vmem:[#allocation6 + $0x708] ss:$56 sps:$4 sm:$0xff]  }
 0x143   :  { %6360 = vmatpush1.bf16.msra.mxu1 %v8575_v58  ;;  %v8664_v58 = vld [vmem:[#allocation6 + $0x714] ss:$56 sps:$4 sm:$0xff]  }
 0x144   :  { %6524 = vmatpush1.bf16.msra.mxu0 %v8578_v43  ;;  %6361 = vmatprep.subr.bf16.mxu1 %v8583_v10  ;;  %v8662_v43 = vld [vmem:[#allocation6 + $0x710] ss:$56 sps:$4 sm:$0xff]   ;;  %v8667_v10 = vld [vmem:[#allocation6 + $0x77c] ss:$56 sps:$4 sm:$0xff]  }
 0x145   :  { %6525 = vmatprep.subr.bf16.mxu0 %v8586_v2  ;;  %v8668_v2 = vld [vmem:[#allocation6 + $0x780] ss:$56 sps:$4 sm:$0xff]  }
 0x147   :  { %6362 = vmatpush1.bf16.msra.mxu1 %v8581_v19  ;;  %v8665_v19 = vld [vmem:[#allocation6 + $0x778] ss:$56 sps:$4 sm:$0xff]  }
 0x148   :  { %6526 = vmatpush1.bf16.msra.mxu0 %v8584_v3  ;;  %6363 = vmatprep.subr.bf16.mxu1 %v8589_v54  ;;  %v8670_v3 = vld [vmem:[#allocation6 + $0x784] ss:$56 sps:$4 sm:$0xff]  }
 0x149   :  { %6527 = vmatprep.subr.bf16.mxu0 %v8592_v41  ;;  %v8673_v54 = vld [vmem:[#allocation6 + $0x7ec] ss:$56 sps:$4 sm:$0xff]   ;;  %v8671_v41 = vld [vmem:[#allocation6 + $0x7e8] ss:$56 sps:$4 sm:$0xff]  }
 0x14b   :  { %6364 = vmatpush1.bf16.msra.mxu1 %v8587_v11  ;;  %v8676_v11 = vld [vmem:[#allocation6 + $0x7f4] ss:$56 sps:$4 sm:$0xff]  }
 0x14c   :  { %6528 = vmatpush1.bf16.msra.mxu0 %v8590_v33  ;;  %6365 = vmatprep.subr.bf16.mxu1 %v8595_v26  ;;  %v8674_v33 = vld [vmem:[#allocation6 + $0x7f0] ss:$56 sps:$4 sm:$0xff]   ;;  %v8679_v26 = vld [vmem:[#allocation6 + $0x85c] ss:$56 sps:$4 sm:$0xff]  }
 0x14d   :  { %6529 = vmatprep.subr.bf16.mxu0 %v8598_v13  ;;  %v8682_v13 = vld [vmem:[#allocation6 + $0x864] ss:$56 sps:$4 sm:$0xff]  }
 0x14f   :  { %6366 = vmatpush1.bf16.msra.mxu1 %v8593_v57  ;;  %v8677_v57 = vld [vmem:[#allocation6 + $0x858] ss:$56 sps:$4 sm:$0xff]  }
 0x150   :  { %6530 = vmatpush1.bf16.msra.mxu0 %v8596_v29  ;;  %6367 = vmatprep.subr.bf16.mxu1 %v8601_v40  ;;  %v8680_v29 = vld [vmem:[#allocation6 + $0x860] ss:$56 sps:$4 sm:$0xff]   ;;  %v8685_v40 = vld [vmem:[#allocation6 + $0x8cc] ss:$56 sps:$4 sm:$0xff]  }
 0x151   :  { %6531 = vmatprep.subr.bf16.mxu0 %v8604_v28  ;;  %v8688_v28 = vld [vmem:[#allocation6 + $0x8d4] ss:$56 sps:$4 sm:$0xff]  }
 0x153   :  { %6368 = vmatpush1.bf16.msra.mxu1 %v8599_v12  ;;  %v8683_v12 = vld [vmem:[#allocation6 + $0x8c8] ss:$56 sps:$4 sm:$0xff]  }
 0x154   :  { %6532 = vmatpush1.bf16.msra.mxu0 %v8602_v32  ;;  %6369 = vmatprep.subr.bf16.mxu1 %v8607_v38  ;;  %v8686_v32 = vld [vmem:[#allocation6 + $0x8d0] ss:$56 sps:$4 sm:$0xff]   ;;  %v8691_v38 = vld [vmem:[#allocation6 + $0x93c] ss:$56 sps:$4 sm:$0xff]  }
 0x155   :  { %6533 = vmatprep.subr.bf16.mxu0 %v8610_v14  ;;  %v8694_v14 = vld [vmem:[#allocation6 + $0x944] ss:$56 sps:$4 sm:$0xff]  }
 0x157   :  { %6370 = vmatpush1.bf16.msra.mxu1 %v8605_v15  ;;  %v8689_v15 = vld [vmem:[#allocation6 + $0x938] ss:$56 sps:$4 sm:$0xff]  }
 0x158   :  { %6534 = vmatpush1.bf16.msra.mxu0 %v8608_v53  ;;  %6371 = vmatprep.subr.bf16.mxu1 %v8613_v20  ;;  %v8692_v53 = vld [vmem:[#allocation6 + $0x940] ss:$56 sps:$4 sm:$0xff]   ;;  %v8697_v20 = vld [vmem:[#allocation6 + $0x9ac] ss:$56 sps:$4 sm:$0xff]  }
 0x159   :  { %6535 = vmatprep.subr.bf16.mxu0 %v8616_v63  ;;  %v8695_v63 = vld [vmem:[#allocation6 + $0x9a8] ss:$56 sps:$4 sm:$0xff]  }
 0x15b   :  { %6372 = vmatpush1.bf16.msra.mxu1 %v8611_v62  ;;  %v8700_v62 = vld [vmem:[#allocation6 + $0x9b4] ss:$56 sps:$4 sm:$0xff]  }
 0x15c   :  { %6536 = vmatpush1.bf16.msra.mxu0 %v8614_v31  ;;  %6373 = vmatprep.subr.bf16.mxu1 %v8619_v30  ;;  %v8698_v31 = vld [vmem:[#allocation6 + $0x9b0] ss:$56 sps:$4 sm:$0xff]   ;;  %v8703_v30 = vld [vmem:[#allocation6 + $0xa1c] ss:$56 sps:$4 sm:$0xff]  }
 0x15d   :  { %6537 = vmatprep.subr.bf16.mxu0 %v8622_v23  ;;  %v8701_v23 = vld [vmem:[#allocation6 + $0xa18] ss:$56 sps:$4 sm:$0xff]  }
 0x15f   :  { %6374 = vmatpush1.bf16.msra.mxu1 %v8617_v0  ;;  %v8706_v0 = vld [vmem:[#allocation6 + $0xa24] ss:$56 sps:$4 sm:$0xff]  }
 0x160   :  { %6538 = vmatpush1.bf16.msra.mxu0 %v8620_v27  ;;  %6375 = vmatprep.subr.bf16.mxu1 %v8625_v61  ;;  %v8704_v27 = vld [vmem:[#allocation6 + $0xa20] ss:$56 sps:$4 sm:$0xff]   ;;  %v8709_v61 = vld [vmem:[#allocation6 + $0xa8c] ss:$56 sps:$4 sm:$0xff]  }
 0x161   :  { %6539 = vmatprep.subr.bf16.mxu0 %v8628_v55  ;;  %v8712_v55 = vld [vmem:[#allocation6 + $0xa94] ss:$56 sps:$4 sm:$0xff]  }
 0x163   :  { %6376 = vmatpush1.bf16.msra.mxu1 %v8623_v48  ;;  %v8707_v48 = vld [vmem:[#allocation6 + $0xa88] ss:$56 sps:$4 sm:$0xff]  }
 0x164   :  { %6540 = vmatpush1.bf16.msra.mxu0 %v8626_v22  ;;  %6377 = vmatprep.subr.bf16.mxu1 %v8631_v5  ;;  %v8710_v22 = vld [vmem:[#allocation6 + $0xa90] ss:$56 sps:$4 sm:$0xff]   ;;  %v8715_v5 = vld [vmem:[#allocation6 + $0xafc] ss:$56 sps:$4 sm:$0xff]  }
 0x165   :  { %6541 = vmatprep.subr.bf16.mxu0 %v8634_v8  ;;  %v8718_v8 = vld [vmem:[#allocation6 + $0xb04] ss:$56 sps:$4 sm:$0xff]  }
 0x167   :  { %6378 = vmatpush1.bf16.msra.mxu1 %v8629_v35  ;;  %v8713_v35 = vld [vmem:[#allocation6 + $0xaf8] ss:$56 sps:$4 sm:$0xff]  }
 0x168   :  { %6542 = vmatpush1.bf16.msra.mxu0 %v8632_v36  ;;  %6379 = vmatprep.subr.bf16.mxu1 %v8637_v18  ;;  %v8716_v36 = vld [vmem:[#allocation6 + $0xb00] ss:$56 sps:$4 sm:$0xff]   ;;  %v8721_v18 = vld [vmem:[#allocation6 + $0xb6c] ss:$56 sps:$4 sm:$0xff]  }
 0x169   :  { %6543 = vmatprep.subr.bf16.mxu0 %v8640_v52  ;;  %v8724_v52 = vld [vmem:[#allocation6 + $0xb74] ss:$56 sps:$4 sm:$0xff]  }
 0x16b   :  { %6380 = vmatpush1.bf16.msra.mxu1 %v8635_v37  ;;  %v8719_v37 = vld [vmem:[#allocation6 + $0xb68] ss:$56 sps:$4 sm:$0xff]  }
 0x16c   :  { %6544 = vmatpush1.bf16.msra.mxu0 %v8638_v21  ;;  %6381 = vmatprep.subr.bf16.mxu1 %v8643_v44  ;;  %v8722_v21 = vld [vmem:[#allocation6 + $0xb70] ss:$56 sps:$4 sm:$0xff]   ;;  %v8727_v44 = vld [vmem:[#allocation6 + $0xbdc] ss:$56 sps:$4 sm:$0xff]  }
 0x16d   :  { %6545 = vmatprep.subr.bf16.mxu0 %v8646_v60  ;;  %v8730_v60 = vld [vmem:[#allocation6 + $0xbe4] ss:$56 sps:$4 sm:$0xff]  }
 0x16f   :  { %6382 = vmatpush1.bf16.msra.mxu1 %v8641_v9  ;;  %v8725_v9 = vld [vmem:[#allocation6 + $0xbd8] ss:$56 sps:$4 sm:$0xff]  }
 0x170   :  { %6546 = vmatpush1.bf16.msra.mxu0 %v8644_v45  ;;  %6383 = vmatprep.subr.bf16.mxu1 %v8649_v51  ;;  %v8728_v45 = vld [vmem:[#allocation6 + $0xbe0] ss:$56 sps:$4 sm:$0xff]   ;;  %v8733_v51 = vld [vmem:[#allocation6 + $0xc4c] ss:$56 sps:$4 sm:$0xff]  }
 0x171   :  { %6547 = vmatprep.subr.bf16.mxu0 %v8652_v46  ;;  %v8736_v46 = vld [vmem:[#allocation6 + $0xc54] ss:$56 sps:$4 sm:$0xff]  }
 0x173   :  { %6384 = vmatpush1.bf16.msra.mxu1 %v8647_v56  ;;  %v8731_v56 = vld [vmem:[#allocation6 + $0xc48] ss:$56 sps:$4 sm:$0xff]  }
 0x174   :  { %6548 = vmatpush1.bf16.msra.mxu0 %v8650_v6  ;;  %6385 = vmatprep.subr.bf16.mxu1 %v8655_v16  ;;  %v8734_v6 = vld [vmem:[#allocation6 + $0xc50] ss:$56 sps:$4 sm:$0xff]   ;;  %v8739_v16 = vld [vmem:[#allocation6 + $0xcbc] ss:$56 sps:$4 sm:$0xff]  }
 0x175   :  { %6549 = vmatprep.subr.bf16.mxu0 %v8658_v1  ;;  %v8742_v1 = vld [vmem:[#allocation6 + $0xcc4] ss:$56 sps:$4 sm:$0xff]  }
 0x177   :  { %6386 = vmatpush1.bf16.msra.mxu1 %v8653_v4  ;;  %v8737_v4 = vld [vmem:[#allocation6 + $0xcb8] ss:$56 sps:$4 sm:$0xff]  }
 0x178   :  { %6550 = vmatpush1.bf16.msra.mxu0 %v8656_v34  ;;  %6396 = vmatprep.subr.bf16.mxu1 %v8661_v47  ;;  %v8740_v34 = vld [vmem:[#allocation6 + $0xcc0] ss:$56 sps:$4 sm:$0xff]   ;;  %v8745_v47 = vld [vmem:[#allocation6 + $0xd2c] ss:$56 sps:$4 sm:$0xff]  }
 0x179   :  { %6560 = vmatprep.subr.bf16.mxu0 %v8664_v58  ;;  %v8748_v58 = vld [vmem:[#allocation6 + $0xd34] ss:$56 sps:$4 sm:$0xff]  }
 0x17a   :  { %6388 = vmatmul.mubr.bf16.vlgmr.msra.gmra.mrb[4].mxu1 %v10496_v25 }
 0x17b   :  { %6552 = vmatmul.mubr.bf16.vlgmr.msra.gmra.mrb[4].mxu0 %v10496_v25  ;;  %6397 = vmatpush1.bf16.msra.mxu1 %v8659_v50  ;;  %v8743_v50 = vld [vmem:[#allocation6 + $0xd28] ss:$56 sps:$4 sm:$0xff]  }
 0x17c   :  { %6428 = vmatprep.mubr.bf16.mxu1 %v10505_v49  ;;  %6561 = vmatpush1.bf16.msra.mxu0 %v8662_v43  ;;  %v8746_v43 = vld [vmem:[#allocation6 + $0xd30] ss:$56 sps:$4 sm:$0xff]  }
 0x17d   :  { %6592 = vmatprep.mubr.bf16.mxu0 %v10505_v49  ;;  %6398 = vmatprep.subr.bf16.mxu1 %v8667_v10  ;;  %v8751_v10 = vld [vmem:[#allocation6 + $0xd9c] ss:$56 sps:$4 sm:$0xff]  }
 0x17e   :  { %6562 = vmatprep.subr.bf16.mxu0 %v8670_v3  ;;  %v8752_v3 = vld [vmem:[#allocation6 + $0xda0] ss:$56 sps:$4 sm:$0xff]  }
 0x17f   :  { %6399 = vmatpush1.bf16.msra.mxu1 %v8665_v19  ;;  %v8749_v19 = vld [vmem:[#allocation6 + $0xd98] ss:$56 sps:$4 sm:$0xff]  }
 0x180   :  { %6563 = vmatpush1.bf16.msra.mxu0 %v8668_v2  ;;  %6400 = vmatprep.subr.bf16.mxu1 %v8673_v54  ;;  %v8754_v2 = vld [vmem:[#allocation6 + $0xda4] ss:$56 sps:$4 sm:$0xff]  }
 0x181   :  { %6564 = vmatprep.subr.bf16.mxu0 %v8676_v11  ;;  %v8757_v54 = vld [vmem:[#allocation6 + $0xe0c] ss:$56 sps:$4 sm:$0xff]   ;;  %v8755_v11 = vld [vmem:[#allocation6 + $0xe08] ss:$56 sps:$4 sm:$0xff]  }
 0x183   :  { %6401 = vmatpush1.bf16.msra.mxu1 %v8671_v41  ;;  %v8760_v41 = vld [vmem:[#allocation6 + $0xe14] ss:$56 sps:$4 sm:$0xff]  }
 0x184   :  { %6565 = vmatpush1.bf16.msra.mxu0 %v8674_v33  ;;  %6402 = vmatprep.subr.bf16.mxu1 %v8679_v26  ;;  %v8758_v33 = vld [vmem:[#allocation6 + $0xe10] ss:$56 sps:$4 sm:$0xff]   ;;  %v8763_v26 = vld [vmem:[#allocation6 + $0xe7c] ss:$56 sps:$4 sm:$0xff]  }
 0x185   :  { %6566 = vmatprep.subr.bf16.mxu0 %v8682_v13  ;;  %v8766_v13 = vld [vmem:[#allocation6 + $0xe84] ss:$56 sps:$4 sm:$0xff]  }
 0x187   :  { %6403 = vmatpush1.bf16.msra.mxu1 %v8677_v57  ;;  %v8761_v57 = vld [vmem:[#allocation6 + $0xe78] ss:$56 sps:$4 sm:$0xff]  }
 0x188   :  { %6567 = vmatpush1.bf16.msra.mxu0 %v8680_v29  ;;  %6404 = vmatprep.subr.bf16.mxu1 %v8685_v40  ;;  %v8764_v29 = vld [vmem:[#allocation6 + $0xe80] ss:$56 sps:$4 sm:$0xff]   ;;  %v8769_v40 = vld [vmem:[#allocation6 + $0xeec] ss:$56 sps:$4 sm:$0xff]  }
 0x189   :  { %6568 = vmatprep.subr.bf16.mxu0 %v8688_v28  ;;  %v8767_v28 = vld [vmem:[#allocation6 + $0xee8] ss:$56 sps:$4 sm:$0xff]  }
 0x18b   :  { %6405 = vmatpush1.bf16.msra.mxu1 %v8683_v12  ;;  %v8772_v12 = vld [vmem:[#allocation6 + $0xef4] ss:$56 sps:$4 sm:$0xff]  }
 0x18c   :  { %6569 = vmatpush1.bf16.msra.mxu0 %v8686_v32  ;;  %6406 = vmatprep.subr.bf16.mxu1 %v8691_v38  ;;  %v8770_v32 = vld [vmem:[#allocation6 + $0xef0] ss:$56 sps:$4 sm:$0xff]   ;;  %v8775_v38 = vld [vmem:[#allocation6 + $0xf5c] ss:$56 sps:$4 sm:$0xff]  }
 0x18d   :  { %6570 = vmatprep.subr.bf16.mxu0 %v8694_v14  ;;  %v8778_v14 = vld [vmem:[#allocation6 + $0xf64] ss:$56 sps:$4 sm:$0xff]  }
 0x18f   :  { %6407 = vmatpush1.bf16.msra.mxu1 %v8689_v15  ;;  %v8773_v15 = vld [vmem:[#allocation6 + $0xf58] ss:$56 sps:$4 sm:$0xff]  }
 0x190   :  { %6571 = vmatpush1.bf16.msra.mxu0 %v8692_v53  ;;  %6408 = vmatprep.subr.bf16.mxu1 %v8697_v20  ;;  %v8776_v53 = vld [vmem:[#allocation6 + $0xf60] ss:$56 sps:$4 sm:$0xff]   ;;  %v8781_v20 = vld [vmem:[#allocation6 + $0xfcc] ss:$56 sps:$4 sm:$0xff]  }
 0x191   :  { %6572 = vmatprep.subr.bf16.mxu0 %v8700_v62  ;;  %v8779_v62 = vld [vmem:[#allocation6 + $0xfc8] ss:$56 sps:$4 sm:$0xff]  }
 0x193   :  { %6409 = vmatpush1.bf16.msra.mxu1 %v8695_v63  ;;  %v8784_v63 = vld [vmem:[#allocation6 + $0xfd4] ss:$56 sps:$4 sm:$0xff]  }
 0x194   :  { %6573 = vmatpush1.bf16.msra.mxu0 %v8698_v31  ;;  %6410 = vmatprep.subr.bf16.mxu1 %v8703_v30  ;;  %v8782_v31 = vld [vmem:[#allocation6 + $0xfd0] ss:$56 sps:$4 sm:$0xff]   ;;  %v8787_v30 = vld [vmem:[#allocation6 + $0x103c] ss:$56 sps:$4 sm:$0xff]  }
 0x195   :  { %6574 = vmatprep.subr.bf16.mxu0 %v8706_v0  ;;  %v8785_v0 = vld [vmem:[#allocation6 + $0x1038] ss:$56 sps:$4 sm:$0xff]  }
 0x197   :  { %6411 = vmatpush1.bf16.msra.mxu1 %v8701_v23  ;;  %v8790_v23 = vld [vmem:[#allocation6 + $0x1044] ss:$56 sps:$4 sm:$0xff]  }
 0x198   :  { %6575 = vmatpush1.bf16.msra.mxu0 %v8704_v27  ;;  %6412 = vmatprep.subr.bf16.mxu1 %v8709_v61  ;;  %v8788_v27 = vld [vmem:[#allocation6 + $0x1040] ss:$56 sps:$4 sm:$0xff]   ;;  %v8793_v61 = vld [vmem:[#allocation6 + $0x10ac] ss:$56 sps:$4 sm:$0xff]  }
 0x199   :  { %6576 = vmatprep.subr.bf16.mxu0 %v8712_v55  ;;  %v8796_v55 = vld [vmem:[#allocation6 + $0x10b4] ss:$56 sps:$4 sm:$0xff]  }
 0x19b   :  { %6413 = vmatpush1.bf16.msra.mxu1 %v8707_v48  ;;  %v8791_v48 = vld [vmem:[#allocation6 + $0x10a8] ss:$56 sps:$4 sm:$0xff]  }
 0x19c   :  { %6577 = vmatpush1.bf16.msra.mxu0 %v8710_v22  ;;  %6414 = vmatprep.subr.bf16.mxu1 %v8715_v5  ;;  %v8794_v22 = vld [vmem:[#allocation6 + $0x10b0] ss:$56 sps:$4 sm:$0xff]   ;;  %v8799_v5 = vld [vmem:[#allocation6 + $0x111c] ss:$56 sps:$4 sm:$0xff]  }
 0x19d   :  { %6578 = vmatprep.subr.bf16.mxu0 %v8718_v8  ;;  %v8802_v8 = vld [vmem:[#allocation6 + $0x1124] ss:$56 sps:$4 sm:$0xff]  }
 0x19f   :  { %6415 = vmatpush1.bf16.msra.mxu1 %v8713_v35  ;;  %v8797_v35 = vld [vmem:[#allocation6 + $0x1118] ss:$56 sps:$4 sm:$0xff]  }
 0x1a0   :  { %6579 = vmatpush1.bf16.msra.mxu0 %v8716_v36  ;;  %6416 = vmatprep.subr.bf16.mxu1 %v8721_v18  ;;  %v8800_v36 = vld [vmem:[#allocation6 + $0x1120] ss:$56 sps:$4 sm:$0xff]   ;;  %v8805_v18 = vld [vmem:[#allocation6 + $0x118c] ss:$56 sps:$4 sm:$0xff]  }
 0x1a1   :  { %6580 = vmatprep.subr.bf16.mxu0 %v8724_v52  ;;  %v8808_v52 = vld [vmem:[#allocation6 + $0x1194] ss:$56 sps:$4 sm:$0xff]  }
 0x1a3   :  { %6417 = vmatpush1.bf16.msra.mxu1 %v8719_v37  ;;  %v8803_v37 = vld [vmem:[#allocation6 + $0x1188] ss:$56 sps:$4 sm:$0xff]  }
 0x1a4   :  { %6581 = vmatpush1.bf16.msra.mxu0 %v8722_v21  ;;  %6418 = vmatprep.subr.bf16.mxu1 %v8727_v44  ;;  %v8806_v21 = vld [vmem:[#allocation6 + $0x1190] ss:$56 sps:$4 sm:$0xff]   ;;  %v8811_v44 = vld [vmem:[#allocation6 + $0x11fc] ss:$56 sps:$4 sm:$0xff]  }
 0x1a5   :  { %6582 = vmatprep.subr.bf16.mxu0 %v8730_v60  ;;  %v8814_v60 = vld [vmem:[#allocation6 + $0x1204] ss:$56 sps:$4 sm:$0xff]  }
 0x1a7   :  { %6419 = vmatpush1.bf16.msra.mxu1 %v8725_v9  ;;  %v8809_v9 = vld [vmem:[#allocation6 + $0x11f8] ss:$56 sps:$4 sm:$0xff]  }
 0x1a8   :  { %6583 = vmatpush1.bf16.msra.mxu0 %v8728_v45  ;;  %6420 = vmatprep.subr.bf16.mxu1 %v8733_v51  ;;  %v8812_v45 = vld [vmem:[#allocation6 + $0x1200] ss:$56 sps:$4 sm:$0xff]   ;;  %v8817_v51 = vld [vmem:[#allocation6 + $0x126c] ss:$56 sps:$4 sm:$0xff]  }
 0x1a9   :  { %6584 = vmatprep.subr.bf16.mxu0 %v8736_v46  ;;  %v8820_v46 = vld [vmem:[#allocation6 + $0x1274] ss:$56 sps:$4 sm:$0xff]  }
 0x1ab   :  { %6421 = vmatpush1.bf16.msra.mxu1 %v8731_v56  ;;  %v8815_v56 = vld [vmem:[#allocation6 + $0x1268] ss:$56 sps:$4 sm:$0xff]  }
 0x1ac   :  { %6585 = vmatpush1.bf16.msra.mxu0 %v8734_v6  ;;  %6422 = vmatprep.subr.bf16.mxu1 %v8739_v16  ;;  %v8818_v6 = vld [vmem:[#allocation6 + $0x1270] ss:$56 sps:$4 sm:$0xff]   ;;  %v8823_v16 = vld [vmem:[#allocation6 + $0x12dc] ss:$56 sps:$4 sm:$0xff]  }
 0x1ad   :  { %6586 = vmatprep.subr.bf16.mxu0 %v8742_v1  ;;  %v8826_v1 = vld [vmem:[#allocation6 + $0x12e4] ss:$56 sps:$4 sm:$0xff]  }
 0x1af   :  { %6423 = vmatpush1.bf16.msra.mxu1 %v8737_v4  ;;  %v8821_v4 = vld [vmem:[#allocation6 + $0x12d8] ss:$56 sps:$4 sm:$0xff]  }
 0x1b0   :  { %6587 = vmatpush1.bf16.msra.mxu0 %v8740_v34  ;;  %6424 = vmatprep.subr.bf16.mxu1 %v8745_v47  ;;  %v8824_v34 = vld [vmem:[#allocation6 + $0x12e0] ss:$56 sps:$4 sm:$0xff]   ;;  %v8829_v47 = vld [vmem:[#allocation6 + $0x134c] ss:$56 sps:$4 sm:$0xff]  }
 0x1b1   :  { %6588 = vmatprep.subr.bf16.mxu0 %v8748_v58  ;;  %v8832_v58 = vld [vmem:[#allocation6 + $0x1354] ss:$56 sps:$4 sm:$0xff]  }
 0x1b3   :  { %6425 = vmatpush1.bf16.msra.mxu1 %v8743_v50  ;;  %v8827_v50 = vld [vmem:[#allocation6 + $0x1348] ss:$56 sps:$4 sm:$0xff]  }
 0x1b4   :  { %6589 = vmatpush1.bf16.msra.mxu0 %v8746_v43  ;;  %6426 = vmatprep.subr.bf16.mxu1 %v8751_v10  ;;  %v8830_v43 = vld [vmem:[#allocation6 + $0x1350] ss:$56 sps:$4 sm:$0xff]   ;;  %v8835_v10 = vld [vmem:[#allocation6 + $0x13bc] ss:$56 sps:$4 sm:$0xff]  }
 0x1b5   :  { %6590 = vmatprep.subr.bf16.mxu0 %v8754_v2  ;;  %v8838_v2 = vld [vmem:[#allocation6 + $0x13c4] ss:$56 sps:$4 sm:$0xff]  }
 0x1b7   :  { %6427 = vmatpush1.bf16.msra.mxu1 %v8749_v19  ;;  %v8833_v19 = vld [vmem:[#allocation6 + $0x13b8] ss:$56 sps:$4 sm:$0xff]  }
 0x1b8   :  { %6591 = vmatpush1.bf16.msra.mxu0 %v8752_v3  ;;  %6437 = vmatprep.subr.bf16.mxu1 %v8757_v54  ;;  %v8836_v3 = vld [vmem:[#allocation6 + $0x13c0] ss:$56 sps:$4 sm:$0xff]   ;;  %v8841_v54 = vld [vmem:[#allocation6 + $0x142c] ss:$56 sps:$4 sm:$0xff]  }
 0x1b9   :  { %6601 = vmatprep.subr.bf16.mxu0 %v8760_v41  ;;  %v8844_v41 = vld [vmem:[#allocation6 + $0x1434] ss:$56 sps:$4 sm:$0xff]  }
 0x1ba   :  { %6429 = vmatmul.mubr.bf16.vlgmr.msra.gmra.mrb[4].mxu1 %v10516_v59 }
 0x1bb   :  { %6593 = vmatmul.mubr.bf16.vlgmr.msra.gmra.mrb[4].mxu0 %v10516_v59  ;;  %6438 = vmatpush1.bf16.msra.mxu1 %v8755_v11  ;;  %v8839_v11 = vld [vmem:[#allocation6 + $0x1428] ss:$56 sps:$4 sm:$0xff]  }
 0x1bc   :  { %6469 = vmatprep.mubr.bf16.mxu1 %v10502_v39  ;;  %6602 = vmatpush1.bf16.msra.mxu0 %v8758_v33  ;;  %v8842_v33 = vld [vmem:[#allocation6 + $0x1430] ss:$56 sps:$4 sm:$0xff]  }
 0x1bd   :  { %6633 = vmatprep.mubr.bf16.mxu0 %v10502_v39  ;;  %6439 = vmatprep.subr.bf16.mxu1 %v8763_v26  ;;  %v8847_v26 = vld [vmem:[#allocation6 + $0x149c] ss:$56 sps:$4 sm:$0xff]  }
 0x1be   :  { %6603 = vmatprep.subr.bf16.mxu0 %v8766_v13  ;;  %v8850_v13 = vld [vmem:[#allocation6 + $0x14a4] ss:$56 sps:$4 sm:$0xff]  }
 0x1bf   :  { %6440 = vmatpush1.bf16.msra.mxu1 %v8761_v57  ;;  %v8845_v57 = vld [vmem:[#allocation6 + $0x1498] ss:$56 sps:$4 sm:$0xff]  }
 0x1c0   :  { %6604 = vmatpush1.bf16.msra.mxu0 %v8764_v29  ;;  %6441 = vmatprep.subr.bf16.mxu1 %v8769_v40  ;;  %v8848_v29 = vld [vmem:[#allocation6 + $0x14a0] ss:$56 sps:$4 sm:$0xff]   ;;  %v8853_v40 = vld [vmem:[#allocation6 + $0x150c] ss:$56 sps:$4 sm:$0xff]  }
 0x1c1   :  { %6605 = vmatprep.subr.bf16.mxu0 %v8772_v12  ;;  %v8851_v12 = vld [vmem:[#allocation6 + $0x1508] ss:$56 sps:$4 sm:$0xff]  }
 0x1c3   :  { %6442 = vmatpush1.bf16.msra.mxu1 %v8767_v28  ;;  %v8856_v28 = vld [vmem:[#allocation6 + $0x1514] ss:$56 sps:$4 sm:$0xff]  }
 0x1c4   :  { %6606 = vmatpush1.bf16.msra.mxu0 %v8770_v32  ;;  %6443 = vmatprep.subr.bf16.mxu1 %v8775_v38  ;;  %v8854_v32 = vld [vmem:[#allocation6 + $0x1510] ss:$56 sps:$4 sm:$0xff]   ;;  %v8859_v38 = vld [vmem:[#allocation6 + $0x157c] ss:$56 sps:$4 sm:$0xff]  }
 0x1c5   :  { %6607 = vmatprep.subr.bf16.mxu0 %v8778_v14  ;;  %v8860_v14 = vld [vmem:[#allocation6 + $0x1580] ss:$56 sps:$4 sm:$0xff]  }
 0x1c7   :  { %6444 = vmatpush1.bf16.msra.mxu1 %v8773_v15  ;;  %v8857_v15 = vld [vmem:[#allocation6 + $0x1578] ss:$56 sps:$4 sm:$0xff]  }
 0x1c8   :  { %6608 = vmatpush1.bf16.msra.mxu0 %v8776_v53  ;;  %6445 = vmatprep.subr.bf16.mxu1 %v8781_v20  ;;  %v8862_v53 = vld [vmem:[#allocation6 + $0x1584] ss:$56 sps:$4 sm:$0xff]  }
 0x1c9   :  { %6609 = vmatprep.subr.bf16.mxu0 %v8784_v63  ;;  %v8865_v20 = vld [vmem:[#allocation6 + $0x15ec] ss:$56 sps:$4 sm:$0xff]   ;;  %v8863_v63 = vld [vmem:[#allocation6 + $0x15e8] ss:$56 sps:$4 sm:$0xff]  }
 0x1cb   :  { %6446 = vmatpush1.bf16.msra.mxu1 %v8779_v62  ;;  %v8868_v62 = vld [vmem:[#allocation6 + $0x15f4] ss:$56 sps:$4 sm:$0xff]  }
 0x1cc   :  { %6610 = vmatpush1.bf16.msra.mxu0 %v8782_v31  ;;  %6447 = vmatprep.subr.bf16.mxu1 %v8787_v30  ;;  %v1641_v31 = vlaneseq  ;;  %v8866_v30 = vld [vmem:[#allocation6 + $0x15f0] ss:$56 sps:$4 sm:$0xff]  }
 0x1cd   :  { %6611 = vmatprep.subr.bf16.mxu0 %v8790_v23  ;;  %v8869_v23 = vld [vmem:[#allocation6 + $0x1658] ss:$56 sps:$4 sm:$0xff]  }
 0x1cf   :  { %6448 = vmatpush1.bf16.msra.mxu1 %v8785_v0  ;;  %v8871_v0 = vld [vmem:[#allocation6 + $0x165c] ss:$56 sps:$4 sm:$0xff]  }
 0x1d0   :  { %6612 = vmatpush1.bf16.msra.mxu0 %v8788_v27  ;;  %6449 = vmatprep.subr.bf16.mxu1 %v8793_v61  ;;  %v8874_v27 = vld [vmem:[#allocation6 + $0x1664] ss:$56 sps:$4 sm:$0xff]   ;;  %v10538_v61 = vshrl.u32 %v1641_v31, 7 }
 0x1d1   :  { %6613 = vmatprep.subr.bf16.mxu0 %v8796_v55  ;;  %v8877_v55 = vld [vmem:[#allocation6 + $0x16cc] ss:$56 sps:$4 sm:$0xff]  }
 0x1d2   :  { %v8925_v31 = vld [vmem:[#allocation6 + $0x1a4c] ss:$56 sps:$4 sm:$0xff]  }
 0x1d3   :  { %6450 = vmatpush1.bf16.msra.mxu1 %v8791_v48  ;;  %v8872_v48 = vld [vmem:[#allocation6 + $0x1660] ss:$56 sps:$4 sm:$0xff]  }
 0x1d4   :  { %6614 = vmatpush1.bf16.msra.mxu0 %v8794_v22  ;;  %6451 = vmatprep.subr.bf16.mxu1 %v8799_v5  ;;  %v8880_v22 = vld [vmem:[#allocation6 + $0x16d4] ss:$56 sps:$4 sm:$0xff]   ;;  %v8875_v5 = vld [vmem:[#allocation6 + $0x16c8] ss:$56 sps:$4 sm:$0xff]  }
 0x1d5   :  { %6615 = vmatprep.subr.bf16.mxu0 %v8802_v8  ;;  %v1643_v8 = vsub.s32 0, %v10538_v61 }
 0x1d7   :  { %6452 = vmatpush1.bf16.msra.mxu1 %v8797_v35  ;;  %v1637_v35 = vld [vmem:[#allocation8] sm:$0xff] }
 0x1d8   :  { %6616 = vmatpush1.bf16.msra.mxu0 %v8800_v36  ;;  %6453 = vmatprep.subr.bf16.mxu1 %v8805_v18  ;;  %v1647_v36 = vsub.s32 1, %v10538_v61  ;;  %v8878_v18 = vld [vmem:[#allocation6 + $0x16d0] ss:$56 sps:$4 sm:$0xff]  }
 0x1d9   :  { %6617 = vmatprep.subr.bf16.mxu0 %v8808_v52  ;;  %v8886_v52 = vld [vmem:[#allocation6 + $0x1744] ss:$56 sps:$4 sm:$0xff]  }
 0x1db   :  { %6454 = vmatpush1.bf16.msra.mxu1 %v8803_v37  ;;  %v8883_v37 = vld [vmem:[#allocation6 + $0x173c] ss:$56 sps:$4 sm:$0xff]  }
 0x1dc   :  { %6618 = vmatpush1.bf16.msra.mxu0 %v8806_v21  ;;  %6455 = vmatprep.subr.bf16.mxu1 %v8811_v44  ;;  %v8881_v21 = vld [vmem:[#allocation6 + $0x1738] ss:$56 sps:$4 sm:$0xff]   ;;  %v1644_v44 = vrot.slane %v1637_v35, %v1643_v8 }
 0x1dd   :  { %6619 = vmatprep.subr.bf16.mxu0 %v8814_v60  ;;  %v8884_v60 = vld [vmem:[#allocation6 + $0x1740] ss:$56 sps:$4 sm:$0xff]  }
 0x1df   :  { %6456 = vmatpush1.bf16.msra.mxu1 %v8809_v9  ;;  %v1648_v9 = vrot.slane %v1637_v35, %v1647_v36  ;;  %v8935_v35 = vld [vmem:[#allocation6 + $0x1b28] ss:$56 sps:$4 sm:$0xff]  }
 0x1e0   :  { %6620 = vmatpush1.bf16.msra.mxu0 %v8812_v45  ;;  %6457 = vmatprep.subr.bf16.mxu1 %v8817_v51  ;;  %v8889_v45 = vld [vmem:[#allocation6 + $0x17ac] ss:$56 sps:$4 sm:$0xff]  }
 0x1e1   :  { %6621 = vmatprep.subr.bf16.mxu0 %v8820_v46  ;;  %v8892_v51 = vld [vmem:[#allocation6 + $0x17b4] ss:$56 sps:$4 sm:$0xff]   ;;  %v8887_v46 = vld [vmem:[#allocation6 + $0x17a8] ss:$56 sps:$4 sm:$0xff]  }
 0x1e3   :  { %6458 = vmatpush1.bf16.msra.mxu1 %v8815_v56 }
 0x1e4   :  { %6622 = vmatpush1.bf16.msra.mxu0 %v8818_v6  ;;  %6459 = vmatprep.subr.bf16.mxu1 %v8823_v16 }
 0x1e5   :  { %6623 = vmatprep.subr.bf16.mxu0 %v8826_v1 }
 0x1e7   :  { %6460 = vmatpush1.bf16.msra.mxu1 %v8821_v4 }
 0x1e8   :  { %6624 = vmatpush1.bf16.msra.mxu0 %v8824_v34  ;;  %6461 = vmatprep.subr.bf16.mxu1 %v8829_v47 }
 0x1e9   :  { %6625 = vmatprep.subr.bf16.mxu0 %v8832_v58 }
 0x1eb   :  { %6462 = vmatpush1.bf16.msra.mxu1 %v8827_v50 }
 0x1ec   :  { %6626 = vmatpush1.bf16.msra.mxu0 %v8830_v43  ;;  %6463 = vmatprep.subr.bf16.mxu1 %v8835_v10  ;;  %v8890_v10 = vld [vmem:[#allocation6 + $0x17b0] ss:$56 sps:$4 sm:$0xff]  }
 0x1ed   :  { %6627 = vmatprep.subr.bf16.mxu0 %v8838_v2 }
 0x1ef   :  { %6464 = vmatpush1.bf16.msra.mxu1 %v8833_v19  ;;  %v8895_v19 = vld [vmem:[#allocation6 + $0x181c] ss:$56 sps:$4 sm:$0xff]  }
 0x1f0   :  { %6628 = vmatpush1.bf16.msra.mxu0 %v8836_v3  ;;  %6465 = vmatprep.subr.bf16.mxu1 %v8841_v54  ;;  %v8893_v54 = vld [vmem:[#allocation6 + $0x1818] ss:$56 sps:$4 sm:$0xff]  }
 0x1f1   :  { %6629 = vmatprep.subr.bf16.mxu0 %v8844_v41  ;;  %v8896_v41 = vld [vmem:[#allocation6 + $0x1820] ss:$56 sps:$4 sm:$0xff]  }
 0x1f3   :  { %6466 = vmatpush1.bf16.msra.mxu1 %v8839_v11  ;;  %v8898_v11 = vld [vmem:[#allocation6 + $0x1824] ss:$56 sps:$4 sm:$0xff]  }
 0x1f4   :  { %6630 = vmatpush1.bf16.msra.mxu0 %v8842_v33  ;;  %6467 = vmatprep.subr.bf16.mxu1 %v8847_v26  ;;  %v8901_v33 = vld [vmem:[#allocation6 + $0x188c] ss:$56 sps:$4 sm:$0xff]   ;;  %v8899_v26 = vld [vmem:[#allocation6 + $0x1888] ss:$56 sps:$4 sm:$0xff]  }
 0x1f5   :  { %6631 = vmatprep.subr.bf16.mxu0 %v8850_v13  ;;  %v8902_v13 = vld [vmem:[#allocation6 + $0x1890] ss:$56 sps:$4 sm:$0xff]  }
 0x1f7   :  { %6468 = vmatpush1.bf16.msra.mxu1 %v8845_v57  ;;  %v8904_v57 = vld [vmem:[#allocation6 + $0x1894] ss:$56 sps:$4 sm:$0xff]  }
 0x1f8   :  { %6632 = vmatpush1.bf16.msra.mxu0 %v8848_v29  ;;  %6478 = vmatprep.subr.bf16.mxu1 %v8853_v40  ;;  %v8907_v29 = vld [vmem:[#allocation6 + $0x18fc] ss:$56 sps:$4 sm:$0xff]   ;;  %v8905_v40 = vld [vmem:[#allocation6 + $0x18f8] ss:$56 sps:$4 sm:$0xff]  }
 0x1f9   :  { %6642 = vmatprep.subr.bf16.mxu0 %v8856_v28  ;;  %v8908_v28 = vld [vmem:[#allocation6 + $0x1900] ss:$56 sps:$4 sm:$0xff]  }
 0x1fa   :  { %6470 = vmatmul.mubr.bf16.vlgmr.msra.gmra.mrb[4].mxu1 %v10500_v42 }
 0x1fb   :  { %6634 = vmatmul.mubr.bf16.vlgmr.msra.gmra.mrb[4].mxu0 %v10500_v42  ;;  %6479 = vmatpush1.bf16.msra.mxu1 %v8851_v12  ;;  %v8910_v12 = vld [vmem:[#allocation6 + $0x1904] ss:$56 sps:$4 sm:$0xff]  }
 0x1fc   :  { %6510 = vmatprep.mubr.bf16.mxu1 %v10509_v7  ;;  %6643 = vmatpush1.bf16.msra.mxu0 %v8854_v32  ;;  %v8913_v32 = vld [vmem:[#allocation6 + $0x196c] ss:$56 sps:$4 sm:$0xff]  }
 0x1fd   :  { %6674 = vmatprep.mubr.bf16.mxu0 %v10509_v7  ;;  %6480 = vmatprep.subr.bf16.mxu1 %v8859_v38  ;;  %v8911_v38 = vld [vmem:[#allocation6 + $0x1968] ss:$56 sps:$4 sm:$0xff]  }
 0x1fe   :  { %6644 = vmatprep.subr.bf16.mxu0 %v8862_v53  ;;  %v8919_v53 = vld [vmem:[#allocation6 + $0x19dc] ss:$56 sps:$4 sm:$0xff]  }
 0x1ff   :  { %6481 = vmatpush1.bf16.msra.mxu1 %v8857_v15  ;;  %v8916_v15 = vld [vmem:[#allocation6 + $0x1974] ss:$56 sps:$4 sm:$0xff]  }
 0x200   :  { %6645 = vmatpush1.bf16.msra.mxu0 %v8860_v14  ;;  %6482 = vmatprep.subr.bf16.mxu1 %v8865_v20  ;;  %v8914_v14 = vld [vmem:[#allocation6 + $0x1970] ss:$56 sps:$4 sm:$0xff]  }
 0x201   :  { %6646 = vmatprep.subr.bf16.mxu0 %v8868_v62  ;;  %v8917_v20 = vld [vmem:[#allocation6 + $0x19d8] ss:$56 sps:$4 sm:$0xff]   ;;  %v8922_v62 = vld [vmem:[#allocation6 + $0x19e4] ss:$56 sps:$4 sm:$0xff]  }
 0x203   :  { %6483 = vmatpush1.bf16.msra.mxu1 %v8863_v63  ;;  %v8920_v63 = vld [vmem:[#allocation6 + $0x19e0] ss:$56 sps:$4 sm:$0xff]  }
 0x204   :  { %6647 = vmatpush1.bf16.msra.mxu0 %v8866_v30  ;;  %6484 = vmatprep.subr.bf16.mxu1 %v8871_v0  ;;  %v8923_v30 = vld [vmem:[#allocation6 + $0x1a48] ss:$56 sps:$4 sm:$0xff]   ;;  %v8928_v0 = vld [vmem:[#allocation6 + $0x1a54] ss:$56 sps:$4 sm:$0xff]  }
 0x205   :  { %6648 = vmatprep.subr.bf16.mxu0 %v8874_v27  ;;  %v8931_v27 = vld [vmem:[#allocation6 + $0x1abc] ss:$56 sps:$4 sm:$0xff]  }
 0x207   :  { %6485 = vmatpush1.bf16.msra.mxu1 %v8869_v23  ;;  %v8926_v23 = vld [vmem:[#allocation6 + $0x1a50] ss:$56 sps:$4 sm:$0xff]  }
 0x208   :  { %6649 = vmatpush1.bf16.msra.mxu0 %v8872_v48  ;;  %6486 = vmatprep.subr.bf16.mxu1 %v8877_v55  ;;  %v8929_v48 = vld [vmem:[#allocation6 + $0x1ab8] ss:$56 sps:$4 sm:$0xff]   ;;  %v8934_v55 = vld [vmem:[#allocation6 + $0x1ac4] ss:$56 sps:$4 sm:$0xff]  }
 0x209   :  { %6650 = vmatprep.subr.bf16.mxu0 %v8880_v22  ;;  %v8932_v22 = vld [vmem:[#allocation6 + $0x1ac0] ss:$56 sps:$4 sm:$0xff]  }
 0x20b   :  { %6487 = vmatpush1.bf16.msra.mxu1 %v8875_v5  ;;  %v8937_v5 = vld [vmem:[#allocation6 + $0x1b2c] ss:$56 sps:$4 sm:$0xff]  }
 0x20c   :  { %6651 = vmatpush1.bf16.msra.mxu0 %v8878_v18  ;;  %6488 = vmatprep.subr.bf16.mxu1 %v8883_v37  ;;  %v8940_v18 = vld [vmem:[#allocation6 + $0x1b34] ss:$56 sps:$4 sm:$0xff]   ;;  %v8938_v37 = vld [vmem:[#allocation6 + $0x1b30] ss:$56 sps:$4 sm:$0xff]  }
 0x20d   :  { %v6266_v56 = vpop.f32.mrb[0].mxu1  ;;  %6652 = vmatprep.subr.bf16.mxu0 %v8886_v52  ;;  %v8943_v52 = vld [vmem:[#allocation6 + $0x1b9c] ss:$56 sps:$4 sm:$0xff]  }
 0x20e   :  { %v8265_v6 = vadd.f32 %v6266_v56, %v1644_v44  ;;  %v6348_v16 = vpop.f32.mrb[0].mxu0  ;;  %v6268_v4 = vpop.f32.mrb[1].mxu1  ;;  %v8946_v44 = vld [vmem:[#allocation6 + $0x1ba4] ss:$56 sps:$4 sm:$0xff]   ;;  %v8950_v56 = vld [vmem:[#allocation6 + $0x20] ss:$56 sps:$4 sm:$0xff]  }
 0x20f   :  { %v8267_v1 = vadd.f32 %v6268_v4, %v1648_v9  ;;  %v6350_v34 = vpop.f32.mrb[1].mxu0  ;;  %v6270_v47 = vpop.f32.mrb[2].mxu1  ;;  %6489 = vmatpush1.bf16.msra.mxu1 %v8881_v21  ;;  %v8941_v21 = vld [vmem:[#allocation6 + $0x1b98] ss:$56 sps:$4 sm:$0xff]   ;;  %v8958_v4 = vld [vmem:[#allocation6 + $0x94] ss:$56 sps:$4 sm:$0xff]  }
 0x210   :  { %v8266_v50 = vadd.f32 %v8265_v6, %v6348_v16  ;;  %v6352_v58 = vpop.f32.mrb[2].mxu0  ;;  %6653 = vmatpush1.bf16.msra.mxu0 %v8884_v60  ;;  %v6271_v43 = vpop.f32.mrb[3].mxu1  ;;  %6490 = vmatprep.subr.bf16.mxu1 %v8889_v45  ;;  %v8944_v9 = vld [vmem:[#allocation6 + $0x1ba0] ss:$56 sps:$4 sm:$0xff]   ;;  %v8949_v60 = vld [vmem:[#allocation6 + $0x1c] ss:$56 sps:$4 sm:$0xff]  }
 0x211   :  { %v8268_v2 = vadd.f32 %v8267_v1, %v6350_v34  ;;  %v6353_v3 = vpop.f32.mrb[3].mxu0  ;;  %6654 = vmatprep.subr.bf16.mxu0 %v8892_v51  ;;  %v8952_v45 = vld [vmem:[#allocation6 + $0x24] ss:$56 sps:$4 sm:$0xff]   ;;  %v8947_v51 = vld [vmem:[#allocation6 + $0x18] ss:$56 sps:$4 sm:$0xff]  }
 0x212   :  { %7339 = vst [vmem:[#allocation9] sm:$0xff] %v8266_v50  ;;  %v8953_v6 = vld [vmem:[#allocation6 + $0x88] ss:$56 sps:$4 sm:$0xff]   ;;  %v8961_v1 = vld [vmem:[#allocation6 + $0xfc] ss:$56 sps:$4 sm:$0xff]  }
 0x213   :  { %7340 = vst [vmem:[#allocation9 + $0x8] sm:$0xff] %v8268_v2  ;;  %6491 = vmatpush1.bf16.msra.mxu1 %v8887_v46  ;;  %v8955_v46 = vld [vmem:[#allocation6 + $0x8c] ss:$56 sps:$4 sm:$0xff]   ;;  %v8956_v16 = vld [vmem:[#allocation6 + $0x90] ss:$56 sps:$4 sm:$0xff]  }
 0x214   :  { %6655 = vmatpush1.bf16.msra.mxu0 %v8890_v10  ;;  %6492 = vmatprep.subr.bf16.mxu1 %v8895_v19  ;;  %v8964_v34 = vld [vmem:[#allocation6 + $0x104] ss:$56 sps:$4 sm:$0xff]   ;;  %v8959_v47 = vld [vmem:[#allocation6 + $0xf8] ss:$56 sps:$4 sm:$0xff]   ;;  %v8965_v43 = vld [vmem:[#allocation6 + $0x168] ss:$56 sps:$4 sm:$0xff]  }
 0x215   :  { %6656 = vmatprep.subr.bf16.mxu0 %v8898_v11  ;;  %v8962_v50 = vld [vmem:[#allocation6 + $0x100] ss:$56 sps:$4 sm:$0xff]   ;;  %v8967_v58 = vld [vmem:[#allocation6 + $0x16c] ss:$56 sps:$4 sm:$0xff]   ;;  %v8968_v19 = vld [vmem:[#allocation6 + $0x170] ss:$56 sps:$4 sm:$0xff]  }
 0x216   :  { %v8970_v10 = vld [vmem:[#allocation6 + $0x174] ss:$56 sps:$4 sm:$0xff]   ;;  %v8971_v3 = vld [vmem:[#allocation6 + $0x1d8] ss:$56 sps:$4 sm:$0xff]  }
 0x217   :  { %6493 = vmatpush1.bf16.msra.mxu1 %v8893_v54  ;;  %v8973_v2 = vld [vmem:[#allocation6 + $0x1dc] ss:$56 sps:$4 sm:$0xff]   ;;  %v8974_v11 = vld [vmem:[#allocation6 + $0x1e0] ss:$56 sps:$4 sm:$0xff]  }
 0x218   :  { %6657 = vmatpush1.bf16.msra.mxu0 %v8896_v41  ;;  %6494 = vmatprep.subr.bf16.mxu1 %v8901_v33  ;;  %v8976_v54 = vld [vmem:[#allocation6 + $0x1e4] ss:$56 sps:$4 sm:$0xff]   ;;  %v8977_v33 = vld [vmem:[#allocation6 + $0x248] ss:$56 sps:$4 sm:$0xff]  }
 0x219   :  { %6658 = vmatprep.subr.bf16.mxu0 %v8904_v57  ;;  %v8979_v41 = vld [vmem:[#allocation6 + $0x24c] ss:$56 sps:$4 sm:$0xff]   ;;  %v8980_v57 = vld [vmem:[#allocation6 + $0x250] ss:$56 sps:$4 sm:$0xff]  }
 0x21b   :  { %6495 = vmatpush1.bf16.msra.mxu1 %v8899_v26  ;;  %v8982_v26 = vld [vmem:[#allocation6 + $0x254] ss:$56 sps:$4 sm:$0xff]  }
 0x21c   :  { %6659 = vmatpush1.bf16.msra.mxu0 %v8902_v13  ;;  %6496 = vmatprep.subr.bf16.mxu1 %v8907_v29  ;;  %v8985_v13 = vld [vmem:[#allocation6 + $0x2bc] ss:$56 sps:$4 sm:$0xff]   ;;  %v8983_v29 = vld [vmem:[#allocation6 + $0x2b8] ss:$56 sps:$4 sm:$0xff]  }
 0x21d   :  { %6660 = vmatprep.subr.bf16.mxu0 %v8910_v12  ;;  %v8986_v12 = vld [vmem:[#allocation6 + $0x2c0] ss:$56 sps:$4 sm:$0xff]  }
 0x21f   :  { %6497 = vmatpush1.bf16.msra.mxu1 %v8905_v40  ;;  %v8988_v40 = vld [vmem:[#allocation6 + $0x2c4] ss:$56 sps:$4 sm:$0xff]  }
 0x220   :  { %6661 = vmatpush1.bf16.msra.mxu0 %v8908_v28  ;;  %6498 = vmatprep.subr.bf16.mxu1 %v8913_v32  ;;  %v8991_v28 = vld [vmem:[#allocation6 + $0x32c] ss:$56 sps:$4 sm:$0xff]   ;;  %v8989_v32 = vld [vmem:[#allocation6 + $0x328] ss:$56 sps:$4 sm:$0xff]  }
 0x221   :  { %6662 = vmatprep.subr.bf16.mxu0 %v8916_v15  ;;  %v8992_v15 = vld [vmem:[#allocation6 + $0x330] ss:$56 sps:$4 sm:$0xff]  }
 0x223   :  { %6499 = vmatpush1.bf16.msra.mxu1 %v8911_v38  ;;  %v8994_v38 = vld [vmem:[#allocation6 + $0x334] ss:$56 sps:$4 sm:$0xff]  }
 0x224   :  { %6663 = vmatpush1.bf16.msra.mxu0 %v8914_v14  ;;  %6500 = vmatprep.subr.bf16.mxu1 %v8919_v53  ;;  %v8997_v14 = vld [vmem:[#allocation6 + $0x39c] ss:$56 sps:$4 sm:$0xff]   ;;  %v8995_v53 = vld [vmem:[#allocation6 + $0x398] ss:$56 sps:$4 sm:$0xff]  }
 0x225   :  { %6664 = vmatprep.subr.bf16.mxu0 %v8922_v62  ;;  %v8998_v62 = vld [vmem:[#allocation6 + $0x3a0] ss:$56 sps:$4 sm:$0xff]  }
 0x227   :  { %6501 = vmatpush1.bf16.msra.mxu1 %v8917_v20  ;;  %v9000_v20 = vld [vmem:[#allocation6 + $0x3a4] ss:$56 sps:$4 sm:$0xff]  }
 0x228   :  { %6665 = vmatpush1.bf16.msra.mxu0 %v8920_v63  ;;  %6502 = vmatprep.subr.bf16.mxu1 %v8925_v31  ;;  %v9003_v63 = vld [vmem:[#allocation6 + $0x40c] ss:$56 sps:$4 sm:$0xff]  }
 0x229   :  { %6666 = vmatprep.subr.bf16.mxu0 %v8928_v0  ;;  %v9006_v31 = vld [vmem:[#allocation6 + $0x414] ss:$56 sps:$4 sm:$0xff]   ;;  %v9004_v0 = vld [vmem:[#allocation6 + $0x410] ss:$56 sps:$4 sm:$0xff]  }
 0x22b   :  { %6503 = vmatpush1.bf16.msra.mxu1 %v8923_v30  ;;  %v9001_v30 = vld [vmem:[#allocation6 + $0x408] ss:$56 sps:$4 sm:$0xff]  }
 0x22c   :  { %6667 = vmatpush1.bf16.msra.mxu0 %v8926_v23  ;;  %6504 = vmatprep.subr.bf16.mxu1 %v8931_v27  ;;  %v9009_v23 = vld [vmem:[#allocation6 + $0x47c] ss:$56 sps:$4 sm:$0xff]  }
 0x22d   :  { %6668 = vmatprep.subr.bf16.mxu0 %v8934_v55  ;;  %v9012_v27 = vld [vmem:[#allocation6 + $0x484] ss:$56 sps:$4 sm:$0xff]   ;;  %v9010_v55 = vld [vmem:[#allocation6 + $0x480] ss:$56 sps:$4 sm:$0xff]  }
 0x22f   :  { %6505 = vmatpush1.bf16.msra.mxu1 %v8929_v48  ;;  %v9007_v48 = vld [vmem:[#allocation6 + $0x478] ss:$56 sps:$4 sm:$0xff]  }
 0x230   :  { %6669 = vmatpush1.bf16.msra.mxu0 %v8932_v22  ;;  %6506 = vmatprep.subr.bf16.mxu1 %v8937_v5  ;;  %v9015_v22 = vld [vmem:[#allocation6 + $0x4ec] ss:$56 sps:$4 sm:$0xff]  }
 0x231   :  { %6670 = vmatprep.subr.bf16.mxu0 %v8940_v18  ;;  %v9018_v5 = vld [vmem:[#allocation6 + $0x4f4] ss:$56 sps:$4 sm:$0xff]   ;;  %v9016_v18 = vld [vmem:[#allocation6 + $0x4f0] ss:$56 sps:$4 sm:$0xff]  }
 0x233   :  { %6507 = vmatpush1.bf16.msra.mxu1 %v8935_v35  ;;  %v9013_v35 = vld [vmem:[#allocation6 + $0x4e8] ss:$56 sps:$4 sm:$0xff]  }
 0x234   :  { %6671 = vmatpush1.bf16.msra.mxu0 %v8938_v37  ;;  %6508 = vmatprep.subr.bf16.mxu1 %v8943_v52  ;;  %v9021_v37 = vld [vmem:[#allocation6 + $0x55c] ss:$56 sps:$4 sm:$0xff]  }
 0x235   :  { %6672 = vmatprep.subr.bf16.mxu0 %v8946_v44  ;;  %v9024_v52 = vld [vmem:[#allocation6 + $0x564] ss:$56 sps:$4 sm:$0xff]   ;;  %v9022_v44 = vld [vmem:[#allocation6 + $0x560] ss:$56 sps:$4 sm:$0xff]  }
 0x237   :  { %6509 = vmatpush1.bf16.msra.mxu1 %v8941_v21  ;;  %v9019_v21 = vld [vmem:[#allocation6 + $0x558] ss:$56 sps:$4 sm:$0xff]  }
 0x238   :  { %6673 = vmatpush1.bf16.msra.mxu0 %v8944_v9  ;;  %6683 = vmatprep.subr.bf16.mxu1 %v8949_v60  ;;  %v9027_v9 = vld [vmem:[#allocation6 + $0x5cc] ss:$56 sps:$4 sm:$0xff]  }
 0x239   :  { %6847 = vmatprep.subr.bf16.mxu0 %v8952_v45  ;;  %v9030_v60 = vld [vmem:[#allocation6 + $0x5d4] ss:$56 sps:$4 sm:$0xff]   ;;  %v9025_v45 = vld [vmem:[#allocation6 + $0x5c8] ss:$56 sps:$4 sm:$0xff]  }
 0x23a   :  { %6511 = vmatmul.mubr.bf16.vlgmr.msra.gmra.mrb[4].mxu1 %v10520_v17 }
 0x23b   :  { %6675 = vmatmul.mubr.bf16.vlgmr.msra.gmra.mrb[4].mxu0 %v10520_v17  ;;  %6684 = vmatpush1.bf16.msra.mxu1 %v8947_v51  ;;  %v9028_v51 = vld [vmem:[#allocation6 + $0x5d0] ss:$56 sps:$4 sm:$0xff]  }
 0x23c   :  { %6715 = vmatprep.mubr.bf16.mxu1 %v10498_v24  ;;  %6848 = vmatpush1.bf16.msra.mxu0 %v8950_v56  ;;  %v9033_v56 = vld [vmem:[#allocation6 + $0x63c] ss:$56 sps:$4 sm:$0xff]  }
 0x23d   :  { %6879 = vmatprep.mubr.bf16.mxu0 %v10498_v24  ;;  %6685 = vmatprep.subr.bf16.mxu1 %v8955_v46  ;;  %v9036_v46 = vld [vmem:[#allocation6 + $0x644] ss:$56 sps:$4 sm:$0xff]  }
 0x23e   :  { %6849 = vmatprep.subr.bf16.mxu0 %v8958_v4  ;;  %v9039_v4 = vld [vmem:[#allocation6 + $0x6ac] ss:$56 sps:$4 sm:$0xff]  }
 0x23f   :  { %6686 = vmatpush1.bf16.msra.mxu1 %v8953_v6  ;;  %v9031_v6 = vld [vmem:[#allocation6 + $0x638] ss:$56 sps:$4 sm:$0xff]  }
 0x240   :  { %6850 = vmatpush1.bf16.msra.mxu0 %v8956_v16  ;;  %6687 = vmatprep.subr.bf16.mxu1 %v8961_v1  ;;  %v9034_v16 = vld [vmem:[#allocation6 + $0x640] ss:$56 sps:$4 sm:$0xff]   ;;  %v9042_v1 = vld [vmem:[#allocation6 + $0x6b4] ss:$56 sps:$4 sm:$0xff]  }
 0x241   :  { %6851 = vmatprep.subr.bf16.mxu0 %v8964_v34  ;;  %v9037_v34 = vld [vmem:[#allocation6 + $0x6a8] ss:$56 sps:$4 sm:$0xff]  }
 0x243   :  { %6688 = vmatpush1.bf16.msra.mxu1 %v8959_v47  ;;  %v9040_v47 = vld [vmem:[#allocation6 + $0x6b0] ss:$56 sps:$4 sm:$0xff]  }
 0x244   :  { %6852 = vmatpush1.bf16.msra.mxu0 %v8962_v50  ;;  %6689 = vmatprep.subr.bf16.mxu1 %v8967_v58  ;;  %v9045_v50 = vld [vmem:[#allocation6 + $0x71c] ss:$56 sps:$4 sm:$0xff]  }
 0x245   :  { %6853 = vmatprep.subr.bf16.mxu0 %v8970_v10  ;;  %v9048_v58 = vld [vmem:[#allocation6 + $0x724] ss:$56 sps:$4 sm:$0xff]   ;;  %v9046_v10 = vld [vmem:[#allocation6 + $0x720] ss:$56 sps:$4 sm:$0xff]  }
 0x247   :  { %6690 = vmatpush1.bf16.msra.mxu1 %v8965_v43  ;;  %v9043_v43 = vld [vmem:[#allocation6 + $0x718] ss:$56 sps:$4 sm:$0xff]  }
 0x248   :  { %6854 = vmatpush1.bf16.msra.mxu0 %v8968_v19  ;;  %6691 = vmatprep.subr.bf16.mxu1 %v8973_v2  ;;  %v9051_v19 = vld [vmem:[#allocation6 + $0x78c] ss:$56 sps:$4 sm:$0xff]  }
 0x249   :  { %6855 = vmatprep.subr.bf16.mxu0 %v8976_v54  ;;  %v9054_v2 = vld [vmem:[#allocation6 + $0x794] ss:$56 sps:$4 sm:$0xff]   ;;  %v9052_v54 = vld [vmem:[#allocation6 + $0x790] ss:$56 sps:$4 sm:$0xff]  }
 0x24b   :  { %6692 = vmatpush1.bf16.msra.mxu1 %v8971_v3  ;;  %v9049_v3 = vld [vmem:[#allocation6 + $0x788] ss:$56 sps:$4 sm:$0xff]  }
 0x24c   :  { %6856 = vmatpush1.bf16.msra.mxu0 %v8974_v11  ;;  %6693 = vmatprep.subr.bf16.mxu1 %v8979_v41  ;;  %v9057_v11 = vld [vmem:[#allocation6 + $0x7fc] ss:$56 sps:$4 sm:$0xff]  }
 0x24d   :  { %6857 = vmatprep.subr.bf16.mxu0 %v8982_v26  ;;  %v9060_v41 = vld [vmem:[#allocation6 + $0x804] ss:$56 sps:$4 sm:$0xff]   ;;  %v9058_v26 = vld [vmem:[#allocation6 + $0x800] ss:$56 sps:$4 sm:$0xff]  }
 0x24f   :  { %6694 = vmatpush1.bf16.msra.mxu1 %v8977_v33  ;;  %v9055_v33 = vld [vmem:[#allocation6 + $0x7f8] ss:$56 sps:$4 sm:$0xff]  }
 0x250   :  { %6858 = vmatpush1.bf16.msra.mxu0 %v8980_v57  ;;  %6695 = vmatprep.subr.bf16.mxu1 %v8985_v13  ;;  %v9063_v57 = vld [vmem:[#allocation6 + $0x86c] ss:$56 sps:$4 sm:$0xff]  }
 0x251   :  { %6859 = vmatprep.subr.bf16.mxu0 %v8988_v40  ;;  %v9066_v13 = vld [vmem:[#allocation6 + $0x874] ss:$56 sps:$4 sm:$0xff]   ;;  %v9064_v40 = vld [vmem:[#allocation6 + $0x870] ss:$56 sps:$4 sm:$0xff]  }
 0x253   :  { %6696 = vmatpush1.bf16.msra.mxu1 %v8983_v29  ;;  %v9061_v29 = vld [vmem:[#allocation6 + $0x868] ss:$56 sps:$4 sm:$0xff]  }
 0x254   :  { %6860 = vmatpush1.bf16.msra.mxu0 %v8986_v12  ;;  %6697 = vmatprep.subr.bf16.mxu1 %v8991_v28  ;;  %v9069_v12 = vld [vmem:[#allocation6 + $0x8dc] ss:$56 sps:$4 sm:$0xff]  }
 0x255   :  { %6861 = vmatprep.subr.bf16.mxu0 %v8994_v38  ;;  %v9072_v28 = vld [vmem:[#allocation6 + $0x8e4] ss:$56 sps:$4 sm:$0xff]   ;;  %v9070_v38 = vld [vmem:[#allocation6 + $0x8e0] ss:$56 sps:$4 sm:$0xff]  }
 0x257   :  { %6698 = vmatpush1.bf16.msra.mxu1 %v8989_v32  ;;  %v9067_v32 = vld [vmem:[#allocation6 + $0x8d8] ss:$56 sps:$4 sm:$0xff]  }
 0x258   :  { %6862 = vmatpush1.bf16.msra.mxu0 %v8992_v15  ;;  %6699 = vmatprep.subr.bf16.mxu1 %v8997_v14  ;;  %v9075_v15 = vld [vmem:[#allocation6 + $0x94c] ss:$56 sps:$4 sm:$0xff]  }
 0x259   :  { %6863 = vmatprep.subr.bf16.mxu0 %v9000_v20  ;;  %v9078_v14 = vld [vmem:[#allocation6 + $0x954] ss:$56 sps:$4 sm:$0xff]   ;;  %v9076_v20 = vld [vmem:[#allocation6 + $0x950] ss:$56 sps:$4 sm:$0xff]  }
 0x25b   :  { %6700 = vmatpush1.bf16.msra.mxu1 %v8995_v53  ;;  %v9073_v53 = vld [vmem:[#allocation6 + $0x948] ss:$56 sps:$4 sm:$0xff]  }
 0x25c   :  { %6864 = vmatpush1.bf16.msra.mxu0 %v8998_v62  ;;  %6701 = vmatprep.subr.bf16.mxu1 %v9003_v63  ;;  %v9081_v62 = vld [vmem:[#allocation6 + $0x9bc] ss:$56 sps:$4 sm:$0xff]  }
 0x25d   :  { %6865 = vmatprep.subr.bf16.mxu0 %v9006_v31  ;;  %v9084_v63 = vld [vmem:[#allocation6 + $0x9c4] ss:$56 sps:$4 sm:$0xff]   ;;  %v9079_v31 = vld [vmem:[#allocation6 + $0x9b8] ss:$56 sps:$4 sm:$0xff]  }
 0x25f   :  { %6702 = vmatpush1.bf16.msra.mxu1 %v9001_v30  ;;  %v9082_v30 = vld [vmem:[#allocation6 + $0x9c0] ss:$56 sps:$4 sm:$0xff]  }
 0x260   :  { %6866 = vmatpush1.bf16.msra.mxu0 %v9004_v0  ;;  %6703 = vmatprep.subr.bf16.mxu1 %v9009_v23  ;;  %v9087_v0 = vld [vmem:[#allocation6 + $0xa2c] ss:$56 sps:$4 sm:$0xff]  }
 0x261   :  { %6867 = vmatprep.subr.bf16.mxu0 %v9012_v27  ;;  %v9090_v23 = vld [vmem:[#allocation6 + $0xa34] ss:$56 sps:$4 sm:$0xff]   ;;  %v9085_v27 = vld [vmem:[#allocation6 + $0xa28] ss:$56 sps:$4 sm:$0xff]  }
 0x263   :  { %6704 = vmatpush1.bf16.msra.mxu1 %v9007_v48  ;;  %v9088_v48 = vld [vmem:[#allocation6 + $0xa30] ss:$56 sps:$4 sm:$0xff]  }
 0x264   :  { %6868 = vmatpush1.bf16.msra.mxu0 %v9010_v55  ;;  %6705 = vmatprep.subr.bf16.mxu1 %v9015_v22  ;;  %v9093_v55 = vld [vmem:[#allocation6 + $0xa9c] ss:$56 sps:$4 sm:$0xff]  }
 0x265   :  { %6869 = vmatprep.subr.bf16.mxu0 %v9018_v5  ;;  %v9096_v22 = vld [vmem:[#allocation6 + $0xaa4] ss:$56 sps:$4 sm:$0xff]   ;;  %v9091_v5 = vld [vmem:[#allocation6 + $0xa98] ss:$56 sps:$4 sm:$0xff]  }
 0x267   :  { %6706 = vmatpush1.bf16.msra.mxu1 %v9013_v35  ;;  %v9094_v35 = vld [vmem:[#allocation6 + $0xaa0] ss:$56 sps:$4 sm:$0xff]  }
 0x268   :  { %6870 = vmatpush1.bf16.msra.mxu0 %v9016_v18  ;;  %6707 = vmatprep.subr.bf16.mxu1 %v9021_v37  ;;  %v9099_v18 = vld [vmem:[#allocation6 + $0xb0c] ss:$56 sps:$4 sm:$0xff]  }
 0x269   :  { %6871 = vmatprep.subr.bf16.mxu0 %v9024_v52  ;;  %v9102_v37 = vld [vmem:[#allocation6 + $0xb14] ss:$56 sps:$4 sm:$0xff]   ;;  %v9097_v52 = vld [vmem:[#allocation6 + $0xb08] ss:$56 sps:$4 sm:$0xff]  }
 0x26b   :  { %6708 = vmatpush1.bf16.msra.mxu1 %v9019_v21  ;;  %v9100_v21 = vld [vmem:[#allocation6 + $0xb10] ss:$56 sps:$4 sm:$0xff]  }
 0x26c   :  { %6872 = vmatpush1.bf16.msra.mxu0 %v9022_v44  ;;  %6709 = vmatprep.subr.bf16.mxu1 %v9027_v9  ;;  %v9105_v44 = vld [vmem:[#allocation6 + $0xb7c] ss:$56 sps:$4 sm:$0xff]  }
 0x26d   :  { %6873 = vmatprep.subr.bf16.mxu0 %v9030_v60  ;;  %v9108_v9 = vld [vmem:[#allocation6 + $0xb84] ss:$56 sps:$4 sm:$0xff]   ;;  %v9103_v60 = vld [vmem:[#allocation6 + $0xb78] ss:$56 sps:$4 sm:$0xff]  }
 0x26f   :  { %6710 = vmatpush1.bf16.msra.mxu1 %v9025_v45  ;;  %v9106_v45 = vld [vmem:[#allocation6 + $0xb80] ss:$56 sps:$4 sm:$0xff]  }
 0x270   :  { %6874 = vmatpush1.bf16.msra.mxu0 %v9028_v51  ;;  %6711 = vmatprep.subr.bf16.mxu1 %v9033_v56  ;;  %v9111_v51 = vld [vmem:[#allocation6 + $0xbec] ss:$56 sps:$4 sm:$0xff]  }
 0x271   :  { %6875 = vmatprep.subr.bf16.mxu0 %v9036_v46  ;;  %v9114_v56 = vld [vmem:[#allocation6 + $0xbf4] ss:$56 sps:$4 sm:$0xff]   ;;  %v9109_v46 = vld [vmem:[#allocation6 + $0xbe8] ss:$56 sps:$4 sm:$0xff]  }
 0x273   :  { %6712 = vmatpush1.bf16.msra.mxu1 %v9031_v6  ;;  %v9112_v6 = vld [vmem:[#allocation6 + $0xbf0] ss:$56 sps:$4 sm:$0xff]  }
 0x274   :  { %6876 = vmatpush1.bf16.msra.mxu0 %v9034_v16  ;;  %6713 = vmatprep.subr.bf16.mxu1 %v9039_v4  ;;  %v9117_v16 = vld [vmem:[#allocation6 + $0xc5c] ss:$56 sps:$4 sm:$0xff]  }
 0x275   :  { %6877 = vmatprep.subr.bf16.mxu0 %v9042_v1  ;;  %v9120_v4 = vld [vmem:[#allocation6 + $0xc64] ss:$56 sps:$4 sm:$0xff]   ;;  %v9115_v1 = vld [vmem:[#allocation6 + $0xc58] ss:$56 sps:$4 sm:$0xff]  }
 0x277   :  { %6714 = vmatpush1.bf16.msra.mxu1 %v9037_v34  ;;  %v9118_v34 = vld [vmem:[#allocation6 + $0xc60] ss:$56 sps:$4 sm:$0xff]  }
 0x278   :  { %6878 = vmatpush1.bf16.msra.mxu0 %v9040_v47  ;;  %6724 = vmatprep.subr.bf16.mxu1 %v9045_v50  ;;  %v9123_v47 = vld [vmem:[#allocation6 + $0xccc] ss:$56 sps:$4 sm:$0xff]  }
 0x279   :  { %6888 = vmatprep.subr.bf16.mxu0 %v9048_v58  ;;  %v9126_v50 = vld [vmem:[#allocation6 + $0xcd4] ss:$56 sps:$4 sm:$0xff]   ;;  %v9121_v58 = vld [vmem:[#allocation6 + $0xcc8] ss:$56 sps:$4 sm:$0xff]  }
 0x27a   :  { %6716 = vmatmul.mubr.bf16.vlgmr.msra.gmra.mrb[8].mxu1 %v10496_v25 }
 0x27b   :  { %6880 = vmatmul.mubr.bf16.vlgmr.msra.gmra.mrb[8].mxu0 %v10496_v25  ;;  %6725 = vmatpush1.bf16.msra.mxu1 %v9043_v43  ;;  %v9124_v43 = vld [vmem:[#allocation6 + $0xcd0] ss:$56 sps:$4 sm:$0xff]  }
 0x27c   :  { %6756 = vmatprep.mubr.bf16.mxu1 %v10505_v49  ;;  %6889 = vmatpush1.bf16.msra.mxu0 %v9046_v10  ;;  %v9129_v10 = vld [vmem:[#allocation6 + $0xd3c] ss:$56 sps:$4 sm:$0xff]  }
 0x27d   :  { %6920 = vmatprep.mubr.bf16.mxu0 %v10505_v49  ;;  %6726 = vmatprep.subr.bf16.mxu1 %v9051_v19  ;;  %v9132_v19 = vld [vmem:[#allocation6 + $0xd44] ss:$56 sps:$4 sm:$0xff]  }
 0x27e   :  { %6890 = vmatprep.subr.bf16.mxu0 %v9054_v2  ;;  %v9127_v2 = vld [vmem:[#allocation6 + $0xd38] ss:$56 sps:$4 sm:$0xff]  }
 0x27f   :  { %6727 = vmatpush1.bf16.msra.mxu1 %v9049_v3  ;;  %v9130_v3 = vld [vmem:[#allocation6 + $0xd40] ss:$56 sps:$4 sm:$0xff]  }
 0x280   :  { %6891 = vmatpush1.bf16.msra.mxu0 %v9052_v54  ;;  %6728 = vmatprep.subr.bf16.mxu1 %v9057_v11  ;;  %v9135_v54 = vld [vmem:[#allocation6 + $0xdac] ss:$56 sps:$4 sm:$0xff]  }
 0x281   :  { %6892 = vmatprep.subr.bf16.mxu0 %v9060_v41  ;;  %v9138_v11 = vld [vmem:[#allocation6 + $0xdb4] ss:$56 sps:$4 sm:$0xff]   ;;  %v9133_v41 = vld [vmem:[#allocation6 + $0xda8] ss:$56 sps:$4 sm:$0xff]  }
 0x283   :  { %6729 = vmatpush1.bf16.msra.mxu1 %v9055_v33  ;;  %v9136_v33 = vld [vmem:[#allocation6 + $0xdb0] ss:$56 sps:$4 sm:$0xff]  }
 0x284   :  { %6893 = vmatpush1.bf16.msra.mxu0 %v9058_v26  ;;  %6730 = vmatprep.subr.bf16.mxu1 %v9063_v57  ;;  %v9141_v26 = vld [vmem:[#allocation6 + $0xe1c] ss:$56 sps:$4 sm:$0xff]  }
 0x285   :  { %6894 = vmatprep.subr.bf16.mxu0 %v9066_v13  ;;  %v9144_v57 = vld [vmem:[#allocation6 + $0xe24] ss:$56 sps:$4 sm:$0xff]   ;;  %v9139_v13 = vld [vmem:[#allocation6 + $0xe18] ss:$56 sps:$4 sm:$0xff]  }
 0x287   :  { %6731 = vmatpush1.bf16.msra.mxu1 %v9061_v29  ;;  %v9142_v29 = vld [vmem:[#allocation6 + $0xe20] ss:$56 sps:$4 sm:$0xff]  }
 0x288   :  { %6895 = vmatpush1.bf16.msra.mxu0 %v9064_v40  ;;  %6732 = vmatprep.subr.bf16.mxu1 %v9069_v12  ;;  %v9147_v40 = vld [vmem:[#allocation6 + $0xe8c] ss:$56 sps:$4 sm:$0xff]  }
 0x289   :  { %6896 = vmatprep.subr.bf16.mxu0 %v9072_v28  ;;  %v9150_v12 = vld [vmem:[#allocation6 + $0xe94] ss:$56 sps:$4 sm:$0xff]   ;;  %v9145_v28 = vld [vmem:[#allocation6 + $0xe88] ss:$56 sps:$4 sm:$0xff]  }
 0x28b   :  { %6733 = vmatpush1.bf16.msra.mxu1 %v9067_v32  ;;  %v9148_v32 = vld [vmem:[#allocation6 + $0xe90] ss:$56 sps:$4 sm:$0xff]  }
 0x28c   :  { %6897 = vmatpush1.bf16.msra.mxu0 %v9070_v38  ;;  %6734 = vmatprep.subr.bf16.mxu1 %v9075_v15  ;;  %v9153_v38 = vld [vmem:[#allocation6 + $0xefc] ss:$56 sps:$4 sm:$0xff]  }
 0x28d   :  { %6898 = vmatprep.subr.bf16.mxu0 %v9078_v14  ;;  %v9156_v15 = vld [vmem:[#allocation6 + $0xf04] ss:$56 sps:$4 sm:$0xff]   ;;  %v9151_v14 = vld [vmem:[#allocation6 + $0xef8] ss:$56 sps:$4 sm:$0xff]  }
 0x28f   :  { %6735 = vmatpush1.bf16.msra.mxu1 %v9073_v53  ;;  %v9154_v53 = vld [vmem:[#allocation6 + $0xf00] ss:$56 sps:$4 sm:$0xff]  }
 0x290   :  { %6899 = vmatpush1.bf16.msra.mxu0 %v9076_v20  ;;  %6736 = vmatprep.subr.bf16.mxu1 %v9081_v62  ;;  %v9159_v20 = vld [vmem:[#allocation6 + $0xf6c] ss:$56 sps:$4 sm:$0xff]  }
 0x291   :  { %6900 = vmatprep.subr.bf16.mxu0 %v9084_v63  ;;  %v9162_v62 = vld [vmem:[#allocation6 + $0xf74] ss:$56 sps:$4 sm:$0xff]   ;;  %v9157_v63 = vld [vmem:[#allocation6 + $0xf68] ss:$56 sps:$4 sm:$0xff]  }
 0x293   :  { %6737 = vmatpush1.bf16.msra.mxu1 %v9079_v31  ;;  %v9160_v31 = vld [vmem:[#allocation6 + $0xf70] ss:$56 sps:$4 sm:$0xff]  }
 0x294   :  { %6901 = vmatpush1.bf16.msra.mxu0 %v9082_v30  ;;  %6738 = vmatprep.subr.bf16.mxu1 %v9087_v0  ;;  %v9165_v30 = vld [vmem:[#allocation6 + $0xfdc] ss:$56 sps:$4 sm:$0xff]  }
 0x295   :  { %6902 = vmatprep.subr.bf16.mxu0 %v9090_v23  ;;  %v9168_v0 = vld [vmem:[#allocation6 + $0xfe4] ss:$56 sps:$4 sm:$0xff]   ;;  %v9163_v23 = vld [vmem:[#allocation6 + $0xfd8] ss:$56 sps:$4 sm:$0xff]  }
 0x297   :  { %6739 = vmatpush1.bf16.msra.mxu1 %v9085_v27  ;;  %v9166_v27 = vld [vmem:[#allocation6 + $0xfe0] ss:$56 sps:$4 sm:$0xff]  }
 0x298   :  { %6903 = vmatpush1.bf16.msra.mxu0 %v9088_v48  ;;  %6740 = vmatprep.subr.bf16.mxu1 %v9093_v55  ;;  %v9171_v48 = vld [vmem:[#allocation6 + $0x104c] ss:$56 sps:$4 sm:$0xff]  }
 0x299   :  { %6904 = vmatprep.subr.bf16.mxu0 %v9096_v22  ;;  %v9174_v55 = vld [vmem:[#allocation6 + $0x1054] ss:$56 sps:$4 sm:$0xff]   ;;  %v9169_v22 = vld [vmem:[#allocation6 + $0x1048] ss:$56 sps:$4 sm:$0xff]  }
 0x29b   :  { %6741 = vmatpush1.bf16.msra.mxu1 %v9091_v5  ;;  %v9172_v5 = vld [vmem:[#allocation6 + $0x1050] ss:$56 sps:$4 sm:$0xff]  }
 0x29c   :  { %6905 = vmatpush1.bf16.msra.mxu0 %v9094_v35  ;;  %6742 = vmatprep.subr.bf16.mxu1 %v9099_v18  ;;  %v9177_v35 = vld [vmem:[#allocation6 + $0x10bc] ss:$56 sps:$4 sm:$0xff]  }
 0x29d   :  { %6906 = vmatprep.subr.bf16.mxu0 %v9102_v37  ;;  %v9180_v18 = vld [vmem:[#allocation6 + $0x10c4] ss:$56 sps:$4 sm:$0xff]   ;;  %v9175_v37 = vld [vmem:[#allocation6 + $0x10b8] ss:$56 sps:$4 sm:$0xff]  }
 0x29f   :  { %6743 = vmatpush1.bf16.msra.mxu1 %v9097_v52  ;;  %v9178_v52 = vld [vmem:[#allocation6 + $0x10c0] ss:$56 sps:$4 sm:$0xff]  }
 0x2a0   :  { %6907 = vmatpush1.bf16.msra.mxu0 %v9100_v21  ;;  %6744 = vmatprep.subr.bf16.mxu1 %v9105_v44  ;;  %v9183_v21 = vld [vmem:[#allocation6 + $0x112c] ss:$56 sps:$4 sm:$0xff]  }
 0x2a1   :  { %6908 = vmatprep.subr.bf16.mxu0 %v9108_v9  ;;  %v9186_v44 = vld [vmem:[#allocation6 + $0x1134] ss:$56 sps:$4 sm:$0xff]   ;;  %v9181_v9 = vld [vmem:[#allocation6 + $0x1128] ss:$56 sps:$4 sm:$0xff]  }
 0x2a3   :  { %6745 = vmatpush1.bf16.msra.mxu1 %v9103_v60  ;;  %v9184_v60 = vld [vmem:[#allocation6 + $0x1130] ss:$56 sps:$4 sm:$0xff]  }
 0x2a4   :  { %6909 = vmatpush1.bf16.msra.mxu0 %v9106_v45  ;;  %6746 = vmatprep.subr.bf16.mxu1 %v9111_v51  ;;  %v9189_v45 = vld [vmem:[#allocation6 + $0x119c] ss:$56 sps:$4 sm:$0xff]  }
 0x2a5   :  { %6910 = vmatprep.subr.bf16.mxu0 %v9114_v56  ;;  %v9192_v51 = vld [vmem:[#allocation6 + $0x11a4] ss:$56 sps:$4 sm:$0xff]   ;;  %v9187_v56 = vld [vmem:[#allocation6 + $0x1198] ss:$56 sps:$4 sm:$0xff]  }
 0x2a7   :  { %6747 = vmatpush1.bf16.msra.mxu1 %v9109_v46  ;;  %v9190_v46 = vld [vmem:[#allocation6 + $0x11a0] ss:$56 sps:$4 sm:$0xff]  }
 0x2a8   :  { %6911 = vmatpush1.bf16.msra.mxu0 %v9112_v6  ;;  %6748 = vmatprep.subr.bf16.mxu1 %v9117_v16  ;;  %v9195_v6 = vld [vmem:[#allocation6 + $0x120c] ss:$56 sps:$4 sm:$0xff]  }
 0x2a9   :  { %6912 = vmatprep.subr.bf16.mxu0 %v9120_v4  ;;  %v9198_v16 = vld [vmem:[#allocation6 + $0x1214] ss:$56 sps:$4 sm:$0xff]   ;;  %v9193_v4 = vld [vmem:[#allocation6 + $0x1208] ss:$56 sps:$4 sm:$0xff]  }
 0x2ab   :  { %6749 = vmatpush1.bf16.msra.mxu1 %v9115_v1  ;;  %v9196_v1 = vld [vmem:[#allocation6 + $0x1210] ss:$56 sps:$4 sm:$0xff]  }
 0x2ac   :  { %6913 = vmatpush1.bf16.msra.mxu0 %v9118_v34  ;;  %6750 = vmatprep.subr.bf16.mxu1 %v9123_v47  ;;  %v9201_v34 = vld [vmem:[#allocation6 + $0x127c] ss:$56 sps:$4 sm:$0xff]  }
 0x2ad   :  { %6914 = vmatprep.subr.bf16.mxu0 %v9126_v50  ;;  %v9204_v47 = vld [vmem:[#allocation6 + $0x1284] ss:$56 sps:$4 sm:$0xff]   ;;  %v9199_v50 = vld [vmem:[#allocation6 + $0x1278] ss:$56 sps:$4 sm:$0xff]  }
 0x2af   :  { %6751 = vmatpush1.bf16.msra.mxu1 %v9121_v58  ;;  %v9202_v58 = vld [vmem:[#allocation6 + $0x1280] ss:$56 sps:$4 sm:$0xff]  }
 0x2b0   :  { %6915 = vmatpush1.bf16.msra.mxu0 %v9124_v43  ;;  %6752 = vmatprep.subr.bf16.mxu1 %v9129_v10  ;;  %v9207_v43 = vld [vmem:[#allocation6 + $0x12ec] ss:$56 sps:$4 sm:$0xff]  }
 0x2b1   :  { %6916 = vmatprep.subr.bf16.mxu0 %v9132_v19  ;;  %v9210_v10 = vld [vmem:[#allocation6 + $0x12f4] ss:$56 sps:$4 sm:$0xff]   ;;  %v9205_v19 = vld [vmem:[#allocation6 + $0x12e8] ss:$56 sps:$4 sm:$0xff]  }
 0x2b3   :  { %6753 = vmatpush1.bf16.msra.mxu1 %v9127_v2  ;;  %v9208_v2 = vld [vmem:[#allocation6 + $0x12f0] ss:$56 sps:$4 sm:$0xff]  }
 0x2b4   :  { %6917 = vmatpush1.bf16.msra.mxu0 %v9130_v3  ;;  %6754 = vmatprep.subr.bf16.mxu1 %v9135_v54  ;;  %v9213_v3 = vld [vmem:[#allocation6 + $0x135c] ss:$56 sps:$4 sm:$0xff]  }
 0x2b5   :  { %6918 = vmatprep.subr.bf16.mxu0 %v9138_v11  ;;  %v9216_v54 = vld [vmem:[#allocation6 + $0x1364] ss:$56 sps:$4 sm:$0xff]   ;;  %v9211_v11 = vld [vmem:[#allocation6 + $0x1358] ss:$56 sps:$4 sm:$0xff]  }
 0x2b7   :  { %6755 = vmatpush1.bf16.msra.mxu1 %v9133_v41  ;;  %v9214_v41 = vld [vmem:[#allocation6 + $0x1360] ss:$56 sps:$4 sm:$0xff]  }
 0x2b8   :  { %6919 = vmatpush1.bf16.msra.mxu0 %v9136_v33  ;;  %6765 = vmatprep.subr.bf16.mxu1 %v9141_v26  ;;  %v9219_v33 = vld [vmem:[#allocation6 + $0x13cc] ss:$56 sps:$4 sm:$0xff]  }
 0x2b9   :  { %6929 = vmatprep.subr.bf16.mxu0 %v9144_v57  ;;  %v9222_v26 = vld [vmem:[#allocation6 + $0x13d4] ss:$56 sps:$4 sm:$0xff]   ;;  %v9217_v57 = vld [vmem:[#allocation6 + $0x13c8] ss:$56 sps:$4 sm:$0xff]  }
 0x2ba   :  { %6757 = vmatmul.mubr.bf16.vlgmr.msra.gmra.mrb[8].mxu1 %v10516_v59 }
 0x2bb   :  { %6921 = vmatmul.mubr.bf16.vlgmr.msra.gmra.mrb[8].mxu0 %v10516_v59  ;;  %6766 = vmatpush1.bf16.msra.mxu1 %v9139_v13  ;;  %v9220_v13 = vld [vmem:[#allocation6 + $0x13d0] ss:$56 sps:$4 sm:$0xff]  }
 0x2bc   :  { %6797 = vmatprep.mubr.bf16.mxu1 %v10502_v39  ;;  %6930 = vmatpush1.bf16.msra.mxu0 %v9142_v29  ;;  %v9225_v29 = vld [vmem:[#allocation6 + $0x143c] ss:$56 sps:$4 sm:$0xff]  }
 0x2bd   :  { %6961 = vmatprep.mubr.bf16.mxu0 %v10502_v39  ;;  %6767 = vmatprep.subr.bf16.mxu1 %v9147_v40  ;;  %v9228_v40 = vld [vmem:[#allocation6 + $0x1444] ss:$56 sps:$4 sm:$0xff]  }
 0x2be   :  { %6931 = vmatprep.subr.bf16.mxu0 %v9150_v12  ;;  %v9223_v12 = vld [vmem:[#allocation6 + $0x1438] ss:$56 sps:$4 sm:$0xff]  }
 0x2bf   :  { %6768 = vmatpush1.bf16.msra.mxu1 %v9145_v28  ;;  %v9226_v28 = vld [vmem:[#allocation6 + $0x1440] ss:$56 sps:$4 sm:$0xff]  }
 0x2c0   :  { %6932 = vmatpush1.bf16.msra.mxu0 %v9148_v32  ;;  %6769 = vmatprep.subr.bf16.mxu1 %v9153_v38  ;;  %v9231_v32 = vld [vmem:[#allocation6 + $0x14ac] ss:$56 sps:$4 sm:$0xff]  }
 0x2c1   :  { %6933 = vmatprep.subr.bf16.mxu0 %v9156_v15  ;;  %v9234_v38 = vld [vmem:[#allocation6 + $0x14b4] ss:$56 sps:$4 sm:$0xff]   ;;  %v9229_v15 = vld [vmem:[#allocation6 + $0x14a8] ss:$56 sps:$4 sm:$0xff]  }
 0x2c3   :  { %6770 = vmatpush1.bf16.msra.mxu1 %v9151_v14  ;;  %v9232_v14 = vld [vmem:[#allocation6 + $0x14b0] ss:$56 sps:$4 sm:$0xff]  }
 0x2c4   :  { %6934 = vmatpush1.bf16.msra.mxu0 %v9154_v53  ;;  %6771 = vmatprep.subr.bf16.mxu1 %v9159_v20  ;;  %v9237_v53 = vld [vmem:[#allocation6 + $0x151c] ss:$56 sps:$4 sm:$0xff]  }
 0x2c5   :  { %6935 = vmatprep.subr.bf16.mxu0 %v9162_v62  ;;  %v9240_v20 = vld [vmem:[#allocation6 + $0x1524] ss:$56 sps:$4 sm:$0xff]   ;;  %v9235_v62 = vld [vmem:[#allocation6 + $0x1518] ss:$56 sps:$4 sm:$0xff]  }
 0x2c7   :  { %6772 = vmatpush1.bf16.msra.mxu1 %v9157_v63  ;;  %v9238_v63 = vld [vmem:[#allocation6 + $0x1520] ss:$56 sps:$4 sm:$0xff]  }
 0x2c8   :  { %6936 = vmatpush1.bf16.msra.mxu0 %v9160_v31  ;;  %6773 = vmatprep.subr.bf16.mxu1 %v9165_v30  ;;  %v9243_v31 = vld [vmem:[#allocation6 + $0x158c] ss:$56 sps:$4 sm:$0xff]  }
 0x2c9   :  { %6937 = vmatprep.subr.bf16.mxu0 %v9168_v0  ;;  %v9246_v30 = vld [vmem:[#allocation6 + $0x1594] ss:$56 sps:$4 sm:$0xff]   ;;  %v9241_v0 = vld [vmem:[#allocation6 + $0x1588] ss:$56 sps:$4 sm:$0xff]  }
 0x2cb   :  { %6774 = vmatpush1.bf16.msra.mxu1 %v9163_v23  ;;  %v9244_v23 = vld [vmem:[#allocation6 + $0x1590] ss:$56 sps:$4 sm:$0xff]  }
 0x2cc   :  { %6938 = vmatpush1.bf16.msra.mxu0 %v9166_v27  ;;  %6775 = vmatprep.subr.bf16.mxu1 %v9171_v48  ;;  %v9249_v27 = vld [vmem:[#allocation6 + $0x15fc] ss:$56 sps:$4 sm:$0xff]  }
 0x2cd   :  { %6939 = vmatprep.subr.bf16.mxu0 %v9174_v55  ;;  %v9252_v48 = vld [vmem:[#allocation6 + $0x1604] ss:$56 sps:$4 sm:$0xff]   ;;  %v9247_v55 = vld [vmem:[#allocation6 + $0x15f8] ss:$56 sps:$4 sm:$0xff]  }
 0x2cf   :  { %6776 = vmatpush1.bf16.msra.mxu1 %v9169_v22  ;;  %v9250_v22 = vld [vmem:[#allocation6 + $0x1600] ss:$56 sps:$4 sm:$0xff]  }
 0x2d0   :  { %6940 = vmatpush1.bf16.msra.mxu0 %v9172_v5  ;;  %6777 = vmatprep.subr.bf16.mxu1 %v9177_v35  ;;  %v9255_v5 = vld [vmem:[#allocation6 + $0x166c] ss:$56 sps:$4 sm:$0xff]  }
 0x2d1   :  { %6941 = vmatprep.subr.bf16.mxu0 %v9180_v18  ;;  %v9258_v35 = vld [vmem:[#allocation6 + $0x1674] ss:$56 sps:$4 sm:$0xff]   ;;  %v9253_v18 = vld [vmem:[#allocation6 + $0x1668] ss:$56 sps:$4 sm:$0xff]  }
 0x2d3   :  { %6778 = vmatpush1.bf16.msra.mxu1 %v9175_v37  ;;  %v9256_v37 = vld [vmem:[#allocation6 + $0x1670] ss:$56 sps:$4 sm:$0xff]  }
 0x2d4   :  { %6942 = vmatpush1.bf16.msra.mxu0 %v9178_v52  ;;  %6779 = vmatprep.subr.bf16.mxu1 %v9183_v21  ;;  %v9261_v52 = vld [vmem:[#allocation6 + $0x16dc] ss:$56 sps:$4 sm:$0xff]  }
 0x2d5   :  { %6943 = vmatprep.subr.bf16.mxu0 %v9186_v44  ;;  %v9264_v21 = vld [vmem:[#allocation6 + $0x16e4] ss:$56 sps:$4 sm:$0xff]   ;;  %v1651_v44 = vsub.s32 2, %v10538_v61 }
 0x2d7   :  { %6780 = vmatpush1.bf16.msra.mxu1 %v9181_v9  ;;  %v9259_v9 = vld [vmem:[#allocation6 + $0x16d8] ss:$56 sps:$4 sm:$0xff]  }
 0x2d8   :  { %6944 = vmatpush1.bf16.msra.mxu0 %v9184_v60  ;;  %6781 = vmatprep.subr.bf16.mxu1 %v9189_v45  ;;  %v1659_v60 = vsub.s32 4, %v10538_v61  ;;  %v1655_v45 = vsub.s32 3, %v10538_v61 }
 0x2d9   :  { %6945 = vmatprep.subr.bf16.mxu0 %v9192_v51  ;;  %v9262_v51 = vld [vmem:[#allocation6 + $0x16e0] ss:$56 sps:$4 sm:$0xff]  }
 0x2db   :  { %6782 = vmatpush1.bf16.msra.mxu1 %v9187_v56  ;;  %v1663_v56 = vsub.s32 5, %v10538_v61 }
 0x2dc   :  { %6946 = vmatpush1.bf16.msra.mxu0 %v9190_v46  ;;  %6783 = vmatprep.subr.bf16.mxu1 %v9195_v6  ;;  %v9267_v46 = vld [vmem:[#allocation6 + $0x174c] ss:$56 sps:$4 sm:$0xff]  }
 0x2dd   :  { %6947 = vmatprep.subr.bf16.mxu0 %v9198_v16  ;;  %v9270_v6 = vld [vmem:[#allocation6 + $0x1754] ss:$56 sps:$4 sm:$0xff]   ;;  %v9715_v16 = vld [vmem:[#allocation8] sm:$0xff] }
 0x2df   :  { %6784 = vmatpush1.bf16.msra.mxu1 %v9193_v4  ;;  %v1652_v4 = vrot.slane %v9715_v16, %v1651_v44 }
 0x2e0   :  { %6948 = vmatpush1.bf16.msra.mxu0 %v9196_v1  ;;  %6785 = vmatprep.subr.bf16.mxu1 %v9201_v34  ;;  %v1660_v1 = vrot.slane %v9715_v16, %v1659_v60  ;;  %v1656_v34 = vrot.slane %v9715_v16, %v1655_v45 }
 0x2e1   :  { %6949 = vmatprep.subr.bf16.mxu0 %v9204_v47  ;;  %v9265_v47 = vld [vmem:[#allocation6 + $0x1748] ss:$56 sps:$4 sm:$0xff]  }
 0x2e3   :  { %6786 = vmatpush1.bf16.msra.mxu1 %v9199_v50  ;;  %v1664_v50 = vrot.slane %v9715_v16, %v1663_v56  ;;  %v9313_v16 = vld [vmem:[#allocation6 + $0x1ac8] ss:$56 sps:$4 sm:$0xff]  }
 0x2e4   :  { %6950 = vmatpush1.bf16.msra.mxu0 %v9202_v58  ;;  %6787 = vmatprep.subr.bf16.mxu1 %v9207_v43  ;;  %v9268_v58 = vld [vmem:[#allocation6 + $0x1750] ss:$56 sps:$4 sm:$0xff]   ;;  %v9273_v43 = vld [vmem:[#allocation6 + $0x17bc] ss:$56 sps:$4 sm:$0xff]  }
 0x2e5   :  { %6951 = vmatprep.subr.bf16.mxu0 %v9210_v10 }
 0x2e7   :  { %6788 = vmatpush1.bf16.msra.mxu1 %v9205_v19  ;;  %v9276_v19 = vld [vmem:[#allocation6 + $0x17c4] ss:$56 sps:$4 sm:$0xff]  }
 0x2e8   :  { %6952 = vmatpush1.bf16.msra.mxu0 %v9208_v2  ;;  %6789 = vmatprep.subr.bf16.mxu1 %v9213_v3 }
 0x2e9   :  { %6953 = vmatprep.subr.bf16.mxu0 %v9216_v54 }
 0x2eb   :  { %6790 = vmatpush1.bf16.msra.mxu1 %v9211_v11 }
 0x2ec   :  { %6954 = vmatpush1.bf16.msra.mxu0 %v9214_v41  ;;  %6791 = vmatprep.subr.bf16.mxu1 %v9219_v33 }
 0x2ed   :  { %6955 = vmatprep.subr.bf16.mxu0 %v9222_v26 }
 0x2ef   :  { %6792 = vmatpush1.bf16.msra.mxu1 %v9217_v57  ;;  %v9271_v57 = vld [vmem:[#allocation6 + $0x17b8] ss:$56 sps:$4 sm:$0xff]  }
 0x2f0   :  { %6956 = vmatpush1.bf16.msra.mxu0 %v9220_v13  ;;  %6793 = vmatprep.subr.bf16.mxu1 %v9225_v29 }
 0x2f1   :  { %6957 = vmatprep.subr.bf16.mxu0 %v9228_v40 }
 0x2f3   :  { %6794 = vmatpush1.bf16.msra.mxu1 %v9223_v12  ;;  %v9274_v12 = vld [vmem:[#allocation6 + $0x17c0] ss:$56 sps:$4 sm:$0xff]  }
 0x2f4   :  { %6958 = vmatpush1.bf16.msra.mxu0 %v9226_v28  ;;  %6795 = vmatprep.subr.bf16.mxu1 %v9231_v32  ;;  %v9279_v28 = vld [vmem:[#allocation6 + $0x182c] ss:$56 sps:$4 sm:$0xff]  }
 0x2f5   :  { %6959 = vmatprep.subr.bf16.mxu0 %v9234_v38  ;;  %v9282_v38 = vld [vmem:[#allocation6 + $0x1834] ss:$56 sps:$4 sm:$0xff]  }
 0x2f7   :  { %6796 = vmatpush1.bf16.msra.mxu1 %v9229_v15  ;;  %v9277_v15 = vld [vmem:[#allocation6 + $0x1828] ss:$56 sps:$4 sm:$0xff]  }
 0x2f8   :  { %6960 = vmatpush1.bf16.msra.mxu0 %v9232_v14  ;;  %6806 = vmatprep.subr.bf16.mxu1 %v9237_v53  ;;  %v9280_v14 = vld [vmem:[#allocation6 + $0x1830] ss:$56 sps:$4 sm:$0xff]   ;;  %v9285_v53 = vld [vmem:[#allocation6 + $0x189c] ss:$56 sps:$4 sm:$0xff]  }
 0x2f9   :  { %6970 = vmatprep.subr.bf16.mxu0 %v9240_v20  ;;  %v9288_v20 = vld [vmem:[#allocation6 + $0x18a4] ss:$56 sps:$4 sm:$0xff]  }
 0x2fa   :  { %6798 = vmatmul.mubr.bf16.vlgmr.msra.gmra.mrb[8].mxu1 %v10500_v42 }
 0x2fb   :  { %6962 = vmatmul.mubr.bf16.vlgmr.msra.gmra.mrb[8].mxu0 %v10500_v42  ;;  %6807 = vmatpush1.bf16.msra.mxu1 %v9235_v62  ;;  %v9283_v62 = vld [vmem:[#allocation6 + $0x1898] ss:$56 sps:$4 sm:$0xff]  }
 0x2fc   :  { %6838 = vmatprep.mubr.bf16.mxu1 %v10509_v7  ;;  %6971 = vmatpush1.bf16.msra.mxu0 %v9238_v63  ;;  %v9286_v63 = vld [vmem:[#allocation6 + $0x18a0] ss:$56 sps:$4 sm:$0xff]  }
 0x2fd   :  { %7002 = vmatprep.mubr.bf16.mxu0 %v10509_v7  ;;  %6808 = vmatprep.subr.bf16.mxu1 %v9243_v31  ;;  %v9291_v31 = vld [vmem:[#allocation6 + $0x190c] ss:$56 sps:$4 sm:$0xff]  }
 0x2fe   :  { %6972 = vmatprep.subr.bf16.mxu0 %v9246_v30  ;;  %v9294_v30 = vld [vmem:[#allocation6 + $0x1914] ss:$56 sps:$4 sm:$0xff]  }
 0x2ff   :  { %6809 = vmatpush1.bf16.msra.mxu1 %v9241_v0  ;;  %v9289_v0 = vld [vmem:[#allocation6 + $0x1908] ss:$56 sps:$4 sm:$0xff]  }
 0x300   :  { %6973 = vmatpush1.bf16.msra.mxu0 %v9244_v23  ;;  %6810 = vmatprep.subr.bf16.mxu1 %v9249_v27  ;;  %v9292_v23 = vld [vmem:[#allocation6 + $0x1910] ss:$56 sps:$4 sm:$0xff]   ;;  %v9297_v27 = vld [vmem:[#allocation6 + $0x197c] ss:$56 sps:$4 sm:$0xff]  }
 0x301   :  { %6974 = vmatprep.subr.bf16.mxu0 %v9252_v48  ;;  %v9300_v48 = vld [vmem:[#allocation6 + $0x1984] ss:$56 sps:$4 sm:$0xff]  }
 0x303   :  { %6811 = vmatpush1.bf16.msra.mxu1 %v9247_v55  ;;  %v9295_v55 = vld [vmem:[#allocation6 + $0x1978] ss:$56 sps:$4 sm:$0xff]  }
 0x304   :  { %6975 = vmatpush1.bf16.msra.mxu0 %v9250_v22  ;;  %6812 = vmatprep.subr.bf16.mxu1 %v9255_v5  ;;  %v9298_v22 = vld [vmem:[#allocation6 + $0x1980] ss:$56 sps:$4 sm:$0xff]   ;;  %v9303_v5 = vld [vmem:[#allocation6 + $0x19ec] ss:$56 sps:$4 sm:$0xff]  }
 0x305   :  { %6976 = vmatprep.subr.bf16.mxu0 %v9258_v35  ;;  %v9306_v35 = vld [vmem:[#allocation6 + $0x19f4] ss:$56 sps:$4 sm:$0xff]  }
 0x307   :  { %6813 = vmatpush1.bf16.msra.mxu1 %v9253_v18  ;;  %v9301_v18 = vld [vmem:[#allocation6 + $0x19e8] ss:$56 sps:$4 sm:$0xff]  }
 0x308   :  { %6977 = vmatpush1.bf16.msra.mxu0 %v9256_v37  ;;  %6814 = vmatprep.subr.bf16.mxu1 %v9261_v52  ;;  %v9304_v37 = vld [vmem:[#allocation6 + $0x19f0] ss:$56 sps:$4 sm:$0xff]   ;;  %v9309_v52 = vld [vmem:[#allocation6 + $0x1a5c] ss:$56 sps:$4 sm:$0xff]  }
 0x309   :  { %6978 = vmatprep.subr.bf16.mxu0 %v9264_v21  ;;  %v9312_v21 = vld [vmem:[#allocation6 + $0x1a64] ss:$56 sps:$4 sm:$0xff]  }
 0x30b   :  { %6815 = vmatpush1.bf16.msra.mxu1 %v9259_v9  ;;  %v9307_v9 = vld [vmem:[#allocation6 + $0x1a58] ss:$56 sps:$4 sm:$0xff]  }
 0x30c   :  { %6979 = vmatpush1.bf16.msra.mxu0 %v9262_v51  ;;  %6816 = vmatprep.subr.bf16.mxu1 %v9267_v46  ;;  %v9310_v51 = vld [vmem:[#allocation6 + $0x1a60] ss:$56 sps:$4 sm:$0xff]   ;;  %v9315_v46 = vld [vmem:[#allocation6 + $0x1acc] ss:$56 sps:$4 sm:$0xff]  }
 0x30d   :  { %v6512_v10 = vpop.f32.mrb[4].mxu1  ;;  %6980 = vmatprep.subr.bf16.mxu0 %v9270_v6  ;;  %v9318_v6 = vld [vmem:[#allocation6 + $0x1ad4] ss:$56 sps:$4 sm:$0xff]  }
 0x30e   :  { %v8269_v2 = vadd.f32 %v6512_v10, %v1652_v4  ;;  %v6676_v3 = vpop.f32.mrb[4].mxu0  ;;  %v6514_v54 = vpop.f32.mrb[5].mxu1  ;;  %v9316_v4 = vld [vmem:[#allocation6 + $0x1ad0] ss:$56 sps:$4 sm:$0xff]  }
 0x30f   :  { %v8271_v11 = vadd.f32 %v6676_v3, %v1660_v1  ;;  %v8270_v41 = vadd.f32 %v6514_v54, %v1656_v34  ;;  %v6678_v33 = vpop.f32.mrb[5].mxu0  ;;  %v6516_v26 = vpop.f32.mrb[6].mxu1  ;;  %6817 = vmatpush1.bf16.msra.mxu1 %v9265_v47  ;;  %v9321_v1 = vld [vmem:[#allocation6 + $0x1b3c] ss:$56 sps:$4 sm:$0xff]   ;;  %v9319_v47 = vld [vmem:[#allocation6 + $0x1b38] ss:$56 sps:$4 sm:$0xff]  }
 0x310   :  { %7341 = vst [vmem:[#allocation9 + $0x10] sm:$0xff] %v8269_v2  ;;  %v8272_v13 = vadd.f32 %v6678_v33, %v1664_v50  ;;  %v6680_v29 = vpop.f32.mrb[6].mxu0  ;;  %6981 = vmatpush1.bf16.msra.mxu0 %v9268_v58  ;;  %v6517_v40 = vpop.f32.mrb[7].mxu1  ;;  %6818 = vmatprep.subr.bf16.mxu1 %v9273_v43  ;;  %v9324_v34 = vld [vmem:[#allocation6 + $0x1b44] ss:$56 sps:$4 sm:$0xff]  }
 0x311   :  { %7343 = vst [vmem:[#allocation9 + $0x20] sm:$0xff] %v8271_v11  ;;  %7342 = vst [vmem:[#allocation9 + $0x18] sm:$0xff] %v8270_v41  ;;  %v6681_v32 = vpop.f32.mrb[7].mxu0  ;;  %6982 = vmatprep.subr.bf16.mxu0 %v9276_v19  ;;  %v9322_v50 = vld [vmem:[#allocation6 + $0x1b40] ss:$56 sps:$4 sm:$0xff]  }
 0x312   :  { %7344 = vst [vmem:[#allocation9 + $0x28] sm:$0xff] %v8272_v13  ;;  %v9327_v58 = vld [vmem:[#allocation6 + $0x1bac] ss:$56 sps:$4 sm:$0xff]   ;;  %v9325_v10 = vld [vmem:[#allocation6 + $0x1ba8] ss:$56 sps:$4 sm:$0xff]  }
 0x313   :  { %6819 = vmatpush1.bf16.msra.mxu1 %v9271_v57  ;;  %v9330_v43 = vld [vmem:[#allocation6 + $0x1bb4] ss:$56 sps:$4 sm:$0xff]   ;;  %v9328_v19 = vld [vmem:[#allocation6 + $0x1bb0] ss:$56 sps:$4 sm:$0xff]   ;;  %v9342_v33 = vld [vmem:[#allocation6 + $0xa4] ss:$56 sps:$4 sm:$0xff]  }
 0x314   :  { %6983 = vmatpush1.bf16.msra.mxu0 %v9274_v12  ;;  %6820 = vmatprep.subr.bf16.mxu1 %v9279_v28  ;;  %v9333_v2 = vld [vmem:[#allocation6 + $0x2c] ss:$56 sps:$4 sm:$0xff]   ;;  %v9331_v54 = vld [vmem:[#allocation6 + $0x28] ss:$56 sps:$4 sm:$0xff]   ;;  %v9339_v41 = vld [vmem:[#allocation6 + $0x9c] ss:$56 sps:$4 sm:$0xff]  }
 0x315   :  { %6984 = vmatprep.subr.bf16.mxu0 %v9282_v38  ;;  %v9336_v3 = vld [vmem:[#allocation6 + $0x34] ss:$56 sps:$4 sm:$0xff]   ;;  %v9334_v11 = vld [vmem:[#allocation6 + $0x30] ss:$56 sps:$4 sm:$0xff]   ;;  %v9340_v57 = vld [vmem:[#allocation6 + $0xa0] ss:$56 sps:$4 sm:$0xff]  }
 0x316   :  { %v9337_v26 = vld [vmem:[#allocation6 + $0x98] ss:$56 sps:$4 sm:$0xff]   ;;  %v9345_v13 = vld [vmem:[#allocation6 + $0x10c] ss:$56 sps:$4 sm:$0xff]   ;;  %v9343_v40 = vld [vmem:[#allocation6 + $0x108] ss:$56 sps:$4 sm:$0xff]  }
 0x317   :  { %6821 = vmatpush1.bf16.msra.mxu1 %v9277_v15  ;;  %v9348_v29 = vld [vmem:[#allocation6 + $0x114] ss:$56 sps:$4 sm:$0xff]   ;;  %v9346_v12 = vld [vmem:[#allocation6 + $0x110] ss:$56 sps:$4 sm:$0xff]   ;;  %v9354_v32 = vld [vmem:[#allocation6 + $0x184] ss:$56 sps:$4 sm:$0xff]  }
 0x318   :  { %6985 = vmatpush1.bf16.msra.mxu0 %v9280_v14  ;;  %6822 = vmatprep.subr.bf16.mxu1 %v9285_v53  ;;  %v9351_v28 = vld [vmem:[#allocation6 + $0x17c] ss:$56 sps:$4 sm:$0xff]   ;;  %v9349_v38 = vld [vmem:[#allocation6 + $0x178] ss:$56 sps:$4 sm:$0xff]   ;;  %v9357_v14 = vld [vmem:[#allocation6 + $0x1ec] ss:$56 sps:$4 sm:$0xff]  }
 0x319   :  { %6986 = vmatprep.subr.bf16.mxu0 %v9288_v20  ;;  %v9352_v15 = vld [vmem:[#allocation6 + $0x180] ss:$56 sps:$4 sm:$0xff]   ;;  %v9360_v53 = vld [vmem:[#allocation6 + $0x1f4] ss:$56 sps:$4 sm:$0xff]   ;;  %v9358_v20 = vld [vmem:[#allocation6 + $0x1f0] ss:$56 sps:$4 sm:$0xff]  }
 0x31b   :  { %6823 = vmatpush1.bf16.msra.mxu1 %v9283_v62  ;;  %v9363_v62 = vld [vmem:[#allocation6 + $0x25c] ss:$56 sps:$4 sm:$0xff]  }
 0x31c   :  { %6987 = vmatpush1.bf16.msra.mxu0 %v9286_v63  ;;  %6824 = vmatprep.subr.bf16.mxu1 %v9291_v31  ;;  %v9366_v63 = vld [vmem:[#allocation6 + $0x264] ss:$56 sps:$4 sm:$0xff]   ;;  %v9361_v31 = vld [vmem:[#allocation6 + $0x258] ss:$56 sps:$4 sm:$0xff]  }
 0x31d   :  { %6988 = vmatprep.subr.bf16.mxu0 %v9294_v30  ;;  %v9364_v30 = vld [vmem:[#allocation6 + $0x260] ss:$56 sps:$4 sm:$0xff]  }
 0x31f   :  { %6825 = vmatpush1.bf16.msra.mxu1 %v9289_v0  ;;  %v9369_v0 = vld [vmem:[#allocation6 + $0x2cc] ss:$56 sps:$4 sm:$0xff]  }
 0x320   :  { %6989 = vmatpush1.bf16.msra.mxu0 %v9292_v23  ;;  %6826 = vmatprep.subr.bf16.mxu1 %v9297_v27  ;;  %v9372_v23 = vld [vmem:[#allocation6 + $0x2d4] ss:$56 sps:$4 sm:$0xff]   ;;  %v9367_v27 = vld [vmem:[#allocation6 + $0x2c8] ss:$56 sps:$4 sm:$0xff]  }
 0x321   :  { %6990 = vmatprep.subr.bf16.mxu0 %v9300_v48  ;;  %v9370_v48 = vld [vmem:[#allocation6 + $0x2d0] ss:$56 sps:$4 sm:$0xff]  }
 0x323   :  { %6827 = vmatpush1.bf16.msra.mxu1 %v9295_v55  ;;  %v9375_v55 = vld [vmem:[#allocation6 + $0x33c] ss:$56 sps:$4 sm:$0xff]  }
 0x324   :  { %6991 = vmatpush1.bf16.msra.mxu0 %v9298_v22  ;;  %6828 = vmatprep.subr.bf16.mxu1 %v9303_v5  ;;  %v9378_v22 = vld [vmem:[#allocation6 + $0x344] ss:$56 sps:$4 sm:$0xff]   ;;  %v9373_v5 = vld [vmem:[#allocation6 + $0x338] ss:$56 sps:$4 sm:$0xff]  }
 0x325   :  { %6992 = vmatprep.subr.bf16.mxu0 %v9306_v35  ;;  %v9376_v35 = vld [vmem:[#allocation6 + $0x340] ss:$56 sps:$4 sm:$0xff]  }
 0x327   :  { %6829 = vmatpush1.bf16.msra.mxu1 %v9301_v18  ;;  %v9381_v18 = vld [vmem:[#allocation6 + $0x3ac] ss:$56 sps:$4 sm:$0xff]  }
 0x328   :  { %6993 = vmatpush1.bf16.msra.mxu0 %v9304_v37  ;;  %6830 = vmatprep.subr.bf16.mxu1 %v9309_v52  ;;  %v9384_v37 = vld [vmem:[#allocation6 + $0x3b4] ss:$56 sps:$4 sm:$0xff]   ;;  %v9379_v52 = vld [vmem:[#allocation6 + $0x3a8] ss:$56 sps:$4 sm:$0xff]  }
 0x329   :  { %6994 = vmatprep.subr.bf16.mxu0 %v9312_v21  ;;  %v9382_v21 = vld [vmem:[#allocation6 + $0x3b0] ss:$56 sps:$4 sm:$0xff]  }
 0x32b   :  { %6831 = vmatpush1.bf16.msra.mxu1 %v9307_v9  ;;  %v9387_v9 = vld [vmem:[#allocation6 + $0x41c] ss:$56 sps:$4 sm:$0xff]  }
 0x32c   :  { %6995 = vmatpush1.bf16.msra.mxu0 %v9310_v51  ;;  %6832 = vmatprep.subr.bf16.mxu1 %v9315_v46  ;;  %v9390_v51 = vld [vmem:[#allocation6 + $0x424] ss:$56 sps:$4 sm:$0xff]   ;;  %v9385_v46 = vld [vmem:[#allocation6 + $0x418] ss:$56 sps:$4 sm:$0xff]  }
 0x32d   :  { %6996 = vmatprep.subr.bf16.mxu0 %v9318_v6  ;;  %v9388_v6 = vld [vmem:[#allocation6 + $0x420] ss:$56 sps:$4 sm:$0xff]  }
 0x32f   :  { %6833 = vmatpush1.bf16.msra.mxu1 %v9313_v16  ;;  %v9393_v16 = vld [vmem:[#allocation6 + $0x48c] ss:$56 sps:$4 sm:$0xff]  }
 0x330   :  { %6997 = vmatpush1.bf16.msra.mxu0 %v9316_v4  ;;  %6834 = vmatprep.subr.bf16.mxu1 %v9321_v1  ;;  %v9396_v4 = vld [vmem:[#allocation6 + $0x494] ss:$56 sps:$4 sm:$0xff]   ;;  %v9391_v1 = vld [vmem:[#allocation6 + $0x488] ss:$56 sps:$4 sm:$0xff]  }
 0x331   :  { %6998 = vmatprep.subr.bf16.mxu0 %v9324_v34  ;;  %v9394_v34 = vld [vmem:[#allocation6 + $0x490] ss:$56 sps:$4 sm:$0xff]  }
 0x333   :  { %6835 = vmatpush1.bf16.msra.mxu1 %v9319_v47  ;;  %v9399_v47 = vld [vmem:[#allocation6 + $0x4fc] ss:$56 sps:$4 sm:$0xff]  }
 0x334   :  { %6999 = vmatpush1.bf16.msra.mxu0 %v9322_v50  ;;  %6836 = vmatprep.subr.bf16.mxu1 %v9327_v58  ;;  %v9402_v50 = vld [vmem:[#allocation6 + $0x504] ss:$56 sps:$4 sm:$0xff]   ;;  %v9397_v58 = vld [vmem:[#allocation6 + $0x4f8] ss:$56 sps:$4 sm:$0xff]  }
 0x335   :  { %7000 = vmatprep.subr.bf16.mxu0 %v9330_v43  ;;  %v9400_v43 = vld [vmem:[#allocation6 + $0x500] ss:$56 sps:$4 sm:$0xff]  }
 0x337   :  { %6837 = vmatpush1.bf16.msra.mxu1 %v9325_v10  ;;  %v9405_v10 = vld [vmem:[#allocation6 + $0x56c] ss:$56 sps:$4 sm:$0xff]  }
 0x338   :  { %7001 = vmatpush1.bf16.msra.mxu0 %v9328_v19  ;;  %7011 = vmatprep.subr.bf16.mxu1 %v9333_v2  ;;  %v9408_v19 = vld [vmem:[#allocation6 + $0x574] ss:$56 sps:$4 sm:$0xff]   ;;  %v9403_v2 = vld [vmem:[#allocation6 + $0x568] ss:$56 sps:$4 sm:$0xff]  }
 0x339   :  { %7175 = vmatprep.subr.bf16.mxu0 %v9336_v3  ;;  %v9406_v3 = vld [vmem:[#allocation6 + $0x570] ss:$56 sps:$4 sm:$0xff]  }
 0x33a   :  { %6839 = vmatmul.mubr.bf16.vlgmr.msra.gmra.mrb[8].mxu1 %v10520_v17 }
 0x33b   :  { %7003 = vmatmul.mubr.bf16.vlgmr.msra.gmra.mrb[8].mxu0 %v10520_v17  ;;  %7012 = vmatpush1.bf16.msra.mxu1 %v9331_v54  ;;  %v9411_v54 = vld [vmem:[#allocation6 + $0x5dc] ss:$56 sps:$4 sm:$0xff]  }
 0x33c   :  { %7043 = vmatprep.mubr.bf16.mxu1 %v10498_v24  ;;  %7176 = vmatpush1.bf16.msra.mxu0 %v9334_v11  ;;  %v9414_v11 = vld [vmem:[#allocation6 + $0x5e4] ss:$56 sps:$4 sm:$0xff]  }
 0x33d   :  { %7207 = vmatprep.mubr.bf16.mxu0 %v10498_v24  ;;  %7013 = vmatprep.subr.bf16.mxu1 %v9339_v41  ;;  %v9355_v24 = vld [vmem:[#allocation6 + $0x1e8] ss:$56 sps:$4 sm:$0xff]   ;;  %v9409_v41 = vld [vmem:[#allocation6 + $0x5d8] ss:$56 sps:$4 sm:$0xff]  }
 0x33e   :  { %7177 = vmatprep.subr.bf16.mxu0 %v9342_v33  ;;  %v9412_v33 = vld [vmem:[#allocation6 + $0x5e0] ss:$56 sps:$4 sm:$0xff]  }
 0x33f   :  { %7014 = vmatpush1.bf16.msra.mxu1 %v9337_v26  ;;  %v9417_v26 = vld [vmem:[#allocation6 + $0x64c] ss:$56 sps:$4 sm:$0xff]  }
 0x340   :  { %7178 = vmatpush1.bf16.msra.mxu0 %v9340_v57  ;;  %7015 = vmatprep.subr.bf16.mxu1 %v9345_v13  ;;  %v9420_v57 = vld [vmem:[#allocation6 + $0x654] ss:$56 sps:$4 sm:$0xff]   ;;  %v9415_v13 = vld [vmem:[#allocation6 + $0x648] ss:$56 sps:$4 sm:$0xff]  }
 0x341   :  { %7179 = vmatprep.subr.bf16.mxu0 %v9348_v29  ;;  %v9418_v29 = vld [vmem:[#allocation6 + $0x650] ss:$56 sps:$4 sm:$0xff]  }
 0x343   :  { %7016 = vmatpush1.bf16.msra.mxu1 %v9343_v40  ;;  %v9423_v40 = vld [vmem:[#allocation6 + $0x6bc] ss:$56 sps:$4 sm:$0xff]  }
 0x344   :  { %7180 = vmatpush1.bf16.msra.mxu0 %v9346_v12  ;;  %7017 = vmatprep.subr.bf16.mxu1 %v9351_v28  ;;  %v9426_v12 = vld [vmem:[#allocation6 + $0x6c4] ss:$56 sps:$4 sm:$0xff]   ;;  %v9421_v28 = vld [vmem:[#allocation6 + $0x6b8] ss:$56 sps:$4 sm:$0xff]  }
 0x345   :  { %7181 = vmatprep.subr.bf16.mxu0 %v9354_v32  ;;  %v9424_v32 = vld [vmem:[#allocation6 + $0x6c0] ss:$56 sps:$4 sm:$0xff]  }
 0x347   :  { %7018 = vmatpush1.bf16.msra.mxu1 %v9349_v38  ;;  %v9429_v38 = vld [vmem:[#allocation6 + $0x72c] ss:$56 sps:$4 sm:$0xff]  }
 0x348   :  { %7182 = vmatpush1.bf16.msra.mxu0 %v9352_v15  ;;  %7019 = vmatprep.subr.bf16.mxu1 %v9357_v14  ;;  %v9432_v15 = vld [vmem:[#allocation6 + $0x734] ss:$56 sps:$4 sm:$0xff]   ;;  %v9427_v14 = vld [vmem:[#allocation6 + $0x728] ss:$56 sps:$4 sm:$0xff]  }
 0x349   :  { %7183 = vmatprep.subr.bf16.mxu0 %v9360_v53  ;;  %v9430_v53 = vld [vmem:[#allocation6 + $0x730] ss:$56 sps:$4 sm:$0xff]  }
 0x34b   :  { %7020 = vmatpush1.bf16.msra.mxu1 %v9355_v24  ;;  %v9435_v24 = vld [vmem:[#allocation6 + $0x79c] ss:$56 sps:$4 sm:$0xff]  }
 0x34c   :  { %7184 = vmatpush1.bf16.msra.mxu0 %v9358_v20  ;;  %7021 = vmatprep.subr.bf16.mxu1 %v9363_v62  ;;  %v9438_v20 = vld [vmem:[#allocation6 + $0x7a4] ss:$56 sps:$4 sm:$0xff]   ;;  %v9433_v62 = vld [vmem:[#allocation6 + $0x798] ss:$56 sps:$4 sm:$0xff]  }
 0x34d   :  { %7185 = vmatprep.subr.bf16.mxu0 %v9366_v63  ;;  %v9436_v63 = vld [vmem:[#allocation6 + $0x7a0] ss:$56 sps:$4 sm:$0xff]  }
 0x34f   :  { %7022 = vmatpush1.bf16.msra.mxu1 %v9361_v31  ;;  %v9441_v31 = vld [vmem:[#allocation6 + $0x80c] ss:$56 sps:$4 sm:$0xff]  }
 0x350   :  { %7186 = vmatpush1.bf16.msra.mxu0 %v9364_v30  ;;  %7023 = vmatprep.subr.bf16.mxu1 %v9369_v0  ;;  %v9444_v30 = vld [vmem:[#allocation6 + $0x814] ss:$56 sps:$4 sm:$0xff]   ;;  %v9439_v0 = vld [vmem:[#allocation6 + $0x808] ss:$56 sps:$4 sm:$0xff]  }
 0x351   :  { %7187 = vmatprep.subr.bf16.mxu0 %v9372_v23  ;;  %v9442_v23 = vld [vmem:[#allocation6 + $0x810] ss:$56 sps:$4 sm:$0xff]  }
 0x353   :  { %7024 = vmatpush1.bf16.msra.mxu1 %v9367_v27  ;;  %v9447_v27 = vld [vmem:[#allocation6 + $0x87c] ss:$56 sps:$4 sm:$0xff]  }
 0x354   :  { %7188 = vmatpush1.bf16.msra.mxu0 %v9370_v48  ;;  %7025 = vmatprep.subr.bf16.mxu1 %v9375_v55  ;;  %v9445_v48 = vld [vmem:[#allocation6 + $0x878] ss:$56 sps:$4 sm:$0xff]  }
 0x355   :  { %7189 = vmatprep.subr.bf16.mxu0 %v9378_v22  ;;  %v9448_v55 = vld [vmem:[#allocation6 + $0x880] ss:$56 sps:$4 sm:$0xff]   ;;  %v9453_v22 = vld [vmem:[#allocation6 + $0x8ec] ss:$56 sps:$4 sm:$0xff]  }
 0x357   :  { %7026 = vmatpush1.bf16.msra.mxu1 %v9373_v5  ;;  %v9456_v5 = vld [vmem:[#allocation6 + $0x8f4] ss:$56 sps:$4 sm:$0xff]  }
 0x358   :  { %7190 = vmatpush1.bf16.msra.mxu0 %v9376_v35  ;;  %7027 = vmatprep.subr.bf16.mxu1 %v9381_v18  ;;  %v9454_v35 = vld [vmem:[#allocation6 + $0x8f0] ss:$56 sps:$4 sm:$0xff]   ;;  %v9459_v18 = vld [vmem:[#allocation6 + $0x95c] ss:$56 sps:$4 sm:$0xff]  }
 0x359   :  { %7191 = vmatprep.subr.bf16.mxu0 %v9384_v37  ;;  %v9462_v37 = vld [vmem:[#allocation6 + $0x964] ss:$56 sps:$4 sm:$0xff]  }
 0x35b   :  { %7028 = vmatpush1.bf16.msra.mxu1 %v9379_v52  ;;  %v9457_v52 = vld [vmem:[#allocation6 + $0x958] ss:$56 sps:$4 sm:$0xff]  }
 0x35c   :  { %7192 = vmatpush1.bf16.msra.mxu0 %v9382_v21  ;;  %7029 = vmatprep.subr.bf16.mxu1 %v9387_v9  ;;  %v9460_v21 = vld [vmem:[#allocation6 + $0x960] ss:$56 sps:$4 sm:$0xff]   ;;  %v9465_v9 = vld [vmem:[#allocation6 + $0x9cc] ss:$56 sps:$4 sm:$0xff]  }
 0x35d   :  { %7193 = vmatprep.subr.bf16.mxu0 %v9390_v51  ;;  %v9468_v51 = vld [vmem:[#allocation6 + $0x9d4] ss:$56 sps:$4 sm:$0xff]  }
 0x35f   :  { %7030 = vmatpush1.bf16.msra.mxu1 %v9385_v46  ;;  %v9463_v46 = vld [vmem:[#allocation6 + $0x9c8] ss:$56 sps:$4 sm:$0xff]  }
 0x360   :  { %7194 = vmatpush1.bf16.msra.mxu0 %v9388_v6  ;;  %7031 = vmatprep.subr.bf16.mxu1 %v9393_v16  ;;  %v9466_v6 = vld [vmem:[#allocation6 + $0x9d0] ss:$56 sps:$4 sm:$0xff]   ;;  %v9471_v16 = vld [vmem:[#allocation6 + $0xa3c] ss:$56 sps:$4 sm:$0xff]  }
 0x361   :  { %7195 = vmatprep.subr.bf16.mxu0 %v9396_v4  ;;  %v9474_v4 = vld [vmem:[#allocation6 + $0xa44] ss:$56 sps:$4 sm:$0xff]  }
 0x363   :  { %7032 = vmatpush1.bf16.msra.mxu1 %v9391_v1  ;;  %v9469_v1 = vld [vmem:[#allocation6 + $0xa38] ss:$56 sps:$4 sm:$0xff]  }
 0x364   :  { %7196 = vmatpush1.bf16.msra.mxu0 %v9394_v34  ;;  %7033 = vmatprep.subr.bf16.mxu1 %v9399_v47  ;;  %v9472_v34 = vld [vmem:[#allocation6 + $0xa40] ss:$56 sps:$4 sm:$0xff]   ;;  %v9477_v47 = vld [vmem:[#allocation6 + $0xaac] ss:$56 sps:$4 sm:$0xff]  }
 0x365   :  { %7197 = vmatprep.subr.bf16.mxu0 %v9402_v50  ;;  %v9480_v50 = vld [vmem:[#allocation6 + $0xab4] ss:$56 sps:$4 sm:$0xff]  }
 0x367   :  { %7034 = vmatpush1.bf16.msra.mxu1 %v9397_v58  ;;  %v9475_v58 = vld [vmem:[#allocation6 + $0xaa8] ss:$56 sps:$4 sm:$0xff]  }
 0x368   :  { %7198 = vmatpush1.bf16.msra.mxu0 %v9400_v43  ;;  %7035 = vmatprep.subr.bf16.mxu1 %v9405_v10  ;;  %v9478_v43 = vld [vmem:[#allocation6 + $0xab0] ss:$56 sps:$4 sm:$0xff]   ;;  %v9483_v10 = vld [vmem:[#allocation6 + $0xb1c] ss:$56 sps:$4 sm:$0xff]  }
 0x369   :  { %7199 = vmatprep.subr.bf16.mxu0 %v9408_v19  ;;  %v9486_v19 = vld [vmem:[#allocation6 + $0xb24] ss:$56 sps:$4 sm:$0xff]  }
 0x36b   :  { %7036 = vmatpush1.bf16.msra.mxu1 %v9403_v2  ;;  %v9481_v2 = vld [vmem:[#allocation6 + $0xb18] ss:$56 sps:$4 sm:$0xff]  }
 0x36c   :  { %7200 = vmatpush1.bf16.msra.mxu0 %v9406_v3  ;;  %7037 = vmatprep.subr.bf16.mxu1 %v9411_v54  ;;  %v9484_v3 = vld [vmem:[#allocation6 + $0xb20] ss:$56 sps:$4 sm:$0xff]   ;;  %v9489_v54 = vld [vmem:[#allocation6 + $0xb8c] ss:$56 sps:$4 sm:$0xff]  }
 0x36d   :  { %7201 = vmatprep.subr.bf16.mxu0 %v9414_v11  ;;  %v9492_v11 = vld [vmem:[#allocation6 + $0xb94] ss:$56 sps:$4 sm:$0xff]  }
 0x36f   :  { %7038 = vmatpush1.bf16.msra.mxu1 %v9409_v41  ;;  %v9487_v41 = vld [vmem:[#allocation6 + $0xb88] ss:$56 sps:$4 sm:$0xff]  }
 0x370   :  { %7202 = vmatpush1.bf16.msra.mxu0 %v9412_v33  ;;  %7039 = vmatprep.subr.bf16.mxu1 %v9417_v26  ;;  %v9490_v33 = vld [vmem:[#allocation6 + $0xb90] ss:$56 sps:$4 sm:$0xff]   ;;  %v9495_v26 = vld [vmem:[#allocation6 + $0xbfc] ss:$56 sps:$4 sm:$0xff]  }
 0x371   :  { %7203 = vmatprep.subr.bf16.mxu0 %v9420_v57  ;;  %v9498_v57 = vld [vmem:[#allocation6 + $0xc04] ss:$56 sps:$4 sm:$0xff]  }
 0x373   :  { %7040 = vmatpush1.bf16.msra.mxu1 %v9415_v13  ;;  %v9493_v13 = vld [vmem:[#allocation6 + $0xbf8] ss:$56 sps:$4 sm:$0xff]  }
 0x374   :  { %7204 = vmatpush1.bf16.msra.mxu0 %v9418_v29  ;;  %7041 = vmatprep.subr.bf16.mxu1 %v9423_v40  ;;  %v9496_v29 = vld [vmem:[#allocation6 + $0xc00] ss:$56 sps:$4 sm:$0xff]   ;;  %v9501_v40 = vld [vmem:[#allocation6 + $0xc6c] ss:$56 sps:$4 sm:$0xff]  }
 0x375   :  { %7205 = vmatprep.subr.bf16.mxu0 %v9426_v12  ;;  %v9504_v12 = vld [vmem:[#allocation6 + $0xc74] ss:$56 sps:$4 sm:$0xff]  }
 0x377   :  { %7042 = vmatpush1.bf16.msra.mxu1 %v9421_v28  ;;  %v9499_v28 = vld [vmem:[#allocation6 + $0xc68] ss:$56 sps:$4 sm:$0xff]  }
 0x378   :  { %7206 = vmatpush1.bf16.msra.mxu0 %v9424_v32  ;;  %7052 = vmatprep.subr.bf16.mxu1 %v9429_v38  ;;  %v9502_v32 = vld [vmem:[#allocation6 + $0xc70] ss:$56 sps:$4 sm:$0xff]   ;;  %v9507_v38 = vld [vmem:[#allocation6 + $0xcdc] ss:$56 sps:$4 sm:$0xff]  }
 0x379   :  { %7216 = vmatprep.subr.bf16.mxu0 %v9432_v15  ;;  %v9510_v15 = vld [vmem:[#allocation6 + $0xce4] ss:$56 sps:$4 sm:$0xff]  }
 0x37a   :  { %7044 = vmatmul.mubr.bf16.vlgmr.msra.gmra.mrb[12].mxu1 %v10496_v25 }
 0x37b   :  { %7208 = vmatmul.mubr.bf16.vlgmr.msra.gmra.mrb[12].mxu0 %v10496_v25  ;;  %7053 = vmatpush1.bf16.msra.mxu1 %v9427_v14  ;;  %v9450_v25 = vld [vmem:[#allocation6 + $0x884] ss:$56 sps:$4 sm:$0xff]   ;;  %v9505_v14 = vld [vmem:[#allocation6 + $0xcd8] ss:$56 sps:$4 sm:$0xff]  }
 0x37c   :  { %7084 = vmatprep.mubr.bf16.mxu1 %v10505_v49  ;;  %7217 = vmatpush1.bf16.msra.mxu0 %v9430_v53  ;;  %v9508_v53 = vld [vmem:[#allocation6 + $0xce0] ss:$56 sps:$4 sm:$0xff]  }
 0x37d   :  { %7248 = vmatprep.mubr.bf16.mxu0 %v10505_v49  ;;  %7054 = vmatprep.subr.bf16.mxu1 %v9435_v24  ;;  %v9451_v49 = vld [vmem:[#allocation6 + $0x8e8] ss:$56 sps:$4 sm:$0xff]   ;;  %v9513_v24 = vld [vmem:[#allocation6 + $0xd4c] ss:$56 sps:$4 sm:$0xff]  }
 0x37e   :  { %7218 = vmatprep.subr.bf16.mxu0 %v9438_v20  ;;  %v9516_v20 = vld [vmem:[#allocation6 + $0xd54] ss:$56 sps:$4 sm:$0xff]  }
 0x37f   :  { %7055 = vmatpush1.bf16.msra.mxu1 %v9433_v62  ;;  %v9511_v62 = vld [vmem:[#allocation6 + $0xd48] ss:$56 sps:$4 sm:$0xff]  }
 0x380   :  { %7219 = vmatpush1.bf16.msra.mxu0 %v9436_v63  ;;  %7056 = vmatprep.subr.bf16.mxu1 %v9441_v31  ;;  %v9514_v63 = vld [vmem:[#allocation6 + $0xd50] ss:$56 sps:$4 sm:$0xff]   ;;  %v9519_v31 = vld [vmem:[#allocation6 + $0xdbc] ss:$56 sps:$4 sm:$0xff]  }
 0x381   :  { %7220 = vmatprep.subr.bf16.mxu0 %v9444_v30  ;;  %v9522_v30 = vld [vmem:[#allocation6 + $0xdc4] ss:$56 sps:$4 sm:$0xff]  }
 0x383   :  { %7057 = vmatpush1.bf16.msra.mxu1 %v9439_v0  ;;  %v9517_v0 = vld [vmem:[#allocation6 + $0xdb8] ss:$56 sps:$4 sm:$0xff]  }
 0x384   :  { %7221 = vmatpush1.bf16.msra.mxu0 %v9442_v23  ;;  %7058 = vmatprep.subr.bf16.mxu1 %v9447_v27  ;;  %v9520_v23 = vld [vmem:[#allocation6 + $0xdc0] ss:$56 sps:$4 sm:$0xff]   ;;  %v9525_v27 = vld [vmem:[#allocation6 + $0xe2c] ss:$56 sps:$4 sm:$0xff]  }
 0x385   :  { %7222 = vmatprep.subr.bf16.mxu0 %v9450_v25  ;;  %v9528_v25 = vld [vmem:[#allocation6 + $0xe34] ss:$56 sps:$4 sm:$0xff]  }
 0x387   :  { %7059 = vmatpush1.bf16.msra.mxu1 %v9445_v48  ;;  %v9523_v48 = vld [vmem:[#allocation6 + $0xe28] ss:$56 sps:$4 sm:$0xff]  }
 0x388   :  { %7223 = vmatpush1.bf16.msra.mxu0 %v9448_v55  ;;  %7060 = vmatprep.subr.bf16.mxu1 %v9453_v22  ;;  %v9526_v55 = vld [vmem:[#allocation6 + $0xe30] ss:$56 sps:$4 sm:$0xff]   ;;  %v9531_v22 = vld [vmem:[#allocation6 + $0xe9c] ss:$56 sps:$4 sm:$0xff]  }
 0x389   :  { %7224 = vmatprep.subr.bf16.mxu0 %v9456_v5  ;;  %v9534_v5 = vld [vmem:[#allocation6 + $0xea4] ss:$56 sps:$4 sm:$0xff]  }
 0x38b   :  { %7061 = vmatpush1.bf16.msra.mxu1 %v9451_v49  ;;  %v9529_v49 = vld [vmem:[#allocation6 + $0xe98] ss:$56 sps:$4 sm:$0xff]  }
 0x38c   :  { %7225 = vmatpush1.bf16.msra.mxu0 %v9454_v35  ;;  %7062 = vmatprep.subr.bf16.mxu1 %v9459_v18  ;;  %v9532_v35 = vld [vmem:[#allocation6 + $0xea0] ss:$56 sps:$4 sm:$0xff]   ;;  %v9537_v18 = vld [vmem:[#allocation6 + $0xf0c] ss:$56 sps:$4 sm:$0xff]  }
 0x38d   :  { %7226 = vmatprep.subr.bf16.mxu0 %v9462_v37  ;;  %v9540_v37 = vld [vmem:[#allocation6 + $0xf14] ss:$56 sps:$4 sm:$0xff]  }
 0x38f   :  { %7063 = vmatpush1.bf16.msra.mxu1 %v9457_v52  ;;  %v9535_v52 = vld [vmem:[#allocation6 + $0xf08] ss:$56 sps:$4 sm:$0xff]  }
 0x390   :  { %7227 = vmatpush1.bf16.msra.mxu0 %v9460_v21  ;;  %7064 = vmatprep.subr.bf16.mxu1 %v9465_v9  ;;  %v9538_v21 = vld [vmem:[#allocation6 + $0xf10] ss:$56 sps:$4 sm:$0xff]   ;;  %v9543_v9 = vld [vmem:[#allocation6 + $0xf7c] ss:$56 sps:$4 sm:$0xff]  }
 0x391   :  { %7228 = vmatprep.subr.bf16.mxu0 %v9468_v51  ;;  %v9541_v51 = vld [vmem:[#allocation6 + $0xf78] ss:$56 sps:$4 sm:$0xff]  }
 0x393   :  { %7065 = vmatpush1.bf16.msra.mxu1 %v9463_v46  ;;  %v9544_v46 = vld [vmem:[#allocation6 + $0xf80] ss:$56 sps:$4 sm:$0xff]  }
 0x394   :  { %7229 = vmatpush1.bf16.msra.mxu0 %v9466_v6  ;;  %7066 = vmatprep.subr.bf16.mxu1 %v9471_v16  ;;  %v9549_v6 = vld [vmem:[#allocation6 + $0xfec] ss:$56 sps:$4 sm:$0xff]  }
 0x395   :  { %7230 = vmatprep.subr.bf16.mxu0 %v9474_v4  ;;  %v9552_v16 = vld [vmem:[#allocation6 + $0xff4] ss:$56 sps:$4 sm:$0xff]   ;;  %v9550_v4 = vld [vmem:[#allocation6 + $0xff0] ss:$56 sps:$4 sm:$0xff]  }
 0x397   :  { %7067 = vmatpush1.bf16.msra.mxu1 %v9469_v1  ;;  %v9555_v1 = vld [vmem:[#allocation6 + $0x105c] ss:$56 sps:$4 sm:$0xff]  }
 0x398   :  { %7231 = vmatpush1.bf16.msra.mxu0 %v9472_v34  ;;  %7068 = vmatprep.subr.bf16.mxu1 %v9477_v47  ;;  %v9558_v34 = vld [vmem:[#allocation6 + $0x1064] ss:$56 sps:$4 sm:$0xff]   ;;  %v9553_v47 = vld [vmem:[#allocation6 + $0x1058] ss:$56 sps:$4 sm:$0xff]  }
 0x399   :  { %7232 = vmatprep.subr.bf16.mxu0 %v9480_v50  ;;  %v9556_v50 = vld [vmem:[#allocation6 + $0x1060] ss:$56 sps:$4 sm:$0xff]  }
 0x39b   :  { %7069 = vmatpush1.bf16.msra.mxu1 %v9475_v58  ;;  %v9561_v58 = vld [vmem:[#allocation6 + $0x10cc] ss:$56 sps:$4 sm:$0xff]  }
 0x39c   :  { %7233 = vmatpush1.bf16.msra.mxu0 %v9478_v43  ;;  %7070 = vmatprep.subr.bf16.mxu1 %v9483_v10  ;;  %v9564_v43 = vld [vmem:[#allocation6 + $0x10d4] ss:$56 sps:$4 sm:$0xff]   ;;  %v9559_v10 = vld [vmem:[#allocation6 + $0x10c8] ss:$56 sps:$4 sm:$0xff]  }
 0x39d   :  { %7234 = vmatprep.subr.bf16.mxu0 %v9486_v19  ;;  %v9562_v19 = vld [vmem:[#allocation6 + $0x10d0] ss:$56 sps:$4 sm:$0xff]  }
 0x39f   :  { %7071 = vmatpush1.bf16.msra.mxu1 %v9481_v2  ;;  %v9567_v2 = vld [vmem:[#allocation6 + $0x113c] ss:$56 sps:$4 sm:$0xff]  }
 0x3a0   :  { %7235 = vmatpush1.bf16.msra.mxu0 %v9484_v3  ;;  %7072 = vmatprep.subr.bf16.mxu1 %v9489_v54  ;;  %v9570_v3 = vld [vmem:[#allocation6 + $0x1144] ss:$56 sps:$4 sm:$0xff]   ;;  %v9565_v54 = vld [vmem:[#allocation6 + $0x1138] ss:$56 sps:$4 sm:$0xff]  }
 0x3a1   :  { %7236 = vmatprep.subr.bf16.mxu0 %v9492_v11  ;;  %v9568_v11 = vld [vmem:[#allocation6 + $0x1140] ss:$56 sps:$4 sm:$0xff]  }
 0x3a3   :  { %7073 = vmatpush1.bf16.msra.mxu1 %v9487_v41  ;;  %v9573_v41 = vld [vmem:[#allocation6 + $0x11ac] ss:$56 sps:$4 sm:$0xff]  }
 0x3a4   :  { %7237 = vmatpush1.bf16.msra.mxu0 %v9490_v33  ;;  %7074 = vmatprep.subr.bf16.mxu1 %v9495_v26  ;;  %v9576_v33 = vld [vmem:[#allocation6 + $0x11b4] ss:$56 sps:$4 sm:$0xff]   ;;  %v9571_v26 = vld [vmem:[#allocation6 + $0x11a8] ss:$56 sps:$4 sm:$0xff]  }
 0x3a5   :  { %7238 = vmatprep.subr.bf16.mxu0 %v9498_v57  ;;  %v9574_v57 = vld [vmem:[#allocation6 + $0x11b0] ss:$56 sps:$4 sm:$0xff]  }
 0x3a7   :  { %7075 = vmatpush1.bf16.msra.mxu1 %v9493_v13  ;;  %v9579_v13 = vld [vmem:[#allocation6 + $0x121c] ss:$56 sps:$4 sm:$0xff]  }
 0x3a8   :  { %7239 = vmatpush1.bf16.msra.mxu0 %v9496_v29  ;;  %7076 = vmatprep.subr.bf16.mxu1 %v9501_v40  ;;  %v9582_v29 = vld [vmem:[#allocation6 + $0x1224] ss:$56 sps:$4 sm:$0xff]   ;;  %v9577_v40 = vld [vmem:[#allocation6 + $0x1218] ss:$56 sps:$4 sm:$0xff]  }
 0x3a9   :  { %7240 = vmatprep.subr.bf16.mxu0 %v9504_v12  ;;  %v9580_v12 = vld [vmem:[#allocation6 + $0x1220] ss:$56 sps:$4 sm:$0xff]  }
 0x3ab   :  { %7077 = vmatpush1.bf16.msra.mxu1 %v9499_v28  ;;  %v9585_v28 = vld [vmem:[#allocation6 + $0x128c] ss:$56 sps:$4 sm:$0xff]  }
 0x3ac   :  { %7241 = vmatpush1.bf16.msra.mxu0 %v9502_v32  ;;  %7078 = vmatprep.subr.bf16.mxu1 %v9507_v38  ;;  %v9588_v32 = vld [vmem:[#allocation6 + $0x1294] ss:$56 sps:$4 sm:$0xff]   ;;  %v9583_v38 = vld [vmem:[#allocation6 + $0x1288] ss:$56 sps:$4 sm:$0xff]  }
 0x3ad   :  { %7242 = vmatprep.subr.bf16.mxu0 %v9510_v15  ;;  %v9586_v15 = vld [vmem:[#allocation6 + $0x1290] ss:$56 sps:$4 sm:$0xff]  }
 0x3af   :  { %7079 = vmatpush1.bf16.msra.mxu1 %v9505_v14  ;;  %v9591_v14 = vld [vmem:[#allocation6 + $0x12fc] ss:$56 sps:$4 sm:$0xff]  }
 0x3b0   :  { %7243 = vmatpush1.bf16.msra.mxu0 %v9508_v53  ;;  %7080 = vmatprep.subr.bf16.mxu1 %v9513_v24  ;;  %v9594_v53 = vld [vmem:[#allocation6 + $0x1304] ss:$56 sps:$4 sm:$0xff]   ;;  %v9589_v24 = vld [vmem:[#allocation6 + $0x12f8] ss:$56 sps:$4 sm:$0xff]  }
 0x3b1   :  { %7244 = vmatprep.subr.bf16.mxu0 %v9516_v20  ;;  %v9592_v20 = vld [vmem:[#allocation6 + $0x1300] ss:$56 sps:$4 sm:$0xff]  }
 0x3b3   :  { %7081 = vmatpush1.bf16.msra.mxu1 %v9511_v62  ;;  %v9597_v62 = vld [vmem:[#allocation6 + $0x136c] ss:$56 sps:$4 sm:$0xff]  }
 0x3b4   :  { %7245 = vmatpush1.bf16.msra.mxu0 %v9514_v63  ;;  %7082 = vmatprep.subr.bf16.mxu1 %v9519_v31  ;;  %v9600_v63 = vld [vmem:[#allocation6 + $0x1374] ss:$56 sps:$4 sm:$0xff]   ;;  %v9595_v31 = vld [vmem:[#allocation6 + $0x1368] ss:$56 sps:$4 sm:$0xff]  }
 0x3b5   :  { %7246 = vmatprep.subr.bf16.mxu0 %v9522_v30  ;;  %v9598_v30 = vld [vmem:[#allocation6 + $0x1370] ss:$56 sps:$4 sm:$0xff]  }
 0x3b7   :  { %7083 = vmatpush1.bf16.msra.mxu1 %v9517_v0  ;;  %v9603_v0 = vld [vmem:[#allocation6 + $0x13dc] ss:$56 sps:$4 sm:$0xff]  }
 0x3b8   :  { %7247 = vmatpush1.bf16.msra.mxu0 %v9520_v23  ;;  %7093 = vmatprep.subr.bf16.mxu1 %v9525_v27  ;;  %v9606_v23 = vld [vmem:[#allocation6 + $0x13e4] ss:$56 sps:$4 sm:$0xff]   ;;  %v9601_v27 = vld [vmem:[#allocation6 + $0x13d8] ss:$56 sps:$4 sm:$0xff]  }
 0x3b9   :  { %7257 = vmatprep.subr.bf16.mxu0 %v9528_v25  ;;  %v9604_v25 = vld [vmem:[#allocation6 + $0x13e0] ss:$56 sps:$4 sm:$0xff]  }
 0x3ba   :  { %7085 = vmatmul.mubr.bf16.vlgmr.msra.gmra.mrb[12].mxu1 %v10516_v59 }
 0x3bb   :  { %7249 = vmatmul.mubr.bf16.vlgmr.msra.gmra.mrb[12].mxu0 %v10516_v59  ;;  %7094 = vmatpush1.bf16.msra.mxu1 %v9523_v48  ;;  %v9546_v59 = vld [vmem:[#allocation6 + $0xf84] ss:$56 sps:$4 sm:$0xff]  }
 0x3bc   :  { %7125 = vmatprep.mubr.bf16.mxu1 %v10502_v39  ;;  %7258 = vmatpush1.bf16.msra.mxu0 %v9526_v55  ;;  %v9609_v48 = vld [vmem:[#allocation6 + $0x144c] ss:$56 sps:$4 sm:$0xff]  }
 0x3bd   :  { %7289 = vmatprep.mubr.bf16.mxu0 %v10502_v39  ;;  %7095 = vmatprep.subr.bf16.mxu1 %v9531_v22  ;;  %v9547_v39 = vld [vmem:[#allocation6 + $0xfe8] ss:$56 sps:$4 sm:$0xff]   ;;  %v9612_v55 = vld [vmem:[#allocation6 + $0x1454] ss:$56 sps:$4 sm:$0xff]  }
 0x3be   :  { %7259 = vmatprep.subr.bf16.mxu0 %v9534_v5  ;;  %v9607_v22 = vld [vmem:[#allocation6 + $0x1448] ss:$56 sps:$4 sm:$0xff]  }
 0x3bf   :  { %7096 = vmatpush1.bf16.msra.mxu1 %v9529_v49  ;;  %v9610_v5 = vld [vmem:[#allocation6 + $0x1450] ss:$56 sps:$4 sm:$0xff]   ;;  %v9615_v49 = vld [vmem:[#allocation6 + $0x14bc] ss:$56 sps:$4 sm:$0xff]  }
 0x3c0   :  { %7260 = vmatpush1.bf16.msra.mxu0 %v9532_v35  ;;  %7097 = vmatprep.subr.bf16.mxu1 %v9537_v18  ;;  %v9618_v35 = vld [vmem:[#allocation6 + $0x14c4] ss:$56 sps:$4 sm:$0xff]   ;;  %v9613_v18 = vld [vmem:[#allocation6 + $0x14b8] ss:$56 sps:$4 sm:$0xff]  }
 0x3c1   :  { %7261 = vmatprep.subr.bf16.mxu0 %v9540_v37  ;;  %v9616_v37 = vld [vmem:[#allocation6 + $0x14c0] ss:$56 sps:$4 sm:$0xff]  }
 0x3c3   :  { %7098 = vmatpush1.bf16.msra.mxu1 %v9535_v52  ;;  %v9621_v52 = vld [vmem:[#allocation6 + $0x152c] ss:$56 sps:$4 sm:$0xff]  }
 0x3c4   :  { %7262 = vmatpush1.bf16.msra.mxu0 %v9538_v21  ;;  %7099 = vmatprep.subr.bf16.mxu1 %v9543_v9  ;;  %v9624_v21 = vld [vmem:[#allocation6 + $0x1534] ss:$56 sps:$4 sm:$0xff]   ;;  %v9619_v9 = vld [vmem:[#allocation6 + $0x1528] ss:$56 sps:$4 sm:$0xff]  }
 0x3c5   :  { %7263 = vmatprep.subr.bf16.mxu0 %v9546_v59  ;;  %v9622_v59 = vld [vmem:[#allocation6 + $0x1530] ss:$56 sps:$4 sm:$0xff]  }
 0x3c7   :  { %7100 = vmatpush1.bf16.msra.mxu1 %v9541_v51  ;;  %v9627_v51 = vld [vmem:[#allocation6 + $0x159c] ss:$56 sps:$4 sm:$0xff]  }
 0x3c8   :  { %7264 = vmatpush1.bf16.msra.mxu0 %v9544_v46  ;;  %7101 = vmatprep.subr.bf16.mxu1 %v9549_v6  ;;  %v9630_v46 = vld [vmem:[#allocation6 + $0x15a4] ss:$56 sps:$4 sm:$0xff]   ;;  %v9625_v6 = vld [vmem:[#allocation6 + $0x1598] ss:$56 sps:$4 sm:$0xff]  }
 0x3c9   :  { %7265 = vmatprep.subr.bf16.mxu0 %v9552_v16  ;;  %v9628_v16 = vld [vmem:[#allocation6 + $0x15a0] ss:$56 sps:$4 sm:$0xff]  }
 0x3cb   :  { %7102 = vmatpush1.bf16.msra.mxu1 %v9547_v39  ;;  %v9633_v39 = vld [vmem:[#allocation6 + $0x160c] ss:$56 sps:$4 sm:$0xff]  }
 0x3cc   :  { %7266 = vmatpush1.bf16.msra.mxu0 %v9550_v4  ;;  %7103 = vmatprep.subr.bf16.mxu1 %v9555_v1  ;;  %v9636_v4 = vld [vmem:[#allocation6 + $0x1614] ss:$56 sps:$4 sm:$0xff]   ;;  %v9631_v1 = vld [vmem:[#allocation6 + $0x1608] ss:$56 sps:$4 sm:$0xff]  }
 0x3cd   :  { %7267 = vmatprep.subr.bf16.mxu0 %v9558_v34  ;;  %v9634_v34 = vld [vmem:[#allocation6 + $0x1610] ss:$56 sps:$4 sm:$0xff]  }
 0x3cf   :  { %7104 = vmatpush1.bf16.msra.mxu1 %v9553_v47  ;;  %v9639_v47 = vld [vmem:[#allocation6 + $0x167c] ss:$56 sps:$4 sm:$0xff]  }
 0x3d0   :  { %7268 = vmatpush1.bf16.msra.mxu0 %v9556_v50  ;;  %7105 = vmatprep.subr.bf16.mxu1 %v9561_v58  ;;  %v9637_v50 = vld [vmem:[#allocation6 + $0x1678] ss:$56 sps:$4 sm:$0xff]  }
 0x3d1   :  { %7269 = vmatprep.subr.bf16.mxu0 %v9564_v43  ;;  %v9640_v58 = vld [vmem:[#allocation6 + $0x1680] ss:$56 sps:$4 sm:$0xff]   ;;  %v9645_v43 = vld [vmem:[#allocation6 + $0x16ec] ss:$56 sps:$4 sm:$0xff]  }
 0x3d3   :  { %7106 = vmatpush1.bf16.msra.mxu1 %v9559_v10  ;;  %v9648_v10 = vld [vmem:[#allocation6 + $0x16f4] ss:$56 sps:$4 sm:$0xff]  }
 0x3d4   :  { %7270 = vmatpush1.bf16.msra.mxu0 %v9562_v19  ;;  %7107 = vmatprep.subr.bf16.mxu1 %v9567_v2  ;;  %v9643_v19 = vld [vmem:[#allocation6 + $0x16e8] ss:$56 sps:$4 sm:$0xff]   ;;  %v1671_v2 = vsub.s32 7, %v10538_v61 }
 0x3d5   :  { %7271 = vmatprep.subr.bf16.mxu0 %v9570_v3  ;;  %v9646_v3 = vld [vmem:[#allocation6 + $0x16f0] ss:$56 sps:$4 sm:$0xff]  }
 0x3d7   :  { %7108 = vmatpush1.bf16.msra.mxu1 %v9565_v54  ;;  %v10592_v54 = vld [vmem:[#allocation8 + $0x8] sm:$0x3f] }
 0x3d8   :  { %7272 = vmatpush1.bf16.msra.mxu0 %v9568_v11  ;;  %7109 = vmatprep.subr.bf16.mxu1 %v9573_v41  ;;  %v9651_v11 = vld [vmem:[#allocation6 + $0x175c] ss:$56 sps:$4 sm:$0xff]  }
 0x3d9   :  { %7273 = vmatprep.subr.bf16.mxu0 %v9576_v33  ;;  %v9654_v41 = vld [vmem:[#allocation6 + $0x1764] ss:$56 sps:$4 sm:$0xff]  }
 0x3da   :  { %v9716_v33 = vld [vmem:[#allocation8] sm:$0xff] }
 0x3db   :  { %7110 = vmatpush1.bf16.msra.mxu1 %v9571_v26 }
 0x3dc   :  { %7274 = vmatpush1.bf16.msra.mxu0 %v9574_v57  ;;  %7111 = vmatprep.subr.bf16.mxu1 %v9579_v13  ;;  %v1676_v57 = vrot.slane %v10592_v54, %v1643_v8  ;;  %v1672_v13 = vrot.slane %v9716_v33, %v1671_v2  ;;  %v9703_v2 = vld [vmem:[#allocation6 + $0x1b48] ss:$56 sps:$4 sm:$0xff]  }
 0x3dd   :  { %7275 = vmatprep.subr.bf16.mxu0 %v9582_v29  ;;  %v9649_v29 = vld [vmem:[#allocation6 + $0x1758] ss:$56 sps:$4 sm:$0xff]  }
 0x3df   :  { %7112 = vmatpush1.bf16.msra.mxu1 %v9577_v40  ;;  %v1680_v40 = vrot.slane %v10592_v54, %v1647_v36 }
 0x3e0   :  { %7276 = vmatpush1.bf16.msra.mxu0 %v9580_v12  ;;  %7113 = vmatprep.subr.bf16.mxu1 %v9585_v28  ;;  %v9652_v12 = vld [vmem:[#allocation6 + $0x1760] ss:$56 sps:$4 sm:$0xff]   ;;  %v9657_v28 = vld [vmem:[#allocation6 + $0x17cc] ss:$56 sps:$4 sm:$0xff]  }
 0x3e1   :  { %7277 = vmatprep.subr.bf16.mxu0 %v9588_v32 }
 0x3e3   :  { %7114 = vmatpush1.bf16.msra.mxu1 %v9583_v38  ;;  %v9660_v38 = vld [vmem:[#allocation6 + $0x17d4] ss:$56 sps:$4 sm:$0xff]  }
 0x3e4   :  { %7278 = vmatpush1.bf16.msra.mxu0 %v9586_v15  ;;  %7115 = vmatprep.subr.bf16.mxu1 %v9591_v14 }
 0x3e5   :  { %7279 = vmatprep.subr.bf16.mxu0 %v9594_v53 }
 0x3e7   :  { %7116 = vmatpush1.bf16.msra.mxu1 %v9589_v24 }
 0x3e8   :  { %7280 = vmatpush1.bf16.msra.mxu0 %v9592_v20  ;;  %7117 = vmatprep.subr.bf16.mxu1 %v9597_v62 }
 0x3e9   :  { %7281 = vmatprep.subr.bf16.mxu0 %v9600_v63  ;;  %v9655_v63 = vld [vmem:[#allocation6 + $0x17c8] ss:$56 sps:$4 sm:$0xff]  }
 0x3eb   :  { %7118 = vmatpush1.bf16.msra.mxu1 %v9595_v31 }
 0x3ec   :  { %7282 = vmatpush1.bf16.msra.mxu0 %v9598_v30  ;;  %7119 = vmatprep.subr.bf16.mxu1 %v9603_v0  ;;  %v9658_v0 = vld [vmem:[#allocation6 + $0x17d0] ss:$56 sps:$4 sm:$0xff]  }
 0x3ed   :  { %7283 = vmatprep.subr.bf16.mxu0 %v9606_v23  ;;  %v9663_v23 = vld [vmem:[#allocation6 + $0x183c] ss:$56 sps:$4 sm:$0xff]  }
 0x3ef   :  { %7120 = vmatpush1.bf16.msra.mxu1 %v9601_v27 }
 0x3f0   :  { %7284 = vmatpush1.bf16.msra.mxu0 %v9604_v25  ;;  %7121 = vmatprep.subr.bf16.mxu1 %v9609_v48  ;;  %v9666_v25 = vld [vmem:[#allocation6 + $0x1844] ss:$56 sps:$4 sm:$0xff]   ;;  %v9661_v48 = vld [vmem:[#allocation6 + $0x1838] ss:$56 sps:$4 sm:$0xff]  }
 0x3f1   :  { %7285 = vmatprep.subr.bf16.mxu0 %v9612_v55  ;;  %v9664_v55 = vld [vmem:[#allocation6 + $0x1840] ss:$56 sps:$4 sm:$0xff]  }
 0x3f3   :  { %7122 = vmatpush1.bf16.msra.mxu1 %v9607_v22  ;;  %v9669_v22 = vld [vmem:[#allocation6 + $0x18ac] ss:$56 sps:$4 sm:$0xff]  }
 0x3f4   :  { %7286 = vmatpush1.bf16.msra.mxu0 %v9610_v5  ;;  %7123 = vmatprep.subr.bf16.mxu1 %v9615_v49  ;;  %v9672_v5 = vld [vmem:[#allocation6 + $0x18b4] ss:$56 sps:$4 sm:$0xff]   ;;  %v9667_v49 = vld [vmem:[#allocation6 + $0x18a8] ss:$56 sps:$4 sm:$0xff]  }
 0x3f5   :  { %7287 = vmatprep.subr.bf16.mxu0 %v9618_v35  ;;  %v9670_v35 = vld [vmem:[#allocation6 + $0x18b0] ss:$56 sps:$4 sm:$0xff]  }
 0x3f7   :  { %7124 = vmatpush1.bf16.msra.mxu1 %v9613_v18  ;;  %v9675_v18 = vld [vmem:[#allocation6 + $0x191c] ss:$56 sps:$4 sm:$0xff]  }
 0x3f8   :  { %7288 = vmatpush1.bf16.msra.mxu0 %v9616_v37  ;;  %7134 = vmatprep.subr.bf16.mxu1 %v9621_v52  ;;  %v9678_v37 = vld [vmem:[#allocation6 + $0x1924] ss:$56 sps:$4 sm:$0xff]   ;;  %v9673_v52 = vld [vmem:[#allocation6 + $0x1918] ss:$56 sps:$4 sm:$0xff]  }
 0x3f9   :  { %7298 = vmatprep.subr.bf16.mxu0 %v9624_v21  ;;  %v9676_v21 = vld [vmem:[#allocation6 + $0x1920] ss:$56 sps:$4 sm:$0xff]  }
 0x3fa   :  { %7126 = vmatmul.mubr.bf16.vlgmr.msra.gmra.mrb[12].mxu1 %v10500_v42 }
 0x3fb   :  { %7290 = vmatmul.mubr.bf16.vlgmr.msra.gmra.mrb[12].mxu0 %v10500_v42  ;;  %7135 = vmatpush1.bf16.msra.mxu1 %v9619_v9  ;;  %v9642_v42 = vld [vmem:[#allocation6 + $0x1684] ss:$56 sps:$4 sm:$0xff]  }
 0x3fc   :  { %7166 = vmatprep.mubr.bf16.mxu1 %v10509_v7  ;;  %7299 = vmatpush1.bf16.msra.mxu0 %v9622_v59  ;;  %v9681_v9 = vld [vmem:[#allocation6 + $0x198c] ss:$56 sps:$4 sm:$0xff]  }
 0x3fd   :  { %7330 = vmatprep.mubr.bf16.mxu0 %v10509_v7  ;;  %7136 = vmatprep.subr.bf16.mxu1 %v9627_v51  ;;  %v1667_v7 = vsub.s32 6, %v10538_v61  ;;  %v9684_v59 = vld [vmem:[#allocation6 + $0x1994] ss:$56 sps:$4 sm:$0xff]   ;;  %v9679_v51 = vld [vmem:[#allocation6 + $0x1988] ss:$56 sps:$4 sm:$0xff]  }
 0x3fe   :  { %7300 = vmatprep.subr.bf16.mxu0 %v9630_v46  ;;  %v9682_v46 = vld [vmem:[#allocation6 + $0x1990] ss:$56 sps:$4 sm:$0xff]  }
 0x3ff   :  { %7137 = vmatpush1.bf16.msra.mxu1 %v9625_v6  ;;  %v1668_v26 = vrot.slane %v9716_v33, %v1667_v7  ;;  %v9687_v6 = vld [vmem:[#allocation6 + $0x19fc] ss:$56 sps:$4 sm:$0xff]   ;;  %v9705_v7 = vld [vmem:[#allocation6 + $0x1b4c] ss:$56 sps:$4 sm:$0xff]   ;;  %v9709_v33 = vld [vmem:[#allocation6 + $0x1bb8] ss:$56 sps:$4 sm:$0xff]  }
 0x400   :  { %7301 = vmatpush1.bf16.msra.mxu0 %v9628_v16  ;;  %7138 = vmatprep.subr.bf16.mxu1 %v9633_v39  ;;  %v9690_v16 = vld [vmem:[#allocation6 + $0x1a04] ss:$56 sps:$4 sm:$0xff]   ;;  %v9685_v39 = vld [vmem:[#allocation6 + $0x19f8] ss:$56 sps:$4 sm:$0xff]  }
 0x401   :  { %7302 = vmatprep.subr.bf16.mxu0 %v9636_v4  ;;  %v9688_v4 = vld [vmem:[#allocation6 + $0x1a00] ss:$56 sps:$4 sm:$0xff]  }
 0x403   :  { %7139 = vmatpush1.bf16.msra.mxu1 %v9631_v1  ;;  %v9693_v1 = vld [vmem:[#allocation6 + $0x1a6c] ss:$56 sps:$4 sm:$0xff]  }
 0x404   :  { %7303 = vmatpush1.bf16.msra.mxu0 %v9634_v34  ;;  %7140 = vmatprep.subr.bf16.mxu1 %v9639_v47  ;;  %v9696_v34 = vld [vmem:[#allocation6 + $0x1a74] ss:$56 sps:$4 sm:$0xff]   ;;  %v9691_v47 = vld [vmem:[#allocation6 + $0x1a68] ss:$56 sps:$4 sm:$0xff]  }
 0x405   :  { %7304 = vmatprep.subr.bf16.mxu0 %v9642_v42  ;;  %v9694_v42 = vld [vmem:[#allocation6 + $0x1a70] ss:$56 sps:$4 sm:$0xff]  }
 0x407   :  { %7141 = vmatpush1.bf16.msra.mxu1 %v9637_v50  ;;  %v9699_v50 = vld [vmem:[#allocation6 + $0x1adc] ss:$56 sps:$4 sm:$0xff]  }
 0x408   :  { %7305 = vmatpush1.bf16.msra.mxu0 %v9640_v58  ;;  %7142 = vmatprep.subr.bf16.mxu1 %v9645_v43  ;;  %v9702_v58 = vld [vmem:[#allocation6 + $0x1ae4] ss:$56 sps:$4 sm:$0xff]   ;;  %v9697_v43 = vld [vmem:[#allocation6 + $0x1ad8] ss:$56 sps:$4 sm:$0xff]  }
 0x409   :  { %7306 = vmatprep.subr.bf16.mxu0 %v9648_v10  ;;  %v9700_v10 = vld [vmem:[#allocation6 + $0x1ae0] ss:$56 sps:$4 sm:$0xff]  }
 0x40b   :  { %7143 = vmatpush1.bf16.msra.mxu1 %v9643_v19  ;;  %v9708_v19 = vld [vmem:[#allocation6 + $0x1b54] ss:$56 sps:$4 sm:$0xff]  }
 0x40c   :  { %7307 = vmatpush1.bf16.msra.mxu0 %v9646_v3  ;;  %7144 = vmatprep.subr.bf16.mxu1 %v9651_v11  ;;  %v9706_v3 = vld [vmem:[#allocation6 + $0x1b50] ss:$56 sps:$4 sm:$0xff]   ;;  %v9711_v11 = vld [vmem:[#allocation6 + $0x1bbc] ss:$56 sps:$4 sm:$0xff]  }
 0x40d   :  { %v6840_v32 = vpop.f32.mrb[8].mxu1  ;;  %7308 = vmatprep.subr.bf16.mxu0 %v9654_v41  ;;  %v9714_v41 = vld [vmem:[#allocation6 + $0x1bc4] ss:$56 sps:$4 sm:$0xff]  }
 0x40e   :  { %v8273_v15 = vadd.f32 %v6840_v32, %v1668_v26  ;;  %v7004_v14 = vpop.f32.mrb[8].mxu0  ;;  %v6842_v53 = vpop.f32.mrb[9].mxu1  ;;  %v9712_v26 = vld [vmem:[#allocation6 + $0x1bc0] ss:$56 sps:$4 sm:$0xff]  }
 0x40f   :  { %v8275_v24 = vadd.f32 %v7004_v14, %v1676_v57  ;;  %v8274_v20 = vadd.f32 %v6842_v53, %v1672_v13  ;;  %v7006_v62 = vpop.f32.mrb[9].mxu0  ;;  %v6844_v8 = vpop.f32.mrb[10].mxu1  ;;  %7145 = vmatpush1.bf16.msra.mxu1 %v9649_v29  ;;  %v1684_v57 = vrot.slane %v10592_v54, %v1651_v44  ;;  %v1692_v13 = vrot.slane %v10592_v54, %v1659_v60 }
 0x410   :  { %7345 = vst [vmem:[#allocation9 + $0x30] sm:$0xff] %v8273_v15  ;;  %v8276_v31 = vadd.f32 %v7006_v62, %v1680_v40  ;;  %v7008_v30 = vpop.f32.mrb[10].mxu0  ;;  %7309 = vmatpush1.bf16.msra.mxu0 %v9652_v12  ;;  %v6845_v36 = vpop.f32.mrb[11].mxu1  ;;  %7146 = vmatprep.subr.bf16.mxu1 %v9657_v28  ;;  %v1688_v29 = vrot.slane %v10592_v54, %v1655_v45 }
 0x411   :  { %7347 = vst [vmem:[#allocation9 + $0x40] sm:$0xff] %v8275_v24  ;;  %7346 = vst [vmem:[#allocation9 + $0x38] sm:$0xff] %v8274_v20  ;;  %v7009_v27 = vpop.f32.mrb[11].mxu0  ;;  %7310 = vmatprep.subr.bf16.mxu0 %v9660_v38  ;;  %v1696_v40 = vrot.slane %v10592_v54, %v1663_v56 }
 0x412   :  { %7348 = vst [vmem:[#allocation9 + $0x48] sm:$0xff] %v8276_v31 }
 0x413   :  { %7147 = vmatpush1.bf16.msra.mxu1 %v9655_v63 }
 0x414   :  { %7311 = vmatpush1.bf16.msra.mxu0 %v9658_v0  ;;  %7148 = vmatprep.subr.bf16.mxu1 %v9663_v23 }
 0x415   :  { %7312 = vmatprep.subr.bf16.mxu0 %v9666_v25 }
 0x417   :  { %7149 = vmatpush1.bf16.msra.mxu1 %v9661_v48 }
 0x418   :  { %7313 = vmatpush1.bf16.msra.mxu0 %v9664_v55  ;;  %7150 = vmatprep.subr.bf16.mxu1 %v9669_v22 }
 0x419   :  { %7314 = vmatprep.subr.bf16.mxu0 %v9672_v5 }
 0x41b   :  { %7151 = vmatpush1.bf16.msra.mxu1 %v9667_v49 }
 0x41c   :  { %7315 = vmatpush1.bf16.msra.mxu0 %v9670_v35  ;;  %7152 = vmatprep.subr.bf16.mxu1 %v9675_v18 }
 0x41d   :  { %7316 = vmatprep.subr.bf16.mxu0 %v9678_v37 }
 0x41f   :  { %7153 = vmatpush1.bf16.msra.mxu1 %v9673_v52 }
 0x420   :  { %7317 = vmatpush1.bf16.msra.mxu0 %v9676_v21  ;;  %7154 = vmatprep.subr.bf16.mxu1 %v9681_v9 }
 0x421   :  { %7318 = vmatprep.subr.bf16.mxu0 %v9684_v59 }
 0x423   :  { %7155 = vmatpush1.bf16.msra.mxu1 %v9679_v51 }
 0x424   :  { %7319 = vmatpush1.bf16.msra.mxu0 %v9682_v46  ;;  %7156 = vmatprep.subr.bf16.mxu1 %v9687_v6 }
 0x425   :  { %7320 = vmatprep.subr.bf16.mxu0 %v9690_v16 }
 0x427   :  { %7157 = vmatpush1.bf16.msra.mxu1 %v9685_v39 }
 0x428   :  { %7321 = vmatpush1.bf16.msra.mxu0 %v9688_v4  ;;  %7158 = vmatprep.subr.bf16.mxu1 %v9693_v1 }
 0x429   :  { %7322 = vmatprep.subr.bf16.mxu0 %v9696_v34 }
 0x42b   :  { %7159 = vmatpush1.bf16.msra.mxu1 %v9691_v47 }
 0x42c   :  { %7323 = vmatpush1.bf16.msra.mxu0 %v9694_v42  ;;  %7160 = vmatprep.subr.bf16.mxu1 %v9699_v50 }
 0x42d   :  { %7324 = vmatprep.subr.bf16.mxu0 %v9702_v58 }
 0x42f   :  { %7161 = vmatpush1.bf16.msra.mxu1 %v9697_v43 }
 0x430   :  { %7325 = vmatpush1.bf16.msra.mxu0 %v9700_v10  ;;  %7162 = vmatprep.subr.bf16.mxu1 %v9705_v7 }
 0x431   :  { %7326 = vmatprep.subr.bf16.mxu0 %v9708_v19 }
 0x433   :  { %7163 = vmatpush1.bf16.msra.mxu1 %v9703_v2 }
 0x434   :  { %7327 = vmatpush1.bf16.msra.mxu0 %v9706_v3  ;;  %7164 = vmatprep.subr.bf16.mxu1 %v9711_v11 }
 0x435   :  { %7328 = vmatprep.subr.bf16.mxu0 %v9714_v41 }
 0x437   :  { %7165 = vmatpush1.bf16.msra.mxu1 %v9709_v33 }
 0x438   :  { %7329 = vmatpush1.bf16.msra.mxu0 %v9712_v26 }
 0x43a   :  { %7167 = vmatmul.mubr.bf16.vlgmr.msra.gmra.mrb[12].mxu1 %v10520_v17 }
 0x43b   :  { %7331 = vmatmul.mubr.bf16.vlgmr.msra.gmra.mrb[12].mxu0 %v10520_v17 }
 0x50d   :  { %v7168_v12 = vpop.f32.mrb[12].mxu1 }
 0x50e   :  { %v8277_v17 = vadd.f32 %v7168_v12, %v1684_v57  ;;  %v7332_v28 = vpop.f32.mrb[12].mxu0  ;;  %v7170_v32 = vpop.f32.mrb[13].mxu1 }
 0x50f   :  { %v8279_v38 = vadd.f32 %v7332_v28, %v1692_v13  ;;  %v8278_v44 = vadd.f32 %v7170_v32, %v1688_v29  ;;  %v7334_v15 = vpop.f32.mrb[13].mxu0  ;;  %v7172_v14 = vpop.f32.mrb[14].mxu1 }
 0x510   :  { %7349 = vst [vmem:[#allocation9 + $0x50] sm:$0xff] %v8277_v17  ;;  %v8280_v60 = vadd.f32 %v7334_v15, %v1696_v40  ;;  %v7336_v53 = vpop.f32.mrb[14].mxu0  ;;  %v7173_v24 = vpop.f32.mrb[15].mxu1 }
 0x511   :  { %7351 = vst [vmem:[#allocation9 + $0x60] sm:$0xff] %v8279_v38  ;;  %7350 = vst [vmem:[#allocation9 + $0x58] sm:$0xff] %v8278_v44  ;;  %v7337_v61 = vpop.f32.mrb[15].mxu0 }
 0x512   :  { %7352 = vst [vmem:[#allocation9 + $0x68] sm:$0xff] %v8280_v60 }
 0x513   :  { %9794 = shalt.err (!%p9791_p0)
}
 0x514   :  { %s9795_s6 = scalar_lea.hbm %s10630_s4, 1792 }
 0x515   :  { %p9796_p1 = scmp.ne.s32.totalorder %s10630_s4, %s9795_s6  ;;  %p9799_p2 = scmp.lt.u32.totalorder %s9795_s6, %s10630_s4 }
 0x517   :  { %p9801_p3 = pnand %p9799_p2, %p9796_p1 }
 0x519   :  { %9804 = shalt.err (!%p9801_p3)
}
 0x51a   :  { %7362 = dma.vmem_to_hbm [thread:$0]  %s7360_s3, 1792, %s10630_s4, [#allocation5]  }
 0x51b   :  { %9809 = dma.done.wait [#allocation5], 1792  }
 0x51c   :  { %9810 = vsyncadd [#allocation5], 4294965504 }
 0x51d   :  { %7366 = vsyncpa [#allocation4], 1 }
 0x51e   :  { %7367 = vsyncpa [#allocation7], 1 }
 0x51f   :  { %7368 = vsyncpa [#allocation5], 1 }

</bundles_post_ra>
